<compile_context>
chip_gen: v6e
topology: v6e:2x2x1
jax: 0.10.0
libtpu: 0.0.40
codegen_flags: <defaults>
</compile_context>

<pallas_src>
import functools

import jax
import jax.numpy as jnp
from jax.experimental import pallas as pl
from jax.experimental.pallas import tpu as pltpu


def _round_up(v, m):
    return (v + m - 1) // m * m


# ----------------------------------------------------------------------------
# Kernel 1: tiled matmul + bias (CNN backbone stand-in projection).
# ----------------------------------------------------------------------------
def _matmul_bias_kernel(x_ref, w_ref, b_ref, o_ref, acc_ref):
    @pl.when(pl.program_id(2) == 0)
    def _():
        acc_ref[...] = jnp.zeros_like(acc_ref)

    acc_ref[...] += jnp.dot(x_ref[...], w_ref[...],
                            preferred_element_type=jnp.float32)

    @pl.when(pl.program_id(2) == pl.num_programs(2) - 1)
    def _():
        o_ref[...] = acc_ref[...] + b_ref[...]


def matmul_bias(x, w, b, *, tm=256, tn=512, tk=256, in_dtype=jnp.bfloat16):
    """(M,K) @ (K,N) + (1,N): bf16 MXU inputs, f32 accumulation, K streamed."""
    M, K = x.shape
    N = w.shape[1]
    # Tiles sized so the double-buffered footprint stays well under the scoped
    # VMEM default on every generation (incl. v7x's smaller 64 MiB VMEM), while
    # keeping the output stores lane-dense (tn multiple of 128).
    tm = min(tm, _round_up(M, 8))
    tn = min(tn, _round_up(N, 128))
    tk = min(tk, _round_up(K, 128))
    Mp, Kp, Np = _round_up(M, tm), _round_up(K, tk), _round_up(N, tn)
    xp = jnp.pad(x, ((0, Mp - M), (0, Kp - K))).astype(in_dtype)
    wp = jnp.pad(w, ((0, Kp - K), (0, Np - N))).astype(in_dtype)
    bp = jnp.pad(b, ((0, 0), (0, Np - N))).astype(jnp.float32)
    out = pl.pallas_call(
        _matmul_bias_kernel,
        out_shape=jax.ShapeDtypeStruct((Mp, Np), jnp.float32),
        grid=(Mp // tm, Np // tn, Kp // tk),
        in_specs=[
            pl.BlockSpec((tm, tk), lambda i, j, k: (i, k)),
            pl.BlockSpec((tk, tn), lambda i, j, k: (k, j)),
            pl.BlockSpec((1, tn), lambda i, j, k: (0, j)),
        ],
        out_specs=pl.BlockSpec((tm, tn), lambda i, j, k: (i, j)),
        scratch_shapes=[pltpu.VMEM((tm, tn), jnp.float32)],
        compiler_params=pltpu.CompilerParams(
            dimension_semantics=("parallel", "parallel", "arbitrary")),
    )(xp, wp, bp)
    return out[:M, :N]


# ----------------------------------------------------------------------------
# Kernel 2: fused Timeception layer + relu/maxpool + AvgPool3d + logits.
# ----------------------------------------------------------------------------
def _tshift_mat(T, s, dtype):
    # (S @ v)[t] == v[t + s] when 0 <= t + s < T, zero otherwise.
    t = jax.lax.broadcasted_iota(jnp.int32, (T, T), 0)
    u = jax.lax.broadcasted_iota(jnp.int32, (T, T), 1)
    return (u == t + s).astype(dtype)


def _head_kernel(feats_ref, w_big_ref, b_big_ref, w_dw_ref, b_dw_ref,
                 w_log_ref, b_log_ref, o_ref, z_ref, *, T, Tout, c_dw):
    # One batch element per grid step; all intermediates stay in VMEM.
    x = feats_ref[0].astype(jnp.bfloat16)                             # (T, F)

    # All five per-group 1x1x1 "dimension reduction" convs as ONE block-diagonal
    # bf16 MXU matmul; output channels are branch-major: ch = branch*c_dw + g*nb + c.
    y = (jnp.dot(x, w_big_ref[...], preferred_element_type=jnp.float32)
         + b_big_ref[...])                                            # (T, 5*c_dw) f32

    sp1 = _tshift_mat(T, 1, jnp.float32)                              # -> v[t+1]

    # branch 1: identity (dimension reduction only).
    z_ref[:, 0:c_dw] = y[:, 0:c_dw]
    # branches 2..4: depthwise temporal conv k=3, dilation 1/2/3, 'same' zero pad.
    for k, dil in enumerate((1, 2, 3)):
        v = y[:, (k + 1) * c_dw:(k + 2) * c_dw]
        w = w_dw_ref[:, k * c_dw:(k + 1) * c_dw]                      # (3, c_dw)
        bias = b_dw_ref[:, k * c_dw:(k + 1) * c_dw]                   # (1, c_dw)
        vm = jnp.dot(_tshift_mat(T, -dil, jnp.float32), v,
                     preferred_element_type=jnp.float32)              # v[t-dil], zero-padded
        vp = jnp.dot(_tshift_mat(T, dil, jnp.float32), v,
                     preferred_element_type=jnp.float32)              # v[t+dil], zero-padded
        z_ref[:, (k + 1) * c_dw:(k + 2) * c_dw] = (
            w[0:1, :] * vm + w[1:2, :] * v + w[2:3, :] * vp + bias)
    # branch 5: temporal max pool, window 2, stride 1, 'same' (last frame kept).
    v5 = y[:, 4 * c_dw:5 * c_dw]
    v5n = jnp.dot(sp1, v5, preferred_element_type=jnp.float32)
    t_col = jax.lax.broadcasted_iota(jnp.int32, (T, c_dw), 0)
    z_ref[:, 4 * c_dw:5 * c_dw] = jnp.where(t_col < T - 1,
                                            jnp.maximum(v5, v5n), v5)
    # TODO(synk): per-branch BatchNorm3d omitted — fresh BN in eval mode is identity.

    # relu -> maxpool(k=2,s=2) -> AvgPool3d([2,1,1],s=1) -> logits, applied to
    # the whole lane-dense (T, 5*c_dw) slab at once (3 MXU ops total).
    # a_mat[t', t] = 0.5 at t = 2t' and t = 2t'+2 implements the stride-2
    # selection + the sliding average in one small matmul.
    z = jnp.maximum(z_ref[...], 0.0)                                  # relu
    zmax = jnp.maximum(z, jnp.dot(sp1, z, preferred_element_type=jnp.float32))
    tp_ = jax.lax.broadcasted_iota(jnp.int32, (Tout, T), 0)
    tt_ = jax.lax.broadcasted_iota(jnp.int32, (Tout, T), 1)
    a_mat = jnp.where((tt_ == 2 * tp_) | (tt_ == 2 * tp_ + 2),
                      0.5, 0.0).astype(jnp.float32)                   # (Tout, T)
    pooled = jnp.dot(a_mat, zmax, preferred_element_type=jnp.float32)  # (Tout, 5*c_dw)
    o_ref[0] = (jnp.dot(pooled, w_log_ref[...],
                        preferred_element_type=jnp.float32) + b_log_ref[...])


def timeception_head(feats_btf, w_big, b_big, w_dw, b_dw, w_log, b_log, *, c_dw):
    B, T, F = feats_btf.shape
    C_out = w_big.shape[1]
    N_log = w_log.shape[1]
    Tout = T // 2 - 1
    kern = functools.partial(_head_kernel, T=T, Tout=Tout, c_dw=c_dw)
    return pl.pallas_call(
        kern,
        out_shape=jax.ShapeDtypeStruct((B, Tout, N_log), jnp.float32),
        grid=(B,),
        in_specs=[
            pl.BlockSpec((1, T, F), lambda b: (b, 0, 0)),
            pl.BlockSpec((F, C_out), lambda b: (0, 0)),
            pl.BlockSpec((1, C_out), lambda b: (0, 0)),
            pl.BlockSpec((3, 3 * c_dw), lambda b: (0, 0)),
            pl.BlockSpec((1, 3 * c_dw), lambda b: (0, 0)),
            pl.BlockSpec((C_out, N_log), lambda b: (0, 0)),
            pl.BlockSpec((1, N_log), lambda b: (0, 0)),
        ],
        out_specs=pl.BlockSpec((1, Tout, N_log), lambda b: (b, 0, 0)),
        scratch_shapes=[pltpu.VMEM((T, C_out), jnp.float32)],
        compiler_params=pltpu.CompilerParams(
            dimension_semantics=("parallel",)),   # lets v7x split batches over its 2 TCs
    )(feats_btf, w_big, b_big, w_dw, b_dw, w_log, b_log)


# ----------------------------------------------------------------------------
# Parameters (deterministic synthetic init — GoogLeNet fc.in_features = 1024,
# Timeception: 8 groups, expansion 1.25 -> 32 channels/branch, 1280 out).
# ----------------------------------------------------------------------------
def init_params(key, frame_dim, feat_dim=1024, n_groups=8, n_branch_ch=32,
                num_classes=2):
    ks = jax.random.split(key, 8)

    def dense(k, shape, fan_in):
        return (jax.random.normal(k, shape, jnp.float32) / jnp.sqrt(fan_in)).astype(
            jnp.float32)

    c_per_group = feat_dim // n_groups          # 128
    n_out_per_group = 5 * n_branch_ch           # 160 (5 branches)
    c_dw = n_groups * n_branch_ch               # 256 channels per temporal branch
    tc_out = n_groups * n_out_per_group         # 1280

    return dict(
        w_cnn=dense(ks[0], (frame_dim, feat_dim), frame_dim),
        b_cnn=jnp.zeros((1, feat_dim), jnp.float32),
        w_grp=dense(ks[1], (n_groups, c_per_group, n_out_per_group), c_per_group),
        b_grp=jnp.zeros((n_groups, 1, n_out_per_group), jnp.float32),
        w_dw1=dense(ks[2], (3, c_dw), 3.0),
        b_dw1=jnp.zeros((1, c_dw), jnp.float32),
        w_dw2=dense(ks[3], (3, c_dw), 3.0),
        b_dw2=jnp.zeros((1, c_dw), jnp.float32),
        w_dw3=dense(ks[4], (3, c_dw), 3.0),
        b_dw3=jnp.zeros((1, c_dw), jnp.float32),
        w_log=dense(ks[5], (tc_out, num_classes), tc_out),
        b_log=jnp.zeros((1, num_classes), jnp.float32),
    )


# ----------------------------------------------------------------------------
# Forward pass
# ----------------------------------------------------------------------------
def cnn_tc_forward(params, x):
    # x: (B, C=3, T, H, W) — PyTorch layout of the module.
    B, C, T, H, W = x.shape
    assert T % 2 == 0 and T >= 4, "need an even T >= 4 (as in the PyTorch module)"
    G, nb, n_br = 8, 32, 5

    # --- CNN backbone (per frame) -----------------------------------------
    # torch: x.transpose(1,2).reshape(B*T, C, H, W) -> cnn -> (B*T, 1024)
    # TODO(synk): pretrained GoogLeNet has no clean Pallas translation; stand-in
    # is one tiled linear projection (bf16 MXU inputs, f32 accumulation).
    frames = jnp.transpose(x, (0, 2, 1, 3, 4)).reshape(B * T, C * H * W)
    feats = matmul_bias(frames, params["w_cnn"], params["b_cnn"])      # (B*T, 1024) f32
    Fdim = feats.shape[1]
    Cg = Fdim // G
    c_dw = G * nb                      # 256 channels per temporal branch
    tc_out = n_br * c_dw               # 1280 Timeception output channels

    # --- Trace-time weight re-layout so the whole head runs in ONE kernel ---
    # (a) grouped 1x1x1 convs -> block-diagonal matmul, branch-major output
    #     layout: channel = branch*256 + g*32 + c; bf16 so the dominant head
    #     matmul takes the native MXU path and the weight DMA is halved.
    wg = params["w_grp"].reshape(G, Cg, n_br, nb)
    w_big = jnp.einsum("gkbc,gh->gkbhc", wg, jnp.eye(G, dtype=wg.dtype))
    w_big = w_big.reshape(Fdim, tc_out).astype(jnp.bfloat16)
    b_big = jnp.transpose(params["b_grp"].reshape(G, n_br, nb), (1, 0, 2))
    b_big = b_big.reshape(1, tc_out)
    # (b) the three depthwise temporal convs share one packed weight/bias.
    w_dw = jnp.concatenate([params["w_dw1"], params["w_dw2"], params["w_dw3"]], axis=1)
    b_dw = jnp.concatenate([params["b_dw1"], params["b_dw2"], params["b_dw3"]], axis=1)
    # (c) channel shuffle folded into a row permutation of the logits weight
    #     (relu / temporal pooling are per-channel, so the shuffle commutes);
    #     logits lane-padded to 128 output columns, sliced afterwards.
    num_classes = params["w_log"].shape[1]
    n_pad = _round_up(num_classes, 128)
    w_log_p = jnp.pad(params["w_log"], ((0, 0), (0, n_pad - num_classes)))
    b_log_p = jnp.pad(params["b_log"], ((0, 0), (0, n_pad - num_classes)))
    i = jnp.arange(tc_out)
    br, rem = i // c_dw, i % c_dw
    g, c = rem // nb, rem % nb
    shuffled = (br * nb + c) * G + g          # branch-major index -> shuffled channel
    w_log_perm = jnp.take(w_log_p, shuffled, axis=0)

    # --- Fused Timeception layer + relu/maxpool + AvgPool3d + logits --------
    # (Dropout is identity at inference.)
    feats_btf = feats.reshape(B, T, Fdim)
    head = timeception_head(feats_btf, w_big, b_big, w_dw, b_dw,
                            w_log_perm, b_log_p, c_dw=c_dw)            # (B, Tout, 128)
    logits = head[:, :, :num_classes]
    return jnp.transpose(logits, (0, 2, 1))                            # (B, num_classes, Tout)


# ----------------------------------------------------------------------------
if __name__ == "__main__":
    B, C, T, H, W = 2, 3, 8, 16, 16      # small video: 3-channel frames, 8 steps
    key = jax.random.PRNGKey(0)
    kx, kp = jax.random.split(key)
    x = jax.random.normal(kx, (B, C, T, H, W), jnp.float32)
    params = init_params(kp, frame_dim=C * H * W)

    fwd = jax.jit(cnn_tc_forward)
    out = jax.block_until_ready(fwd(params, x))

    # PyTorch forward returns (B, num_classes, T') with T' = T//2 - 1
    assert out.shape == (B, 2, T // 2 - 1), out.shape
    assert out.dtype == jnp.float32
    print("KERNEL_OK")
</pallas_src>

<mosaic_0001>
module attributes {stable_mosaic.version = 11 : i64} {
  func.func @_matmul_bias_kernel(%arg0: i32, %arg1: i32, %arg2: i32, %arg3: memref<16x256xbf16, #tpu.memory_space<vmem>>, %arg4: memref<256x512xbf16, #tpu.memory_space<vmem>>, %arg5: memref<1x512xf32, #tpu.memory_space<vmem>>, %arg6: memref<16x512xf32, #tpu.memory_space<vmem>>, %arg7: memref<16x512xf32, #tpu.memory_space<vmem>>) attributes {dimension_semantics = [#tpu.dimension_semantics<parallel>, #tpu.dimension_semantics<parallel>, #tpu.dimension_semantics<arbitrary>], iteration_bounds = array<i64: 1, 2, 3>, scalar_prefetch = 0 : i64, scratch_operands = 1 : i64, tpu.core_type = #tpu.core_type<tc>, window_params = [{transform_indices = @transform_0, window_bounds = array<i64: 16, 256>}, {transform_indices = @transform_1, window_bounds = array<i64: 256, 512>}, {transform_indices = @transform_2, window_bounds = array<i64: 1, 512>}, {transform_indices = @transform_3, window_bounds = array<i64: 16, 512>}]} {
    %c0_i32 = arith.constant 0 : i32
    %0 = arith.cmpi eq, %arg2, %c0_i32 : i32
    %1 = arith.extui %0 : i1 to i32
    %c0_i32_0 = arith.constant 0 : i32
    %2 = arith.cmpi ne, %1, %c0_i32_0 : i32
    scf.if %2 {
      %cst_9 = arith.constant 0.000000e+00 : f32
      %12 = vector.broadcast %cst_9 : f32 to vector<16x512xf32>
      %c0_10 = arith.constant 0 : index
      %c0_11 = arith.constant 0 : index
      %13 = vector.load %arg7[%c0_10, %c0_11] : memref<16x512xf32, #tpu.memory_space<vmem>>, vector<16x512xf32>
      tpu.vector_store %arg7[%c0_10, %c0_11], %12 {strides = array<i32>} : memref<16x512xf32, #tpu.memory_space<vmem>>, vector<16x512xf32>,
    } else {
    }
    %c0 = arith.constant 0 : index
    %c0_1 = arith.constant 0 : index
    %3 = vector.load %arg7[%c0, %c0_1] : memref<16x512xf32, #tpu.memory_space<vmem>>, vector<16x512xf32>
    %c0_2 = arith.constant 0 : index
    %c0_3 = arith.constant 0 : index
    %4 = vector.load %arg3[%c0_2, %c0_3] : memref<16x256xbf16, #tpu.memory_space<vmem>>, vector<16x256xbf16>
    %c0_4 = arith.constant 0 : index
    %c0_5 = arith.constant 0 : index
    %5 = vector.load %arg4[%c0_4, %c0_5] : memref<256x512xbf16, #tpu.memory_space<vmem>>, vector<256x512xbf16>
    %cst = arith.constant dense<0.000000e+00> : vector<16x512xf32>
    %6 = tpu.matmul %4, %5, %cst {dimension_numbers = #tpu.dot_dimension_numbers<[1], [0], [0], [1], [0, 0, 1, 1], [], []>} : vector<16x256xbf16>, vector<256x512xbf16>, vector<16x512xf32> -> vector<16x512xf32>
    %7 = arith.addf %3, %6 : vector<16x512xf32>
    %c0_6 = arith.constant 0 : index
    %c0_7 = arith.constant 0 : index
    %8 = vector.load %arg7[%c0_6, %c0_7] : memref<16x512xf32, #tpu.memory_space<vmem>>, vector<16x512xf32>
    tpu.vector_store %arg7[%c0_6, %c0_7], %7 {strides = array<i32>} : memref<16x512xf32, #tpu.memory_space<vmem>>, vector<16x512xf32>,
    %c2_i32 = arith.constant 2 : i32
    %9 = arith.cmpi eq, %arg2, %c2_i32 : i32
    %10 = arith.extui %9 : i1 to i32
    %c0_i32_8 = arith.constant 0 : i32
    %11 = arith.cmpi ne, %10, %c0_i32_8 : i32
    scf.if %11 {
      %c0_9 = arith.constant 0 : index
      %c0_10 = arith.constant 0 : index
      %12 = vector.load %arg7[%c0_9, %c0_10] : memref<16x512xf32, #tpu.memory_space<vmem>>, vector<16x512xf32>
      %c0_11 = arith.constant 0 : index
      %c0_12 = arith.constant 0 : index
      %13 = vector.load %arg5[%c0_11, %c0_12] : memref<1x512xf32, #tpu.memory_space<vmem>>, vector<1x512xf32>
      %14 = vector.broadcast %13 : vector<1x512xf32> to vector<16x512xf32>
      %15 = arith.addf %12, %14 : vector<16x512xf32>
      %c0_13 = arith.constant 0 : index
      %c0_14 = arith.constant 0 : index
      %16 = vector.load %arg6[%c0_13, %c0_14] : memref<16x512xf32, #tpu.memory_space<vmem>>, vector<16x512xf32>
      tpu.vector_store %arg6[%c0_13, %c0_14], %15 {strides = array<i32>} : memref<16x512xf32, #tpu.memory_space<vmem>>, vector<16x512xf32>,
    } else {
    }
    return
  }
  func.func @transform_0(%arg0: i32, %arg1: i32, %arg2: i32) -> (i32, i32) {
    %c0_i32 = arith.constant 0 : i32
    return %arg0, %arg2 : i32, i32
  }
  func.func @transform_1(%arg0: i32, %arg1: i32, %arg2: i32) -> (i32, i32) {
    %c0_i32 = arith.constant 0 : i32
    return %arg2, %arg1 : i32, i32
  }
  func.func @transform_2(%arg0: i32, %arg1: i32, %arg2: i32) -> (i32, i32) {
    %c0_i32 = arith.constant 0 : i32
    %c0_i32_0 = arith.constant 0 : i32
    return %c0_i32, %arg1 : i32, i32
  }
  func.func @transform_3(%arg0: i32, %arg1: i32, %arg2: i32) -> (i32, i32) {
    %c0_i32 = arith.constant 0 : i32
    return %arg0, %arg1 : i32, i32
  }
}

module attributes {stable_mosaic.version = 11 : i64} {
  func.func @_head_kernel(%arg0: i32, %arg1: memref<1x8x1024xf32, #tpu.memory_space<vmem>>, %arg2: memref<1024x1280xbf16, #tpu.memory_space<vmem>>, %arg3: memref<1x1280xf32, #tpu.memory_space<vmem>>, %arg4: memref<3x768xf32, #tpu.memory_space<vmem>>, %arg5: memref<1x768xf32, #tpu.memory_space<vmem>>, %arg6: memref<1280x128xf32, #tpu.memory_space<vmem>>, %arg7: memref<1x128xf32, #tpu.memory_space<vmem>>, %arg8: memref<1x3x128xf32, #tpu.memory_space<vmem>>, %arg9: memref<8x1280xf32, #tpu.memory_space<vmem>>) attributes {dimension_semantics = [#tpu.dimension_semantics<parallel>], iteration_bounds = array<i64: 2>, scalar_prefetch = 0 : i64, scratch_operands = 1 : i64, tpu.core_type = #tpu.core_type<tc>, window_params = [{transform_indices = @transform_0, window_bounds = array<i64: 1, 8, 1024>}, {pipeline_mode = #tpu.pipeline_mode<synchronous>, transform_indices = @transform_1, window_bounds = array<i64: 1024, 1280>}, {pipeline_mode = #tpu.pipeline_mode<synchronous>, transform_indices = @transform_2, window_bounds = array<i64: 1, 1280>}, {pipeline_mode = #tpu.pipeline_mode<synchronous>, transform_indices = @transform_3, window_bounds = array<i64: 3, 768>}, {pipeline_mode = #tpu.pipeline_mode<synchronous>, transform_indices = @transform_4, window_bounds = array<i64: 1, 768>}, {pipeline_mode = #tpu.pipeline_mode<synchronous>, transform_indices = @transform_5, window_bounds = array<i64: 1280, 128>}, {pipeline_mode = #tpu.pipeline_mode<synchronous>, transform_indices = @transform_6, window_bounds = array<i64: 1, 128>}, {transform_indices = @transform_7, window_bounds = array<i64: 1, 3, 128>}]} {
    %c0 = arith.constant 0 : index
    %c0_0 = arith.constant 0 : index
    %c0_1 = arith.constant 0 : index
    %0 = vector.load %arg1[%c0, %c0_0, %c0_1] : memref<1x8x1024xf32, #tpu.memory_space<vmem>>, vector<1x8x1024xf32>
    %1 = vector.shape_cast %0 : vector<1x8x1024xf32> to vector<8x1024xf32>
    %2 = arith.truncf %1 : vector<8x1024xf32> to vector<8x1024xbf16>
    %c0_2 = arith.constant 0 : index
    %c0_3 = arith.constant 0 : index
    %3 = vector.load %arg2[%c0_2, %c0_3] : memref<1024x1280xbf16, #tpu.memory_space<vmem>>, vector<1024x1280xbf16>
    %cst = arith.constant dense<0.000000e+00> : vector<8x1280xf32>
    %4 = tpu.matmul %2, %3, %cst {dimension_numbers = #tpu.dot_dimension_numbers<[1], [0], [0], [1], [0, 0, 1, 1], [], []>} : vector<8x1024xbf16>, vector<1024x1280xbf16>, vector<8x1280xf32> -> vector<8x1280xf32>
    %c0_4 = arith.constant 0 : index
    %c0_5 = arith.constant 0 : index
    %5 = vector.load %arg3[%c0_4, %c0_5] : memref<1x1280xf32, #tpu.memory_space<vmem>>, vector<1x1280xf32>
    %6 = vector.broadcast %5 : vector<1x1280xf32> to vector<8x1280xf32>
    %7 = arith.addf %4, %6 : vector<8x1280xf32>
    %8 = tpu.iota {dimensions = array<i32: 0>} : vector<8x8xi32>
    %9 = tpu.iota {dimensions = array<i32: 1>} : vector<8x8xi32>
    %c1_i32 = arith.constant 1 : i32
    %10 = vector.broadcast %c1_i32 : i32 to vector<8x8xi32>
    %11 = arith.addi %8, %10 : vector<8x8xi32>
    %12 = arith.cmpi eq, %9, %11 : vector<8x8xi32>
    %13 = arith.extui %12 : vector<8x8xi1> to vector<8x8xi32>
    %14 = arith.sitofp %13 : vector<8x8xi32> to vector<8x8xf32>
    %15 = vector.extract_strided_slice %7 {offsets = [0, 0], sizes = [8, 256], strides = [1, 1]} : vector<8x1280xf32> to vector<8x256xf32>
    %c0_6 = arith.constant 0 : index
    %c0_7 = arith.constant 0 : index
    %16 = vector.load %arg9[%c0_6, %c0_7] : memref<8x1280xf32, #tpu.memory_space<vmem>>, vector<8x256xf32>
    tpu.vector_store %arg9[%c0_6, %c0_7], %15 {strides = array<i32>} : memref<8x1280xf32, #tpu.memory_space<vmem>>, vector<8x256xf32>,
    %17 = vector.extract_strided_slice %7 {offsets = [0, 256], sizes = [8, 256], strides = [1, 1]} : vector<8x1280xf32> to vector<8x256xf32>
    %c0_8 = arith.constant 0 : index
    %c0_9 = arith.constant 0 : index
    %18 = vector.load %arg4[%c0_8, %c0_9] : memref<3x768xf32, #tpu.memory_space<vmem>>, vector<3x256xf32>
    %c0_10 = arith.constant 0 : index
    %c0_11 = arith.constant 0 : index
    %19 = vector.load %arg5[%c0_10, %c0_11] : memref<1x768xf32, #tpu.memory_space<vmem>>, vector<1x256xf32>
    %20 = tpu.iota {dimensions = array<i32: 0>} : vector<8x8xi32>
    %21 = tpu.iota {dimensions = array<i32: 1>} : vector<8x8xi32>
    %c-1_i32 = arith.constant -1 : i32
    %22 = vector.broadcast %c-1_i32 : i32 to vector<8x8xi32>
    %23 = arith.addi %20, %22 : vector<8x8xi32>
    %24 = arith.cmpi eq, %21, %23 : vector<8x8xi32>
    %25 = arith.extui %24 : vector<8x8xi1> to vector<8x8xi32>
    %26 = arith.sitofp %25 : vector<8x8xi32> to vector<8x8xf32>
    %cst_12 = arith.constant dense<0.000000e+00> : vector<8x256xf32>
    %27 = tpu.matmul %26, %17, %cst_12 {dimension_numbers = #tpu.dot_dimension_numbers<[1], [0], [0], [1], [0, 0, 1, 1], [], []>} : vector<8x8xf32>, vector<8x256xf32>, vector<8x256xf32> -> vector<8x256xf32>
    %28 = tpu.iota {dimensions = array<i32: 0>} : vector<8x8xi32>
    %29 = tpu.iota {dimensions = array<i32: 1>} : vector<8x8xi32>
    %c1_i32_13 = arith.constant 1 : i32
    %30 = vector.broadcast %c1_i32_13 : i32 to vector<8x8xi32>
    %31 = arith.addi %28, %30 : vector<8x8xi32>
    %32 = arith.cmpi eq, %29, %31 : vector<8x8xi32>
    %33 = arith.extui %32 : vector<8x8xi1> to vector<8x8xi32>
    %34 = arith.sitofp %33 : vector<8x8xi32> to vector<8x8xf32>
    %cst_14 = arith.constant dense<0.000000e+00> : vector<8x256xf32>
    %35 = tpu.matmul %34, %17, %cst_14 {dimension_numbers = #tpu.dot_dimension_numbers<[1], [0], [0], [1], [0, 0, 1, 1], [], []>} : vector<8x8xf32>, vector<8x256xf32>, vector<8x256xf32> -> vector<8x256xf32>
    %36 = vector.extract_strided_slice %18 {offsets = [0, 0], sizes = [1, 256], strides = [1, 1]} : vector<3x256xf32> to vector<1x256xf32>
    %37 = vector.broadcast %36 : vector<1x256xf32> to vector<8x256xf32>
    %38 = arith.mulf %37, %27 : vector<8x256xf32>
    %39 = vector.extract_strided_slice %18 {offsets = [1, 0], sizes = [1, 256], strides = [1, 1]} : vector<3x256xf32> to vector<1x256xf32>
    %40 = vector.broadcast %39 : vector<1x256xf32> to vector<8x256xf32>
    %41 = arith.mulf %40, %17 : vector<8x256xf32>
    %42 = arith.addf %38, %41 : vector<8x256xf32>
    %43 = vector.extract_strided_slice %18 {offsets = [2, 0], sizes = [1, 256], strides = [1, 1]} : vector<3x256xf32> to vector<1x256xf32>
    %44 = vector.broadcast %43 : vector<1x256xf32> to vector<8x256xf32>
    %45 = arith.mulf %44, %35 : vector<8x256xf32>
    %46 = arith.addf %42, %45 : vector<8x256xf32>
    %47 = vector.broadcast %19 : vector<1x256xf32> to vector<8x256xf32>
    %48 = arith.addf %46, %47 : vector<8x256xf32>
    %c0_15 = arith.constant 0 : index
    %c256 = arith.constant 256 : index
    %49 = vector.load %arg9[%c0_15, %c256] : memref<8x1280xf32, #tpu.memory_space<vmem>>, vector<8x256xf32>
    tpu.vector_store %arg9[%c0_15, %c256], %48 {strides = array<i32>} : memref<8x1280xf32, #tpu.memory_space<vmem>>, vector<8x256xf32>,
    %50 = vector.extract_strided_slice %7 {offsets = [0, 512], sizes = [8, 256], strides = [1, 1]} : vector<8x1280xf32> to vector<8x256xf32>
    %c0_16 = arith.constant 0 : index
    %c256_17 = arith.constant 256 : index
    %51 = vector.load %arg4[%c0_16, %c256_17] : memref<3x768xf32, #tpu.memory_space<vmem>>, vector<3x256xf32>
    %c0_18 = arith.constant 0 : index
    %c256_19 = arith.constant 256 : index
    %52 = vector.load %arg5[%c0_18, %c256_19] : memref<1x768xf32, #tpu.memory_space<vmem>>, vector<1x256xf32>
    %53 = tpu.iota {dimensions = array<i32: 0>} : vector<8x8xi32>
    %54 = tpu.iota {dimensions = array<i32: 1>} : vector<8x8xi32>
    %c-2_i32 = arith.constant -2 : i32
    %55 = vector.broadcast %c-2_i32 : i32 to vector<8x8xi32>
    %56 = arith.addi %53, %55 : vector<8x8xi32>
    %57 = arith.cmpi eq, %54, %56 : vector<8x8xi32>
    %58 = arith.extui %57 : vector<8x8xi1> to vector<8x8xi32>
    %59 = arith.sitofp %58 : vector<8x8xi32> to vector<8x8xf32>
    %cst_20 = arith.constant dense<0.000000e+00> : vector<8x256xf32>
    %60 = tpu.matmul %59, %50, %cst_20 {dimension_numbers = #tpu.dot_dimension_numbers<[1], [0], [0], [1], [0, 0, 1, 1], [], []>} : vector<8x8xf32>, vector<8x256xf32>, vector<8x256xf32> -> vector<8x256xf32>
    %61 = tpu.iota {dimensions = array<i32: 0>} : vector<8x8xi32>
    %62 = tpu.iota {dimensions = array<i32: 1>} : vector<8x8xi32>
    %c2_i32 = arith.constant 2 : i32
    %63 = vector.broadcast %c2_i32 : i32 to vector<8x8xi32>
    %64 = arith.addi %61, %63 : vector<8x8xi32>
    %65 = arith.cmpi eq, %62, %64 : vector<8x8xi32>
    %66 = arith.extui %65 : vector<8x8xi1> to vector<8x8xi32>
    %67 = arith.sitofp %66 : vector<8x8xi32> to vector<8x8xf32>
    %cst_21 = arith.constant dense<0.000000e+00> : vector<8x256xf32>
    %68 = tpu.matmul %67, %50, %cst_21 {dimension_numbers = #tpu.dot_dimension_numbers<[1], [0], [0], [1], [0, 0, 1, 1], [], []>} : vector<8x8xf32>, vector<8x256xf32>, vector<8x256xf32> -> vector<8x256xf32>
    %69 = vector.extract_strided_slice %51 {offsets = [0, 0], sizes = [1, 256], strides = [1, 1]} : vector<3x256xf32> to vector<1x256xf32>
    %70 = vector.broadcast %69 : vector<1x256xf32> to vector<8x256xf32>
    %71 = arith.mulf %70, %60 : vector<8x256xf32>
    %72 = vector.extract_strided_slice %51 {offsets = [1, 0], sizes = [1, 256], strides = [1, 1]} : vector<3x256xf32> to vector<1x256xf32>
    %73 = vector.broadcast %72 : vector<1x256xf32> to vector<8x256xf32>
    %74 = arith.mulf %73, %50 : vector<8x256xf32>
    %75 = arith.addf %71, %74 : vector<8x256xf32>
    %76 = vector.extract_strided_slice %51 {offsets = [2, 0], sizes = [1, 256], strides = [1, 1]} : vector<3x256xf32> to vector<1x256xf32>
    %77 = vector.broadcast %76 : vector<1x256xf32> to vector<8x256xf32>
    %78 = arith.mulf %77, %68 : vector<8x256xf32>
    %79 = arith.addf %75, %78 : vector<8x256xf32>
    %80 = vector.broadcast %52 : vector<1x256xf32> to vector<8x256xf32>
    %81 = arith.addf %79, %80 : vector<8x256xf32>
    %c0_22 = arith.constant 0 : index
    %c512 = arith.constant 512 : index
    %82 = vector.load %arg9[%c0_22, %c512] : memref<8x1280xf32, #tpu.memory_space<vmem>>, vector<8x256xf32>
    tpu.vector_store %arg9[%c0_22, %c512], %81 {strides = array<i32>} : memref<8x1280xf32, #tpu.memory_space<vmem>>, vector<8x256xf32>,
    %83 = vector.extract_strided_slice %7 {offsets = [0, 768], sizes = [8, 256], strides = [1, 1]} : vector<8x1280xf32> to vector<8x256xf32>
    %c0_23 = arith.constant 0 : index
    %c512_24 = arith.constant 512 : index
    %84 = vector.load %arg4[%c0_23, %c512_24] : memref<3x768xf32, #tpu.memory_space<vmem>>, vector<3x256xf32>
    %c0_25 = arith.constant 0 : index
    %c512_26 = arith.constant 512 : index
    %85 = vector.load %arg5[%c0_25, %c512_26] : memref<1x768xf32, #tpu.memory_space<vmem>>, vector<1x256xf32>
    %86 = tpu.iota {dimensions = array<i32: 0>} : vector<8x8xi32>
    %87 = tpu.iota {dimensions = array<i32: 1>} : vector<8x8xi32>
    %c-3_i32 = arith.constant -3 : i32
    %88 = vector.broadcast %c-3_i32 : i32 to vector<8x8xi32>
    %89 = arith.addi %86, %88 : vector<8x8xi32>
    %90 = arith.cmpi eq, %87, %89 : vector<8x8xi32>
    %91 = arith.extui %90 : vector<8x8xi1> to vector<8x8xi32>
    %92 = arith.sitofp %91 : vector<8x8xi32> to vector<8x8xf32>
    %cst_27 = arith.constant dense<0.000000e+00> : vector<8x256xf32>
    %93 = tpu.matmul %92, %83, %cst_27 {dimension_numbers = #tpu.dot_dimension_numbers<[1], [0], [0], [1], [0, 0, 1, 1], [], []>} : vector<8x8xf32>, vector<8x256xf32>, vector<8x256xf32> -> vector<8x256xf32>
    %94 = tpu.iota {dimensions = array<i32: 0>} : vector<8x8xi32>
    %95 = tpu.iota {dimensions = array<i32: 1>} : vector<8x8xi32>
    %c3_i32 = arith.constant 3 : i32
    %96 = vector.broadcast %c3_i32 : i32 to vector<8x8xi32>
    %97 = arith.addi %94, %96 : vector<8x8xi32>
    %98 = arith.cmpi eq, %95, %97 : vector<8x8xi32>
    %99 = arith.extui %98 : vector<8x8xi1> to vector<8x8xi32>
    %100 = arith.sitofp %99 : vector<8x8xi32> to vector<8x8xf32>
    %cst_28 = arith.constant dense<0.000000e+00> : vector<8x256xf32>
    %101 = tpu.matmul %100, %83, %cst_28 {dimension_numbers = #tpu.dot_dimension_numbers<[1], [0], [0], [1], [0, 0, 1, 1], [], []>} : vector<8x8xf32>, vector<8x256xf32>, vector<8x256xf32> -> vector<8x256xf32>
    %102 = vector.extract_strided_slice %84 {offsets = [0, 0], sizes = [1, 256], strides = [1, 1]} : vector<3x256xf32> to vector<1x256xf32>
    %103 = vector.broadcast %102 : vector<1x256xf32> to vector<8x256xf32>
    %104 = arith.mulf %103, %93 : vector<8x256xf32>
    %105 = vector.extract_strided_slice %84 {offsets = [1, 0], sizes = [1, 256], strides = [1, 1]} : vector<3x256xf32> to vector<1x256xf32>
    %106 = vector.broadcast %105 : vector<1x256xf32> to vector<8x256xf32>
    %107 = arith.mulf %106, %83 : vector<8x256xf32>
    %108 = arith.addf %104, %107 : vector<8x256xf32>
    %109 = vector.extract_strided_slice %84 {offsets = [2, 0], sizes = [1, 256], strides = [1, 1]} : vector<3x256xf32> to vector<1x256xf32>
    %110 = vector.broadcast %109 : vector<1x256xf32> to vector<8x256xf32>
    %111 = arith.mulf %110, %101 : vector<8x256xf32>
    %112 = arith.addf %108, %111 : vector<8x256xf32>
    %113 = vector.broadcast %85 : vector<1x256xf32> to vector<8x256xf32>
    %114 = arith.addf %112, %113 : vector<8x256xf32>
    %c0_29 = arith.constant 0 : index
    %c768 = arith.constant 768 : index
    %115 = vector.load %arg9[%c0_29, %c768] : memref<8x1280xf32, #tpu.memory_space<vmem>>, vector<8x256xf32>
    tpu.vector_store %arg9[%c0_29, %c768], %114 {strides = array<i32>} : memref<8x1280xf32, #tpu.memory_space<vmem>>, vector<8x256xf32>,
    %116 = vector.extract_strided_slice %7 {offsets = [0, 1024], sizes = [8, 256], strides = [1, 1]} : vector<8x1280xf32> to vector<8x256xf32>
    %cst_30 = arith.constant dense<0.000000e+00> : vector<8x256xf32>
    %117 = tpu.matmul %14, %116, %cst_30 {dimension_numbers = #tpu.dot_dimension_numbers<[1], [0], [0], [1], [0, 0, 1, 1], [], []>} : vector<8x8xf32>, vector<8x256xf32>, vector<8x256xf32> -> vector<8x256xf32>
    %118 = tpu.iota {dimensions = array<i32: 0>} : vector<8x256xi32>
    %c7_i32 = arith.constant 7 : i32
    %119 = vector.broadcast %c7_i32 : i32 to vector<8x256xi32>
    %120 = arith.cmpi slt, %118, %119 : vector<8x256xi32>
    %121 = arith.maximumf %116, %117 : vector<8x256xf32>
    %122 = arith.select %120, %121, %116 : vector<8x256xi1>, vector<8x256xf32>
    %c0_31 = arith.constant 0 : index
    %c1024 = arith.constant 1024 : index
    %123 = vector.load %arg9[%c0_31, %c1024] : memref<8x1280xf32, #tpu.memory_space<vmem>>, vector<8x256xf32>
    tpu.vector_store %arg9[%c0_31, %c1024], %122 {strides = array<i32>} : memref<8x1280xf32, #tpu.memory_space<vmem>>, vector<8x256xf32>,
    %c0_32 = arith.constant 0 : index
    %c0_33 = arith.constant 0 : index
    %124 = vector.load %arg9[%c0_32, %c0_33] : memref<8x1280xf32, #tpu.memory_space<vmem>>, vector<8x1280xf32>
    %cst_34 = arith.constant 0.000000e+00 : f32
    %125 = vector.broadcast %cst_34 : f32 to vector<8x1280xf32>
    %126 = arith.maximumf %124, %125 : vector<8x1280xf32>
    %cst_35 = arith.constant dense<0.000000e+00> : vector<8x1280xf32>
    %127 = tpu.matmul %14, %126, %cst_35 {dimension_numbers = #tpu.dot_dimension_numbers<[1], [0], [0], [1], [0, 0, 1, 1], [], []>} : vector<8x8xf32>, vector<8x1280xf32>, vector<8x1280xf32> -> vector<8x1280xf32>
    %128 = arith.maximumf %126, %127 : vector<8x1280xf32>
    %129 = tpu.iota {dimensions = array<i32: 0>} : vector<3x8xi32>
    %130 = tpu.iota {dimensions = array<i32: 1>} : vector<3x8xi32>
    %c2_i32_36 = arith.constant 2 : i32
    %131 = vector.broadcast %c2_i32_36 : i32 to vector<3x8xi32>
    %132 = arith.muli %131, %129 : vector<3x8xi32>
    %133 = arith.cmpi eq, %130, %132 : vector<3x8xi32>
    %c2_i32_37 = arith.constant 2 : i32
    %134 = vector.broadcast %c2_i32_37 : i32 to vector<3x8xi32>
    %135 = arith.muli %134, %129 : vector<3x8xi32>
    %c2_i32_38 = arith.constant 2 : i32
    %136 = vector.broadcast %c2_i32_38 : i32 to vector<3x8xi32>
    %137 = arith.addi %135, %136 : vector<3x8xi32>
    %138 = arith.cmpi eq, %130, %137 : vector<3x8xi32>
    %139 = arith.ori %133, %138 : vector<3x8xi1>
    %cst_39 = arith.constant 5.000000e-01 : f32
    %cst_40 = arith.constant 0.000000e+00 : f32
    %140 = vector.broadcast %cst_39 : f32 to vector<3x8xf32>
    %141 = vector.broadcast %cst_40 : f32 to vector<3x8xf32>
    %142 = arith.select %139, %140, %141 : vector<3x8xi1>, vector<3x8xf32>
    %cst_41 = arith.constant dense<0.000000e+00> : vector<3x1280xf32>
    %143 = tpu.matmul %142, %128, %cst_41 {dimension_numbers = #tpu.dot_dimension_numbers<[1], [0], [0], [1], [0, 0, 1, 1], [], []>} : vector<3x8xf32>, vector<8x1280xf32>, vector<3x1280xf32> -> vector<3x1280xf32>
    %c0_42 = arith.constant 0 : index
    %c0_43 = arith.constant 0 : index
    %144 = vector.load %arg6[%c0_42, %c0_43] : memref<1280x128xf32, #tpu.memory_space<vmem>>, vector<1280x128xf32>
    %cst_44 = arith.constant dense<0.000000e+00> : vector<3x128xf32>
    %145 = tpu.matmul %143, %144, %cst_44 {dimension_numbers = #tpu.dot_dimension_numbers<[1], [0], [0], [1], [0, 0, 1, 1], [], []>} : vector<3x1280xf32>, vector<1280x128xf32>, vector<3x128xf32> -> vector<3x128xf32>
    %c0_45 = arith.constant 0 : index
    %c0_46 = arith.constant 0 : index
    %146 = vector.load %arg7[%c0_45, %c0_46] : memref<1x128xf32, #tpu.memory_space<vmem>>, vector<1x128xf32>
    %147 = vector.broadcast %146 : vector<1x128xf32> to vector<3x128xf32>
    %148 = arith.addf %145, %147 : vector<3x128xf32>
    %c0_47 = arith.constant 0 : index
    %c0_48 = arith.constant 0 : index
    %c0_49 = arith.constant 0 : index
    %149 = vector.load %arg8[%c0_47, %c0_48, %c0_49] : memref<1x3x128xf32, #tpu.memory_space<vmem>>, vector<1x3x128xf32>
    %150 = vector.shape_cast %149 : vector<1x3x128xf32> to vector<3x128xf32>
    %151 = vector.shape_cast %148 : vector<3x128xf32> to vector<1x3x128xf32>
    tpu.vector_store %arg8[%c0_47, %c0_48, %c0_49], %151 {strides = array<i32>} : memref<1x3x128xf32, #tpu.memory_space<vmem>>, vector<1x3x128xf32>,
    return
  }
  func.func @transform_0(%arg0: i32) -> (i32, i32, i32) {
    %c0_i32 = arith.constant 0 : i32
    %c0_i32_0 = arith.constant 0 : i32
    %c0_i32_1 = arith.constant 0 : i32
    return %arg0, %c0_i32, %c0_i32_0 : i32, i32, i32
  }
  func.func @transform_1(%arg0: i32) -> (i32, i32) {
    %c0_i32 = arith.constant 0 : i32
    %c0_i32_0 = arith.constant 0 : i32
    %c0_i32_1 = arith.constant 0 : i32
    return %c0_i32, %c0_i32_0 : i32, i32
  }
  func.func @transform_2(%arg0: i32) -> (i32, i32) {
    %c0_i32 = arith.constant 0 : i32
    %c0_i32_0 = arith.constant 0 : i32
    %c0_i32_1 = arith.constant 0 : i32
    return %c0_i32, %c0_i32_0 : i32, i32
  }
  func.func @transform_3(%arg0: i32) -> (i32, i32) {
    %c0_i32 = arith.constant 0 : i32
    %c0_i32_0 = arith.constant 0 : i32
    %c0_i32_1 = arith.constant 0 : i32
    return %c0_i32, %c0_i32_0 : i32, i32
  }
  func.func @transform_4(%arg0: i32) -> (i32, i32) {
    %c0_i32 = arith.constant 0 : i32
    %c0_i32_0 = arith.constant 0 : i32
    %c0_i32_1 = arith.constant 0 : i32
    return %c0_i32, %c0_i32_0 : i32, i32
  }
  func.func @transform_5(%arg0: i32) -> (i32, i32) {
    %c0_i32 = arith.constant 0 : i32
    %c0_i32_0 = arith.constant 0 : i32
    %c0_i32_1 = arith.constant 0 : i32
    return %c0_i32, %c0_i32_0 : i32, i32
  }
  func.func @transform_6(%arg0: i32) -> (i32, i32) {
    %c0_i32 = arith.constant 0 : i32
    %c0_i32_0 = arith.constant 0 : i32
    %c0_i32_1 = arith.constant 0 : i32
    return %c0_i32, %c0_i32_0 : i32, i32
  }
  func.func @transform_7(%arg0: i32) -> (i32, i32, i32) {
    %c0_i32 = arith.constant 0 : i32
    %c0_i32_0 = arith.constant 0 : i32
    %c0_i32_1 = arith.constant 0 : i32
    return %arg0, %c0_i32, %c0_i32_0 : i32, i32, i32
  }
}

</mosaic_0001>

<bundles_post_ra>
// kernel: cnn_tc_forward.2
= control target key start
LH: loop header
LB: loop body
LE: loop exit
PB: predicated region body
PF: predicated region fallthrough
CT: control target
= control target key end

     0   :  { %s1536_s12 = smov 0   ;;  %s1538_s13 = smov 0   ;;  %s1931_s0 = inlined_call_operand.vmem [shape: bf16[16,768], index: 0, kind: input, shape index: {}]   ;;  %s1932_s1 = inlined_call_operand.vmem [shape: bf16[768,1024], index: 1, kind: input, shape index: {}]   ;;  %s1933_s2 = inlined_call_operand.vmem [shape: f32[1,1024], index: 2, kind: input, shape index: {}]   ;;  %s1934_s3 = inlined_call_operand.vmem [shape: f32[16,1024], index: 3, kind: output, shape index: {}]  }
   0x1   :  { %s1540_s14 = smov 0   ;;  %s1542_s15 = smov 0  }
   0x2   :  { %s1544_s16 = smov 0   ;;  %s1546_s17 = smov 0  }
   0x3   :  { %s1548_s18 = smov 0   ;;  %s1550_s19 = smov 0  }
   0x4   :  { %s1552_s20 = smov 0   ;;  %s1554_s21 = smov 0  }
   0x5   :  { %s1556_s22 = smov 0  }
   0x6 LB: > { %s1146_s23 = sadd.s32 4294967295, %s1513_s22   ;;  %s25_s24 = sadd.s32 1, %s1505_s20  ;;  %s1513_s22 = sphi %s1556_s22, %s13_s22   ;;  %s1509_s21 = sphi %s1554_s21, %s1955_s21   ;;  %s1505_s20 = sphi %s1552_s20, %s1954_s20   ;;  %s1501_s19 = sphi %s1550_s19, %s1953_s19   ;;  %s1497_s18 = sphi %s1548_s18, %s1952_s18   ;;  %s1493_s17 = sphi %s1546_s17, %s1951_s17   ;;  %s1489_s16 = sphi %s1544_s16, %s1950_s16   ;;  %s1485_s15 = sphi %s1542_s15, %s1949_s15   ;;  %s1481_s14 = sphi %s1540_s14, %s1948_s14   ;;  %s1477_s13 = sphi %s1538_s13, %s1947_s13   ;;  %s1473_s12 = sphi %s1536_s12, %s1946_s12  }
   0x7   : > { %p26_p0 = scmp.ge.s32.totalorder %s25_s24, 3  ;;  %s28_s25 = sadd.s32 1, %s1509_s21 }
   0x8   : > { %s41_s26 = sadd.s32 1, %s1493_s17  ;;  %p48_p1 = scmp.ne.s32.totalorder %s1493_s17, %s1489_s16 }
   0x9   : > { %s1957_s24 = smov (%p26_p0, %s25_s24), 0  ;;  %s1959_s25 = smov (!%p26_p0, %s28_s25), %s1509_s21 }
   0xa   : > { %1937 = sst [smem:[#allocation6_spill]] %s1957_s24  ;;  %s37_s27 = ssub.s32 %s1505_s20, %s1957_s24 }
   0xb   : > { %p49_p2 = scmp.eq.s32.totalorder %s1513_s22, 0  ;;  %p30_p3 = scmp.ge.s32.totalorder %s1959_s25, 2 }
   0xc   : > { %p39_p4 = scmp.eq.s32.totalorder %s37_s27, 0  ;;  %s69_s29 = sadd.s32 1, %s1485_s15 }
   0xd   : > { %p1603_p5 = por %p49_p2, %p48_p1  ;;  %s1961_s25 = smov (%p30_p3, %s1959_s25), 0 }
   0xe   : > { %1939 = sst [smem:[#allocation7_spill]] %s1961_s25  ;;  %s65_s4 = ssub.s32 %s1509_s21, %s1961_s25 }
   0xf   : > { %s1611_s30 = scalar_select %p39_p4, %s1493_s17, %s41_s26  }
  0x10   : > { %p76_p6 = scmp.ne.s32.totalorder %s1485_s15, %s1481_s14  ;;  %s66_s5 = sor.u32 %s65_s4, %s37_s27 }
  0x11   : > { %1940 = sst [smem:[#allocation8_spill]] %s1611_s30  ;;  %p121_p7 = scmp.eq.s32.totalorder %s65_s4, 0 }
  0x12   : > { %p67_p8 = scmp.eq.s32.totalorder %s66_s5, 0  ;;  %p1617_p9 = por %p76_p6, %p49_p2 }
  0x13   : > { %s123_s7 = sadd.s32 1, %s1477_s13  ;;  %p133_p10 = scmp.ne.s32.totalorder %s1477_s13, %s1473_s12 }
  0x14   : > { %s1625_s8 = scalar_select %p67_p8, %s1485_s15, %s69_s29  }
  0x15   : > { %s1628_s9 = scalar_select %p121_p7, %s1477_s13, %s123_s7  }
  0x16   : > { %p134_p11 = scmp.eq.s32.totalorder %s1146_s23, 5  ;;  %p1149_p13 = scmp.ge.s32.totalorder %s1513_s22, 6 }
  0x18   : > { %p1630_p12 = por %p134_p11, %p133_p10  ;;  %156 = sbr.rel (%p1149_p13) target bundleno = 73 (0x49), region = 16 }
  0x1d   : > { %159 = sbr.rel (!%p1603_p5) target bundleno = 34 (0x22), region = 20  ;;  %s161_s11 = sand.u32 (%p1603_p5), 1, %s1493_s17  }
  0x1e   : > { %s1236_s26 = sshll.u32 (%p1603_p5), %s1505_s20, 3  ;;  %s1150_s27 = sshll.u32 (%p1603_p5), %s161_s11, 4 }
  0x1f   : > { %s169_s5 = scalar_lea.vmem (%p1603_p5), %s1931_s0, %s1236_s26  ;;  %s163_s23 = scalar_lea.vmem (%p1603_p5), [#allocation3], %s1150_s27 }
  0x20   : > { %v200_v0 = vld [vmem:[%s169_s5] sm:$0xff] (%p1603_p5)  ;;  %v202_v1 = vld [vmem:[%s169_s5 + $0x18] sm:$0xff] (%p1603_p5) }
  0x21   : > { %201 = vst [vmem:[%s163_s23] sm:$0xff] (%p1603_p5), %v200_v0  ;;  %203 = vst [vmem:[%s163_s23 + $0x8] sm:$0xff] (%p1603_p5), %v202_v1 }
  0x22 PF: > { %209 = sbr.rel (!%p1617_p9) target bundleno = 73 (0x49), region = 58  ;;  %s211_s28 = sand.u32 (%p1617_p9), 1, %s1485_s15  }
  0x23   : > { %s1155_s7 = sshll.u32 (%p1617_p9), %s1509_s21, 2  ;;  %s1153_s25 = sshll.u32 (%p1617_p9), %s211_s28, 9 }
  0x24   : > { %s1237_s11 = sshll.u32 (%p1617_p9), %s1505_s20, 8  ;;  %s1655_s6 = scalar_lea.vmem (%p1617_p9), [#allocation4], %s1153_s25 }
  0x25   : > { %s217_s24 = sadd.s32 (%p1617_p9), %s1237_s11, %s1155_s7 }
  0x26   : > { %s1157_s30 = sshll.u32 (%p1617_p9), %s217_s24, 2 }
  0x27   : > { %s1650_s4 = scalar_lea.vmem %s1932_s1, %s1157_s30 }
  0x28   : > { %v232_v2 = vld [vmem:[%s1650_s4] sm:$0xff]  ;;  %v234_v3 = vld [vmem:[%s1650_s4 + $0x8] sm:$0xff] }
  0x29   : > { %v236_v4 = vld [vmem:[%s1650_s4 + $0x20] sm:$0xff]  ;;  %233 = vst [vmem:[%s1655_s6] sm:$0xff] %v232_v2  ;;  %235 = vst [vmem:[%s1655_s6 + $0x8] sm:$0xff] %v234_v3  ;;  %v238_v5 = vld [vmem:[%s1650_s4 + $0x28] sm:$0xff] }
  0x2a   : > { %237 = vst [vmem:[%s1655_s6 + $0x10] sm:$0xff] %v236_v4  ;;  %v240_v6 = vld [vmem:[%s1650_s4 + $0x40] sm:$0xff]  ;;  %v242_v7 = vld [vmem:[%s1650_s4 + $0x48] sm:$0xff]  ;;  %239 = vst [vmem:[%s1655_s6 + $0x18] sm:$0xff] %v238_v5 }
  0x2b   : > { %241 = vst [vmem:[%s1655_s6 + $0x20] sm:$0xff] %v240_v6  ;;  %243 = vst [vmem:[%s1655_s6 + $0x28] sm:$0xff] %v242_v7  ;;  %v244_v8 = vld [vmem:[%s1650_s4 + $0x60] sm:$0xff]  ;;  %v246_v9 = vld [vmem:[%s1650_s4 + $0x68] sm:$0xff] }
  0x2c   : > { %v248_v10 = vld [vmem:[%s1650_s4 + $0x80] sm:$0xff]  ;;  %245 = vst [vmem:[%s1655_s6 + $0x30] sm:$0xff] %v244_v8  ;;  %247 = vst [vmem:[%s1655_s6 + $0x38] sm:$0xff] %v246_v9  ;;  %v250_v11 = vld [vmem:[%s1650_s4 + $0x88] sm:$0xff] }
  0x2d   : > { %249 = vst [vmem:[%s1655_s6 + $0x40] sm:$0xff] %v248_v10  ;;  %v252_v12 = vld [vmem:[%s1650_s4 + $0xa0] sm:$0xff]  ;;  %v254_v13 = vld [vmem:[%s1650_s4 + $0xa8] sm:$0xff]  ;;  %251 = vst [vmem:[%s1655_s6 + $0x48] sm:$0xff] %v250_v11 }
  0x2e   : > { %253 = vst [vmem:[%s1655_s6 + $0x50] sm:$0xff] %v252_v12  ;;  %255 = vst [vmem:[%s1655_s6 + $0x58] sm:$0xff] %v254_v13  ;;  %v256_v14 = vld [vmem:[%s1650_s4 + $0xc0] sm:$0xff]  ;;  %v258_v15 = vld [vmem:[%s1650_s4 + $0xc8] sm:$0xff] }
  0x2f   : > { %v260_v16 = vld [vmem:[%s1650_s4 + $0xe0] sm:$0xff]  ;;  %257 = vst [vmem:[%s1655_s6 + $0x60] sm:$0xff] %v256_v14  ;;  %259 = vst [vmem:[%s1655_s6 + $0x68] sm:$0xff] %v258_v15  ;;  %v262_v17 = vld [vmem:[%s1650_s4 + $0xe8] sm:$0xff] }
  0x30   : > { %261 = vst [vmem:[%s1655_s6 + $0x70] sm:$0xff] %v260_v16  ;;  %v264_v18 = vld [vmem:[%s1650_s4 + $0x100] sm:$0xff]  ;;  %v266_v19 = vld [vmem:[%s1650_s4 + $0x108] sm:$0xff]  ;;  %263 = vst [vmem:[%s1655_s6 + $0x78] sm:$0xff] %v262_v17 }
  0x31   : > { %265 = vst [vmem:[%s1655_s6 + $0x80] sm:$0xff] %v264_v18  ;;  %267 = vst [vmem:[%s1655_s6 + $0x88] sm:$0xff] %v266_v19  ;;  %v268_v20 = vld [vmem:[%s1650_s4 + $0x120] sm:$0xff]  ;;  %v270_v21 = vld [vmem:[%s1650_s4 + $0x128] sm:$0xff] }
  0x32   : > { %v272_v22 = vld [vmem:[%s1650_s4 + $0x140] sm:$0xff]  ;;  %269 = vst [vmem:[%s1655_s6 + $0x90] sm:$0xff] %v268_v20  ;;  %271 = vst [vmem:[%s1655_s6 + $0x98] sm:$0xff] %v270_v21  ;;  %v274_v23 = vld [vmem:[%s1650_s4 + $0x148] sm:$0xff] }
  0x33   : > { %273 = vst [vmem:[%s1655_s6 + $0xa0] sm:$0xff] %v272_v22  ;;  %v276_v24 = vld [vmem:[%s1650_s4 + $0x160] sm:$0xff]  ;;  %v278_v25 = vld [vmem:[%s1650_s4 + $0x168] sm:$0xff]  ;;  %275 = vst [vmem:[%s1655_s6 + $0xa8] sm:$0xff] %v274_v23 }
  0x34   : > { %277 = vst [vmem:[%s1655_s6 + $0xb0] sm:$0xff] %v276_v24  ;;  %279 = vst [vmem:[%s1655_s6 + $0xb8] sm:$0xff] %v278_v25  ;;  %v280_v26 = vld [vmem:[%s1650_s4 + $0x180] sm:$0xff]  ;;  %v282_v27 = vld [vmem:[%s1650_s4 + $0x188] sm:$0xff] }
  0x35   : > { %v284_v28 = vld [vmem:[%s1650_s4 + $0x1a0] sm:$0xff]  ;;  %281 = vst [vmem:[%s1655_s6 + $0xc0] sm:$0xff] %v280_v26  ;;  %283 = vst [vmem:[%s1655_s6 + $0xc8] sm:$0xff] %v282_v27  ;;  %v286_v29 = vld [vmem:[%s1650_s4 + $0x1a8] sm:$0xff] }
  0x36   : > { %285 = vst [vmem:[%s1655_s6 + $0xd0] sm:$0xff] %v284_v28  ;;  %v288_v30 = vld [vmem:[%s1650_s4 + $0x1c0] sm:$0xff]  ;;  %v290_v31 = vld [vmem:[%s1650_s4 + $0x1c8] sm:$0xff]  ;;  %287 = vst [vmem:[%s1655_s6 + $0xd8] sm:$0xff] %v286_v29 }
  0x37   : > { %289 = vst [vmem:[%s1655_s6 + $0xe0] sm:$0xff] %v288_v30  ;;  %291 = vst [vmem:[%s1655_s6 + $0xe8] sm:$0xff] %v290_v31  ;;  %v292_v32 = vld [vmem:[%s1650_s4 + $0x1e0] sm:$0xff]  ;;  %v294_v33 = vld [vmem:[%s1650_s4 + $0x1e8] sm:$0xff] }
  0x38   : > { %v296_v34 = vld [vmem:[%s1650_s4 + $0x200] sm:$0xff]  ;;  %293 = vst [vmem:[%s1655_s6 + $0xf0] sm:$0xff] %v292_v32  ;;  %295 = vst [vmem:[%s1655_s6 + $0xf8] sm:$0xff] %v294_v33  ;;  %v298_v35 = vld [vmem:[%s1650_s4 + $0x208] sm:$0xff] }
  0x39   : > { %297 = vst [vmem:[%s1655_s6 + $0x100] sm:$0xff] %v296_v34  ;;  %v300_v36 = vld [vmem:[%s1650_s4 + $0x220] sm:$0xff]  ;;  %v302_v37 = vld [vmem:[%s1650_s4 + $0x228] sm:$0xff]  ;;  %299 = vst [vmem:[%s1655_s6 + $0x108] sm:$0xff] %v298_v35 }
  0x3a   : > { %301 = vst [vmem:[%s1655_s6 + $0x110] sm:$0xff] %v300_v36  ;;  %303 = vst [vmem:[%s1655_s6 + $0x118] sm:$0xff] %v302_v37  ;;  %v304_v38 = vld [vmem:[%s1650_s4 + $0x240] sm:$0xff]  ;;  %v306_v39 = vld [vmem:[%s1650_s4 + $0x248] sm:$0xff] }
  0x3b   : > { %v308_v40 = vld [vmem:[%s1650_s4 + $0x260] sm:$0xff]  ;;  %305 = vst [vmem:[%s1655_s6 + $0x120] sm:$0xff] %v304_v38  ;;  %307 = vst [vmem:[%s1655_s6 + $0x128] sm:$0xff] %v306_v39  ;;  %v310_v41 = vld [vmem:[%s1650_s4 + $0x268] sm:$0xff] }
  0x3c   : > { %309 = vst [vmem:[%s1655_s6 + $0x130] sm:$0xff] %v308_v40  ;;  %v312_v42 = vld [vmem:[%s1650_s4 + $0x280] sm:$0xff]  ;;  %v314_v43 = vld [vmem:[%s1650_s4 + $0x288] sm:$0xff]  ;;  %311 = vst [vmem:[%s1655_s6 + $0x138] sm:$0xff] %v310_v41 }
  0x3d   : > { %313 = vst [vmem:[%s1655_s6 + $0x140] sm:$0xff] %v312_v42  ;;  %315 = vst [vmem:[%s1655_s6 + $0x148] sm:$0xff] %v314_v43  ;;  %v316_v44 = vld [vmem:[%s1650_s4 + $0x2a0] sm:$0xff]  ;;  %v318_v45 = vld [vmem:[%s1650_s4 + $0x2a8] sm:$0xff] }
  0x3e   : > { %v320_v46 = vld [vmem:[%s1650_s4 + $0x2c0] sm:$0xff]  ;;  %317 = vst [vmem:[%s1655_s6 + $0x150] sm:$0xff] %v316_v44  ;;  %319 = vst [vmem:[%s1655_s6 + $0x158] sm:$0xff] %v318_v45  ;;  %v322_v47 = vld [vmem:[%s1650_s4 + $0x2c8] sm:$0xff] }
  0x3f   : > { %321 = vst [vmem:[%s1655_s6 + $0x160] sm:$0xff] %v320_v46  ;;  %v324_v48 = vld [vmem:[%s1650_s4 + $0x2e0] sm:$0xff]  ;;  %v326_v49 = vld [vmem:[%s1650_s4 + $0x2e8] sm:$0xff]  ;;  %323 = vst [vmem:[%s1655_s6 + $0x168] sm:$0xff] %v322_v47 }
  0x40   : > { %325 = vst [vmem:[%s1655_s6 + $0x170] sm:$0xff] %v324_v48  ;;  %327 = vst [vmem:[%s1655_s6 + $0x178] sm:$0xff] %v326_v49  ;;  %v328_v50 = vld [vmem:[%s1650_s4 + $0x300] sm:$0xff]  ;;  %v330_v51 = vld [vmem:[%s1650_s4 + $0x308] sm:$0xff] }
  0x41   : > { %v332_v52 = vld [vmem:[%s1650_s4 + $0x320] sm:$0xff]  ;;  %329 = vst [vmem:[%s1655_s6 + $0x180] sm:$0xff] %v328_v50  ;;  %331 = vst [vmem:[%s1655_s6 + $0x188] sm:$0xff] %v330_v51  ;;  %v334_v53 = vld [vmem:[%s1650_s4 + $0x328] sm:$0xff] }
  0x42   : > { %333 = vst [vmem:[%s1655_s6 + $0x190] sm:$0xff] %v332_v52  ;;  %v336_v54 = vld [vmem:[%s1650_s4 + $0x340] sm:$0xff]  ;;  %v338_v55 = vld [vmem:[%s1650_s4 + $0x348] sm:$0xff]  ;;  %335 = vst [vmem:[%s1655_s6 + $0x198] sm:$0xff] %v334_v53 }
  0x43   : > { %337 = vst [vmem:[%s1655_s6 + $0x1a0] sm:$0xff] %v336_v54  ;;  %339 = vst [vmem:[%s1655_s6 + $0x1a8] sm:$0xff] %v338_v55  ;;  %v340_v56 = vld [vmem:[%s1650_s4 + $0x360] sm:$0xff]  ;;  %v342_v57 = vld [vmem:[%s1650_s4 + $0x368] sm:$0xff] }
  0x44   : > { %v344_v58 = vld [vmem:[%s1650_s4 + $0x380] sm:$0xff]  ;;  %341 = vst [vmem:[%s1655_s6 + $0x1b0] sm:$0xff] %v340_v56  ;;  %343 = vst [vmem:[%s1655_s6 + $0x1b8] sm:$0xff] %v342_v57  ;;  %v346_v59 = vld [vmem:[%s1650_s4 + $0x388] sm:$0xff] }
  0x45   : > { %345 = vst [vmem:[%s1655_s6 + $0x1c0] sm:$0xff] %v344_v58  ;;  %v348_v60 = vld [vmem:[%s1650_s4 + $0x3a0] sm:$0xff]  ;;  %v350_v61 = vld [vmem:[%s1650_s4 + $0x3a8] sm:$0xff]  ;;  %347 = vst [vmem:[%s1655_s6 + $0x1c8] sm:$0xff] %v346_v59 }
  0x46   : > { %349 = vst [vmem:[%s1655_s6 + $0x1d0] sm:$0xff] %v348_v60  ;;  %351 = vst [vmem:[%s1655_s6 + $0x1d8] sm:$0xff] %v350_v61  ;;  %v352_v62 = vld [vmem:[%s1650_s4 + $0x3c0] sm:$0xff]  ;;  %v354_v63 = vld [vmem:[%s1650_s4 + $0x3c8] sm:$0xff] }
  0x47   : > { %v356_v0 = vld [vmem:[%s1650_s4 + $0x3e0] sm:$0xff]  ;;  %353 = vst [vmem:[%s1655_s6 + $0x1e0] sm:$0xff] %v352_v62  ;;  %355 = vst [vmem:[%s1655_s6 + $0x1e8] sm:$0xff] %v354_v63  ;;  %v358_v1 = vld [vmem:[%s1650_s4 + $0x3e8] sm:$0xff] }
  0x48   : > { %357 = vst [vmem:[%s1655_s6 + $0x1f0] sm:$0xff] %v356_v0  ;;  %359 = vst [vmem:[%s1655_s6 + $0x1f8] sm:$0xff] %v358_v1 }
  0x49 PF: > { %p1158_p0 = scmp.ge.s32.totalorder %s1513_s22, 1  ;;  %p372_p1 = scmp.lt.s32.totalorder %s1513_s22, 7 }
  0x4b   : > { %p373_p2 = pnand %p1158_p0, %p372_p1 }
  0x4c   : > { %s379_s24 = sand.u32 (!%p373_p2), 1, %s1489_s16   ;;  %s386_s25 = sand.u32 (!%p373_p2), 1, %s1481_s14  }
  0x4d   : > { %376 = sbr.rel (%p373_p2) target bundleno = 383 (0x17f), region = 85  ;;  %s1786_s30 = sshll.u32 (!%p373_p2), %s379_s24, 4 }
  0x4e   : > { %s1160_s27 = sshll.u32 (!%p373_p2), %s386_s25, 9  ;;  %s413_s5 = sand.u32 (!%p373_p2), 1, %s1473_s12  }
  0x4f   : > { %s1162_s23 = sshll.u32 (!%p373_p2), %s1501_s19, 2  ;;  %s1161_s28 = sshll.u32 (!%p373_p2), %s413_s5, 6 }
  0x50   : > { %p421_p3 = scmp.lt.s32.totalorder (!%p373_p2), %s1162_s23, 7  ;;  %s381_s26 = scalar_lea.vmem (!%p373_p2), [#allocation3], %s1786_s30 }
  0x51   : > { %s1797_s4 = scalar_lea.vmem (!%p373_p2), [#allocation4], %s1160_s27  ;;  %s1799_s16 = scalar_lea.vmem (!%p373_p2), [#allocation5], %s1161_s28 }
  0x52   : > { %s1963_s23 = smov (!%p421_p3, %s1162_s23), 7  ;;  %p1163_p4 = scmp.ne.s32.totalorder %s1497_s18, 0 }
  0x53   : > { %s423_s29 = scalar_lea.vmem %s1933_s2, %s1963_s23 }
  0x54   : > { %430 = sbr.rel (%p1163_p4) target bundleno = 94 (0x5e), region = 97 }
  0x59   : > { %v1515_v2 = vmov 0.0  }
  0x5a   : > { %431 = vst [vmem:[#allocation2 + $0x30] sm:$0xff] %v1515_v2  ;;  %432 = vst [vmem:[#allocation2] sm:$0xff] %v1515_v2 }
  0x5b   : > { %433 = vst [vmem:[#allocation2 + $0x18] sm:$0xff] %v1515_v2  ;;  %434 = vst [vmem:[#allocation2 + $0x10] sm:$0xff] %v1515_v2 }
  0x5c   : > { %435 = vst [vmem:[#allocation2 + $0x8] sm:$0xff] %v1515_v2  ;;  %436 = vst [vmem:[#allocation2 + $0x20] sm:$0xff] %v1515_v2 }
  0x5d   : > { %437 = vst [vmem:[#allocation2 + $0x28] sm:$0xff] %v1515_v2  ;;  %438 = vst [vmem:[#allocation2 + $0x38] sm:$0xff] %v1515_v2 }
  0x5e PF: > { %v1328_v3 = vld [vmem:[%s1797_s4 + $0xe4] ss:$16 sps:$4 sm:$0xff]   ;;  %v1330_v4 = vld [vmem:[%s1797_s4 + $0xec] ss:$16 sps:$4 sm:$0xff]   ;;  %v1332_v5 = vld [vmem:[%s1797_s4 + $0xe0] ss:$16 sps:$4 sm:$0xff]  }
  0x5f   : > { %843 = vmatprep.subr.bf16.mxu0 %v1328_v3  ;;  %v1333_v6 = vld [vmem:[%s1797_s4 + $0xe8] ss:$16 sps:$4 sm:$0xff]   ;;  %886 = vmatprep.subr.bf16.mxu1 %v1330_v4  ;;  %v1334_v7 = vld [vmem:[%s1797_s4 + $0xc4] ss:$16 sps:$4 sm:$0xff]   ;;  %v1336_v8 = vld [vmem:[%s1797_s4 + $0xcc] ss:$16 sps:$4 sm:$0xff]  }
  0x60   : > { %844 = vmatpush1.bf16.msra.mxu0 %v1332_v5  ;;  %887 = vmatpush1.bf16.msra.mxu1 %v1333_v6  ;;  %v1338_v9 = vld [vmem:[%s1797_s4 + $0xc0] ss:$16 sps:$4 sm:$0xff]   ;;  %v1339_v10 = vld [vmem:[%s1797_s4 + $0xc8] ss:$16 sps:$4 sm:$0xff]   ;;  %v1340_v11 = vld [vmem:[%s1797_s4 + $0xa4] ss:$16 sps:$4 sm:$0xff]  }
  0x61   : > { %845 = vmatprep.subr.bf16.mxu0 %v1334_v7  ;;  %888 = vmatprep.subr.bf16.mxu1 %v1336_v8  ;;  %v1342_v12 = vld [vmem:[%s1797_s4 + $0xac] ss:$16 sps:$4 sm:$0xff]   ;;  %v1344_v13 = vld [vmem:[%s1797_s4 + $0xa0] ss:$16 sps:$4 sm:$0xff]   ;;  %v1345_v14 = vld [vmem:[%s1797_s4 + $0xa8] ss:$16 sps:$4 sm:$0xff]  }
  0x62   : > { %v1346_v15 = vld [vmem:[%s1797_s4 + $0x84] ss:$16 sps:$4 sm:$0xff]   ;;  %v1348_v16 = vld [vmem:[%s1797_s4 + $0x8c] ss:$16 sps:$4 sm:$0xff]   ;;  %v1350_v17 = vld [vmem:[%s1797_s4 + $0x80] ss:$16 sps:$4 sm:$0xff]  }
  0x63   : > { %v1351_v18 = vld [vmem:[%s1797_s4 + $0x88] ss:$16 sps:$4 sm:$0xff]   ;;  %v1352_v19 = vld [vmem:[%s1797_s4 + $0x64] ss:$16 sps:$4 sm:$0xff]   ;;  %v1354_v20 = vld [vmem:[%s1797_s4 + $0x6c] ss:$16 sps:$4 sm:$0xff]  }
  0x64   : > { %846 = vmatpush1.bf16.msra.mxu0 %v1338_v9  ;;  %889 = vmatpush1.bf16.msra.mxu1 %v1339_v10  ;;  %v1356_v21 = vld [vmem:[%s1797_s4 + $0x60] ss:$16 sps:$4 sm:$0xff]   ;;  %v1357_v22 = vld [vmem:[%s1797_s4 + $0x68] ss:$16 sps:$4 sm:$0xff]   ;;  %v1358_v23 = vld [vmem:[%s1797_s4 + $0x44] ss:$16 sps:$4 sm:$0xff]  }
  0x65   : > { %847 = vmatprep.subr.bf16.mxu0 %v1340_v11  ;;  %890 = vmatprep.subr.bf16.mxu1 %v1342_v12  ;;  %v1360_v24 = vld [vmem:[%s1797_s4 + $0x4c] ss:$16 sps:$4 sm:$0xff]   ;;  %v1362_v25 = vld [vmem:[%s1797_s4 + $0x40] ss:$16 sps:$4 sm:$0xff]   ;;  %v1363_v26 = vld [vmem:[%s1797_s4 + $0x48] ss:$16 sps:$4 sm:$0xff]  }
  0x66   : > { %v1364_v27 = vld [vmem:[%s1797_s4 + $0x24] ss:$16 sps:$4 sm:$0xff]   ;;  %v1366_v28 = vld [vmem:[%s1797_s4 + $0x2c] ss:$16 sps:$4 sm:$0xff]   ;;  %v1368_v29 = vld [vmem:[%s1797_s4 + $0x20] ss:$16 sps:$4 sm:$0xff]  }
  0x67   : > { %v1369_v30 = vld [vmem:[%s1797_s4 + $0x28] ss:$16 sps:$4 sm:$0xff]   ;;  %v1370_v31 = vld [vmem:[%s1797_s4 + $0x4] ss:$16 sps:$4 sm:$0xff]   ;;  %v1372_v32 = vld [vmem:[%s1797_s4 + $0xc] ss:$16 sps:$4 sm:$0xff]  }
  0x68   : > { %848 = vmatpush1.bf16.msra.mxu0 %v1344_v13  ;;  %891 = vmatpush1.bf16.msra.mxu1 %v1345_v14  ;;  %v1374_v33 = vld [vmem:[%s1797_s4] ss:$16 sps:$4 sm:$0xff]   ;;  %v1375_v34 = vld [vmem:[%s1797_s4 + $0x8] ss:$16 sps:$4 sm:$0xff]   ;;  %v1376_v35 = vld [vmem:[%s1797_s4 + $0x1e4] ss:$16 sps:$4 sm:$0xff]  }
  0x69   : > { %849 = vmatprep.subr.bf16.mxu0 %v1346_v15  ;;  %892 = vmatprep.subr.bf16.mxu1 %v1348_v16  ;;  %v1378_v36 = vld [vmem:[%s1797_s4 + $0x1ec] ss:$16 sps:$4 sm:$0xff]   ;;  %v1380_v37 = vld [vmem:[%s1797_s4 + $0x1e0] ss:$16 sps:$4 sm:$0xff]   ;;  %v1381_v38 = vld [vmem:[%s1797_s4 + $0x1e8] ss:$16 sps:$4 sm:$0xff]  }
  0x6a   : > { %v1382_v39 = vld [vmem:[%s1797_s4 + $0x1c4] ss:$16 sps:$4 sm:$0xff]   ;;  %v1384_v40 = vld [vmem:[%s1797_s4 + $0x1cc] ss:$16 sps:$4 sm:$0xff]   ;;  %v1386_v41 = vld [vmem:[%s1797_s4 + $0x1c0] ss:$16 sps:$4 sm:$0xff]  }
  0x6b   : > { %v1387_v42 = vld [vmem:[%s1797_s4 + $0x1c8] ss:$16 sps:$4 sm:$0xff]   ;;  %v1388_v43 = vld [vmem:[%s1797_s4 + $0x1a4] ss:$16 sps:$4 sm:$0xff]   ;;  %v1390_v44 = vld [vmem:[%s1797_s4 + $0x1ac] ss:$16 sps:$4 sm:$0xff]  }
  0x6c   : > { %850 = vmatpush1.bf16.msra.mxu0 %v1350_v17  ;;  %893 = vmatpush1.bf16.msra.mxu1 %v1351_v18  ;;  %v1392_v45 = vld [vmem:[%s1797_s4 + $0x1a0] ss:$16 sps:$4 sm:$0xff]   ;;  %v1393_v46 = vld [vmem:[%s1797_s4 + $0x1a8] ss:$16 sps:$4 sm:$0xff]   ;;  %v1394_v47 = vld [vmem:[%s1797_s4 + $0x184] ss:$16 sps:$4 sm:$0xff]  }
  0x6d   : > { %851 = vmatprep.subr.bf16.mxu0 %v1352_v19  ;;  %894 = vmatprep.subr.bf16.mxu1 %v1354_v20  ;;  %v1396_v48 = vld [vmem:[%s1797_s4 + $0x18c] ss:$16 sps:$4 sm:$0xff]   ;;  %v1398_v50 = vld [vmem:[%s1797_s4 + $0x180] ss:$16 sps:$4 sm:$0xff]   ;;  %v1399_v51 = vld [vmem:[%s1797_s4 + $0x188] ss:$16 sps:$4 sm:$0xff]  }
  0x6e   : > { %v1426_v49 = vld [vmem:[%s381_s26 + $0x4] ss:$8 sps:$4 sm:$0xff]   ;;  %v1404_v54 = vld [vmem:[%s1797_s4 + $0x160] ss:$16 sps:$4 sm:$0xff]   ;;  %v1405_v55 = vld [vmem:[%s1797_s4 + $0x168] ss:$16 sps:$4 sm:$0xff]  }
  0x6f   : > { %v1400_v52 = vld [vmem:[%s1797_s4 + $0x164] ss:$16 sps:$4 sm:$0xff]   ;;  %v1402_v53 = vld [vmem:[%s1797_s4 + $0x16c] ss:$16 sps:$4 sm:$0xff]   ;;  %875 = vmatprep.mubr.bf16.mxu0 %v1426_v49  ;;  %918 = vmatprep.mubr.bf16.mxu1 %v1426_v49  ;;  %v1410_v58 = vld [vmem:[%s1797_s4 + $0x140] ss:$16 sps:$4 sm:$0xff]  }
  0x70   : > { %852 = vmatpush1.bf16.msra.mxu0 %v1356_v21  ;;  %895 = vmatpush1.bf16.msra.mxu1 %v1357_v22  ;;  %v1406_v56 = vld [vmem:[%s1797_s4 + $0x144] ss:$16 sps:$4 sm:$0xff]   ;;  %v1408_v57 = vld [vmem:[%s1797_s4 + $0x14c] ss:$16 sps:$4 sm:$0xff]   ;;  %v1411_v59 = vld [vmem:[%s1797_s4 + $0x148] ss:$16 sps:$4 sm:$0xff]  }
  0x71   : > { %853 = vmatprep.subr.bf16.mxu0 %v1358_v23  ;;  %896 = vmatprep.subr.bf16.mxu1 %v1360_v24  ;;  %v1412_v60 = vld [vmem:[%s1797_s4 + $0x124] ss:$16 sps:$4 sm:$0xff]   ;;  %v1414_v61 = vld [vmem:[%s1797_s4 + $0x12c] ss:$16 sps:$4 sm:$0xff]   ;;  %v1416_v62 = vld [vmem:[%s1797_s4 + $0x120] ss:$16 sps:$4 sm:$0xff]  }
  0x72   : > { %v1417_v63 = vld [vmem:[%s1797_s4 + $0x128] ss:$16 sps:$4 sm:$0xff]   ;;  %v1418_v0 = vld [vmem:[%s1797_s4 + $0x104] ss:$16 sps:$4 sm:$0xff]   ;;  %v1420_v1 = vld [vmem:[%s1797_s4 + $0x10c] ss:$16 sps:$4 sm:$0xff]  }
  0x73   : > { %v1422_v2 = vld [vmem:[%s1797_s4 + $0x100] ss:$16 sps:$4 sm:$0xff]   ;;  %v1423_v3 = vld [vmem:[%s1797_s4 + $0x108] ss:$16 sps:$4 sm:$0xff]   ;;  %p1230_p5 = scmp.ne.s32.totalorder %s1497_s18, 2 }
  0x74   : > { %854 = vmatpush1.bf16.msra.mxu0 %v1362_v25  ;;  %897 = vmatpush1.bf16.msra.mxu1 %v1363_v26  ;;  %v1424_v4 = vld [vmem:[%s381_s26] ss:$8 sps:$4 sm:$0xff]  }
  0x75   : > { %855 = vmatprep.subr.bf16.mxu0 %v1364_v27  ;;  %898 = vmatprep.subr.bf16.mxu1 %v1366_v28  ;;  %v439_v5 = vld [vmem:[#allocation2 + $0x30] sm:$0xff]  ;;  %v441_v6 = vld [vmem:[#allocation2 + $0x18] sm:$0xff]  ;;  %v440_v9 = vld [vmem:[#allocation2] sm:$0xff] }
  0x76   : > { %v442_v10 = vld [vmem:[#allocation2 + $0x10] sm:$0xff]  ;;  %v443_v15 = vld [vmem:[#allocation2 + $0x8] sm:$0xff]  ;;  %v444_v21 = vld [vmem:[#allocation2 + $0x20] sm:$0xff] }
  0x77   : > { %v445_v16 = vld [vmem:[#allocation2 + $0x28] sm:$0xff]  ;;  %v446_v22 = vld [vmem:[#allocation2 + $0x38] sm:$0xff] }
  0x78   : > { %856 = vmatpush1.bf16.msra.mxu0 %v1368_v29  ;;  %899 = vmatpush1.bf16.msra.mxu1 %v1369_v30 }
  0x79   : > { %857 = vmatprep.subr.bf16.mxu0 %v1370_v31  ;;  %900 = vmatprep.subr.bf16.mxu1 %v1372_v32 }
  0x7c   : > { %858 = vmatpush1.bf16.msra.mxu0 %v1374_v33  ;;  %901 = vmatpush1.bf16.msra.mxu1 %v1375_v34 }
  0x7d   : > { %859 = vmatprep.subr.bf16.mxu0 %v1376_v35  ;;  %902 = vmatprep.subr.bf16.mxu1 %v1378_v36 }
  0x80   : > { %860 = vmatpush2.bf16.msra.mxu0 %v1380_v37  ;;  %903 = vmatpush2.bf16.msra.mxu1 %v1381_v38 }
  0x81   : > { %861 = vmatprep.subr.bf16.mxu0 %v1382_v39  ;;  %904 = vmatprep.subr.bf16.mxu1 %v1384_v40 }
  0x84   : > { %862 = vmatpush2.bf16.msra.mxu0 %v1386_v41  ;;  %905 = vmatpush2.bf16.msra.mxu1 %v1387_v42 }
  0x85   : > { %863 = vmatprep.subr.bf16.mxu0 %v1388_v43  ;;  %906 = vmatprep.subr.bf16.mxu1 %v1390_v44 }
  0x88   : > { %864 = vmatpush2.bf16.msra.mxu0 %v1392_v45  ;;  %907 = vmatpush2.bf16.msra.mxu1 %v1393_v46 }
  0x89   : > { %865 = vmatprep.subr.bf16.mxu0 %v1394_v47  ;;  %908 = vmatprep.subr.bf16.mxu1 %v1396_v48 }
  0x8c   : > { %866 = vmatpush2.bf16.msra.mxu0 %v1398_v50  ;;  %909 = vmatpush2.bf16.msra.mxu1 %v1399_v51 }
  0x8d   : > { %867 = vmatprep.subr.bf16.mxu0 %v1400_v52  ;;  %910 = vmatprep.subr.bf16.mxu1 %v1402_v53 }
  0x90   : > { %868 = vmatpush2.bf16.msra.mxu0 %v1404_v54  ;;  %911 = vmatpush2.bf16.msra.mxu1 %v1405_v55 }
  0x91   : > { %869 = vmatprep.subr.bf16.mxu0 %v1406_v56  ;;  %912 = vmatprep.subr.bf16.mxu1 %v1408_v57 }
  0x94   : > { %870 = vmatpush2.bf16.msra.mxu0 %v1410_v58  ;;  %913 = vmatpush2.bf16.msra.mxu1 %v1411_v59 }
  0x95   : > { %871 = vmatprep.subr.bf16.mxu0 %v1412_v60  ;;  %914 = vmatprep.subr.bf16.mxu1 %v1414_v61 }
  0x98   : > { %872 = vmatpush2.bf16.msra.mxu0 %v1416_v62  ;;  %915 = vmatpush2.bf16.msra.mxu1 %v1417_v63 }
  0x99   : > { %873 = vmatprep.subr.bf16.mxu0 %v1418_v0  ;;  %916 = vmatprep.subr.bf16.mxu1 %v1420_v1 }
  0x9c   : > { %874 = vmatpush2.bf16.msra.mxu0 %v1422_v2  ;;  %917 = vmatpush2.bf16.msra.mxu1 %v1423_v3 }
  0x9f   : > { %876 = vmatmul.mubr.bf16.vlgmr.msra.gmra.mxu0 %v1424_v4  ;;  %919 = vmatmul.mubr.bf16.vlgmr.msra.gmra.mxu1 %v1424_v4 }
 0x15f   : > { %v877_v7 = vpop.f32.mrf.mxu0  ;;  %v920_v8 = vpop.f32.mrf.mxu1 }
 0x160   : > { %v929_v11 = vadd.f32 %v877_v7, %v439_v5  ;;  %v931_v12 = vadd.f32 %v920_v8, %v441_v6 }
 0x161   : > { %v879_v13 = vpop.f32.mrf.mxu0  ;;  %v922_v14 = vpop.f32.mrf.mxu1 }
 0x162   : > { %937 = vst [vmem:[#allocation2 + $0x30] sm:$0xff] %v929_v11  ;;  %939 = vst [vmem:[#allocation2 + $0x18] sm:$0xff] %v931_v12  ;;  %v930_v17 = vadd.f32 %v879_v13, %v440_v9  ;;  %v932_v18 = vadd.f32 %v922_v14, %v442_v10 }
 0x163   : > { %v881_v19 = vpop.f32.mrf.mxu0  ;;  %v924_v20 = vpop.f32.mrf.mxu1 }
 0x164   : > { %938 = vst [vmem:[#allocation2] sm:$0xff] %v930_v17  ;;  %940 = vst [vmem:[#allocation2 + $0x10] sm:$0xff] %v932_v18  ;;  %v933_v23 = vadd.f32 %v881_v19, %v443_v15  ;;  %v935_v24 = vadd.f32 %v924_v20, %v445_v16  ;;  %948 = sbr.rel (%p1230_p5) target bundleno = 375 (0x177), region = 101 }
 0x165   : > { %v883_v25 = vpop.f32.mrf.mxu0  ;;  %v926_v26 = vpop.f32.mrf.mxu1 }
 0x166   : > { %941 = vst [vmem:[#allocation2 + $0x8] sm:$0xff] %v933_v23  ;;  %943 = vst [vmem:[#allocation2 + $0x28] sm:$0xff] %v935_v24  ;;  %v934_v27 = vadd.f32 %v883_v25, %v444_v21  ;;  %v936_v28 = vadd.f32 %v926_v26, %v446_v22 }
 0x168   : > { %942 = vst [vmem:[#allocation2 + $0x20] sm:$0xff] %v934_v27  ;;  %944 = vst [vmem:[#allocation2 + $0x38] sm:$0xff] %v936_v28 }
 0x169   : > { %v959_v29 = vlaneseq  ;;  %v957_v31 = vld [vmem:[%s423_s29] sm:$0xf]  ;;  %v949_v32 = vld [vmem:[#allocation2 + $0x30] sm:$0xff]  ;;  %v951_v38 = vld [vmem:[#allocation2 + $0x18] sm:$0xff] }
 0x16b   : > { %v960_v30 = vshrl.u32 %v959_v29, 7  ;;  %v950_v34 = vld [vmem:[#allocation2] sm:$0xff]  ;;  %v952_v39 = vld [vmem:[#allocation2 + $0x10] sm:$0xff] }
 0x16d   : > { %v961_v33 = vsub.s32 0, %v960_v30  ;;  %v965_v35 = vsub.s32 1, %v960_v30  ;;  %v969_v36 = vsub.s32 2, %v960_v30  ;;  %v973_v37 = vsub.s32 3, %v960_v30  ;;  %v953_v40 = vld [vmem:[#allocation2 + $0x8] sm:$0xff] }
 0x16e   : > { %v955_v46 = vld [vmem:[#allocation2 + $0x28] sm:$0xff] }
 0x16f   : > { %v962_v41 = vrot.slane %v957_v31, %v961_v33  ;;  %v966_v42 = vrot.slane %v957_v31, %v965_v35  ;;  %v970_v43 = vrot.slane %v957_v31, %v969_v36  ;;  %v974_v44 = vrot.slane %v957_v31, %v973_v37  ;;  %v954_v45 = vld [vmem:[#allocation2 + $0x20] sm:$0xff]  ;;  %v956_v47 = vld [vmem:[#allocation2 + $0x38] sm:$0xff] }
 0x171   : > { %v979_v48 = vadd.f32 %v962_v41, %v949_v32  ;;  %v980_v49 = vadd.f32 %v966_v42, %v950_v34  ;;  %v981_v50 = vadd.f32 %v970_v43, %v951_v38  ;;  %v982_v51 = vadd.f32 %v974_v44, %v952_v39 }
 0x172   : > { %v983_v52 = vadd.f32 %v962_v41, %v953_v40  ;;  %v984_v53 = vadd.f32 %v966_v42, %v954_v45  ;;  %v985_v54 = vadd.f32 %v970_v43, %v955_v46  ;;  %v986_v55 = vadd.f32 %v974_v44, %v956_v47 }
 0x173   : > { %987 = vst [vmem:[%s1799_s16] sm:$0xff] %v979_v48  ;;  %988 = vst [vmem:[%s1799_s16 + $0x8] sm:$0xff] %v980_v49 }
 0x174   : > { %989 = vst [vmem:[%s1799_s16 + $0x10] sm:$0xff] %v981_v50  ;;  %990 = vst [vmem:[%s1799_s16 + $0x18] sm:$0xff] %v982_v51 }
 0x175   : > { %991 = vst [vmem:[%s1799_s16 + $0x20] sm:$0xff] %v983_v52  ;;  %992 = vst [vmem:[%s1799_s16 + $0x28] sm:$0xff] %v984_v53 }
 0x176   : > { %993 = vst [vmem:[%s1799_s16 + $0x30] sm:$0xff] %v985_v54  ;;  %994 = vst [vmem:[%s1799_s16 + $0x38] sm:$0xff] %v986_v55 }
 0x177 PF: > { %1001 = sbr.rel (!%p1630_p12) target bundleno = 383 (0x17f), region = 105  ;;  %s1238_s18 = sshll.u32 (%p1630_p12), %s1501_s19, 5 }
 0x178   : > { %s1007_s25 = scalar_lea.vmem (%p1630_p12), %s1934_s3, %s1238_s18 }
 0x17a   : > { %v1020_v56 = vld [vmem:[%s1799_s16] sm:$0xff] (%p1630_p12)  ;;  %v1022_v57 = vld [vmem:[%s1799_s16 + $0x8] sm:$0xff] (%p1630_p12) }
 0x17b   : > { %v1024_v58 = vld [vmem:[%s1799_s16 + $0x10] sm:$0xff] (%p1630_p12)  ;;  %v1026_v59 = vld [vmem:[%s1799_s16 + $0x18] sm:$0xff] (%p1630_p12)  ;;  %1021 = vst [vmem:[%s1007_s25] sm:$0xff] (%p1630_p12), %v1020_v56  ;;  %1023 = vst [vmem:[%s1007_s25 + $0x8] sm:$0xff] (%p1630_p12), %v1022_v57 }
 0x17c   : > { %v1028_v60 = vld [vmem:[%s1799_s16 + $0x20] sm:$0xff]  ;;  %v1030_v61 = vld [vmem:[%s1799_s16 + $0x28] sm:$0xff]  ;;  %1025 = vst [vmem:[%s1007_s25 + $0x10] sm:$0xff] %v1024_v58  ;;  %1027 = vst [vmem:[%s1007_s25 + $0x18] sm:$0xff] %v1026_v59 }
 0x17d   : > { %1029 = vst [vmem:[%s1007_s25 + $0x40] sm:$0xff] %v1028_v60  ;;  %1031 = vst [vmem:[%s1007_s25 + $0x48] sm:$0xff] %v1030_v61  ;;  %v1032_v62 = vld [vmem:[%s1799_s16 + $0x30] sm:$0xff]  ;;  %v1034_v63 = vld [vmem:[%s1799_s16 + $0x38] sm:$0xff] }
 0x17e   : > { %1033 = vst [vmem:[%s1007_s25 + $0x50] sm:$0xff] %v1032_v62  ;;  %1035 = vst [vmem:[%s1007_s25 + $0x58] sm:$0xff] %v1034_v63 }
 0x17f PF: > { %s13_s22 = sadd.s32 1, %s1513_s22   ;;  %s1943_s19 = sld [smem:[#allocation8_spill]] }
 0x180   : > { %p10_p6 = scmp.ge.s32.totalorder %s13_s22, 8   ;;  %s1944_s10 = sld [smem:[#allocation6_spill]] }
 0x181   : > { %s1945_s30 = sld [smem:[#allocation7_spill]]  ;;  %s1946_s12 = smov %s1477_s13 }
 0x182   : > { %s1947_s13 = smov %s1628_s9  ;;  %s1948_s14 = smov %s1485_s15 }
 0x183   : > { %s1949_s15 = smov %s1625_s8  ;;  %s1950_s16 = smov %s1493_s17 }
 0x184   : > { %s1952_s18 = smov %s1505_s20  ;;  %12 = sbr.rel (!%p10_p6) target bundleno = 6 (0x6), region = 170 }
 0x185   : > { %s1951_s17 = smov %s1943_s19  ;;  %s1953_s19 = smov %s1509_s21 }
 0x186   : > { %s1954_s20 = smov %s1944_s10 }
 0x187   : > { %s1955_s21 = smov %s1945_s30 }

// kernel: cnn_tc_forward.3
= control target key start
LH: loop header
LB: loop body
LE: loop exit
PB: predicated region body
PF: predicated region fallthrough
CT: control target
= control target key end

     0   :  { %s8996_s24 = smov 0   ;;  %s11792_s0 = inlined_call_operand.vmem [shape: f32[2,8,1024], index: 0, kind: input, shape index: {}]   ;;  %s11793_s1 = inlined_call_operand.vmem [shape: bf16[1024,1280], index: 1, kind: input, shape index: {}]   ;;  %s11794_s2 = inlined_call_operand.vmem [shape: f32[1,1280], index: 2, kind: input, shape index: {}]   ;;  %s11795_s3 = inlined_call_operand.vmem [shape: f32[3,768], index: 3, kind: input, shape index: {}]   ;;  %s11796_s4 = inlined_call_operand.vmem [shape: f32[1,768], index: 4, kind: input, shape index: {}]   ;;  %s11797_s5 = inlined_call_operand.vmem [shape: f32[1280,128], index: 5, kind: input, shape index: {}]   ;;  %s11798_s6 = inlined_call_operand.vmem [shape: f32[1,128], index: 6, kind: input, shape index: {}]   ;;  %s11799_s7 = inlined_call_operand.vmem [shape: f32[2,3,128], index: 7, kind: output, shape index: {}]  }
   0x1 LB: > { %s7126_s25 = sadd.s32 4294967295, %s8953_s24   ;;  %p7130_p0 = scmp.ge.s32.totalorder %s8953_s24, 1  ;;  %s8953_s24 = sphi %s8996_s24, %s17_s24  }
   0x2   : > { %p237_p1 = scmp.lt.s32.totalorder %s8953_s24, 3 }
   0x4   : > { %p238_p2 = pnand %p7130_p0, %p237_p1 }
   0x5   : > { %p268_p3 = scmp.lt.s32.totalorder (!%p238_p2), %s7126_s25, 1 }
   0x6   : > { %241 = sbr.rel (%p238_p2) target bundleno = 1650 (0x672), region = 48 }
   0xb   : > { %v7985_v0 = vld [vmem:[%s11793_s1 + $0x234] ss:$40 sps:$4 sm:$0xff]   ;;  %v7989_v2 = vld [vmem:[%s11793_s1 + $0x230] ss:$40 sps:$4 sm:$0xff]   ;;  %v7991_v4 = vld [vmem:[%s11793_s1 + $0x1e4] ss:$40 sps:$4 sm:$0xff]  }
   0xc   : > { %v7987_v1 = vld [vmem:[%s11793_s1 + $0x734] ss:$40 sps:$4 sm:$0xff]   ;;  %4187 = vmatprep.subr.bf16.mxu0 %v7985_v0  ;;  %v7990_v3 = vld [vmem:[%s11793_s1 + $0x730] ss:$40 sps:$4 sm:$0xff]   ;;  %v7993_v5 = vld [vmem:[%s11793_s1 + $0x6e4] ss:$40 sps:$4 sm:$0xff]  }
   0xd   : > { %4228 = vmatprep.subr.bf16.mxu1 %v7987_v1  ;;  %4188 = vmatpush1.bf16.msra.mxu0 %v7989_v2  ;;  %v7995_v6 = vld [vmem:[%s11793_s1 + $0x1e0] ss:$40 sps:$4 sm:$0xff]   ;;  %v7997_v8 = vld [vmem:[%s11793_s1 + $0x194] ss:$40 sps:$4 sm:$0xff]   ;;  %v8001_v10 = vld [vmem:[%s11793_s1 + $0x190] ss:$40 sps:$4 sm:$0xff]  }
   0xe   : > { %4229 = vmatpush1.bf16.msra.mxu1 %v7990_v3  ;;  %4189 = vmatprep.subr.bf16.mxu0 %v7991_v4  ;;  %v7996_v7 = vld [vmem:[%s11793_s1 + $0x6e0] ss:$40 sps:$4 sm:$0xff]   ;;  %v7999_v9 = vld [vmem:[%s11793_s1 + $0x694] ss:$40 sps:$4 sm:$0xff]   ;;  %v8002_v11 = vld [vmem:[%s11793_s1 + $0x690] ss:$40 sps:$4 sm:$0xff]  }
   0xf   : > { %4230 = vmatprep.subr.bf16.mxu1 %v7993_v5  ;;  %v8003_v12 = vld [vmem:[%s11793_s1 + $0x144] ss:$40 sps:$4 sm:$0xff]   ;;  %v8007_v14 = vld [vmem:[%s11793_s1 + $0x140] ss:$40 sps:$4 sm:$0xff]   ;;  %v8009_v16 = vld [vmem:[%s11793_s1 + $0xf4] ss:$40 sps:$4 sm:$0xff]  }
  0x10   : > { %v8005_v13 = vld [vmem:[%s11793_s1 + $0x644] ss:$40 sps:$4 sm:$0xff]   ;;  %v8008_v15 = vld [vmem:[%s11793_s1 + $0x640] ss:$40 sps:$4 sm:$0xff]   ;;  %v8011_v17 = vld [vmem:[%s11793_s1 + $0x5f4] ss:$40 sps:$4 sm:$0xff]  }
  0x11   : > { %4190 = vmatpush1.bf16.msra.mxu0 %v7995_v6  ;;  %v8013_v18 = vld [vmem:[%s11793_s1 + $0xf0] ss:$40 sps:$4 sm:$0xff]   ;;  %v8015_v20 = vld [vmem:[%s11793_s1 + $0xa4] ss:$40 sps:$4 sm:$0xff]   ;;  %v8019_v22 = vld [vmem:[%s11793_s1 + $0xa0] ss:$40 sps:$4 sm:$0xff]  }
  0x12   : > { %4231 = vmatpush1.bf16.msra.mxu1 %v7996_v7  ;;  %4191 = vmatprep.subr.bf16.mxu0 %v7997_v8  ;;  %v8014_v19 = vld [vmem:[%s11793_s1 + $0x5f0] ss:$40 sps:$4 sm:$0xff]   ;;  %v8017_v21 = vld [vmem:[%s11793_s1 + $0x5a4] ss:$40 sps:$4 sm:$0xff]   ;;  %v8020_v23 = vld [vmem:[%s11793_s1 + $0x5a0] ss:$40 sps:$4 sm:$0xff]  }
  0x13   : > { %4232 = vmatprep.subr.bf16.mxu1 %v7999_v9  ;;  %v8021_v24 = vld [vmem:[%s11793_s1 + $0x54] ss:$40 sps:$4 sm:$0xff]   ;;  %v8025_v26 = vld [vmem:[%s11793_s1 + $0x50] ss:$40 sps:$4 sm:$0xff]   ;;  %v8027_v28 = vld [vmem:[%s11793_s1 + $0x4] ss:$40 sps:$4 sm:$0xff]  }
  0x14   : > { %v8023_v25 = vld [vmem:[%s11793_s1 + $0x554] ss:$40 sps:$4 sm:$0xff]   ;;  %v8026_v27 = vld [vmem:[%s11793_s1 + $0x550] ss:$40 sps:$4 sm:$0xff]   ;;  %v8029_v29 = vld [vmem:[%s11793_s1 + $0x504] ss:$40 sps:$4 sm:$0xff]  }
  0x15   : > { %4192 = vmatpush1.bf16.msra.mxu0 %v8001_v10  ;;  %v8031_v30 = vld [vmem:[%s11793_s1] ss:$40 sps:$4 sm:$0xff]   ;;  %v8033_v32 = vld [vmem:[%s11793_s1 + $0x4b4] ss:$40 sps:$4 sm:$0xff]   ;;  %v8037_v34 = vld [vmem:[%s11793_s1 + $0x4b0] ss:$40 sps:$4 sm:$0xff]  }
  0x16   : > { %4233 = vmatpush1.bf16.msra.mxu1 %v8002_v11  ;;  %4193 = vmatprep.subr.bf16.mxu0 %v8003_v12  ;;  %v8032_v31 = vld [vmem:[%s11793_s1 + $0x500] ss:$40 sps:$4 sm:$0xff]   ;;  %v8035_v33 = vld [vmem:[%s11793_s1 + $0x9b4] ss:$40 sps:$4 sm:$0xff]   ;;  %v8038_v35 = vld [vmem:[%s11793_s1 + $0x9b0] ss:$40 sps:$4 sm:$0xff]  }
  0x17   : > { %4234 = vmatprep.subr.bf16.mxu1 %v8005_v13  ;;  %v8039_v36 = vld [vmem:[%s11793_s1 + $0x464] ss:$40 sps:$4 sm:$0xff]   ;;  %s11801_s25 = smov (!%p268_p3, %s7126_s25), 1  ;;  %v8043_v38 = vld [vmem:[%s11793_s1 + $0x460] ss:$40 sps:$4 sm:$0xff]   ;;  %vm5023_vm2 = vcmask 64512  }
  0x18   : > { %v8041_v37 = vld [vmem:[%s11793_s1 + $0x964] ss:$40 sps:$4 sm:$0xff]   ;;  %v8044_v39 = vld [vmem:[%s11793_s1 + $0x960] ss:$40 sps:$4 sm:$0xff]   ;;  %v8045_v40 = vld [vmem:[%s11793_s1 + $0x414] ss:$40 sps:$4 sm:$0xff]  }
  0x19   : > { %4194 = vmatpush1.bf16.msra.mxu0 %v8007_v14  ;;  %s7800_s22 = sshll.u32 %s11801_s25, 6  ;;  %v8047_v41 = vld [vmem:[%s11793_s1 + $0x914] ss:$40 sps:$4 sm:$0xff]   ;;  %v8049_v42 = vld [vmem:[%s11793_s1 + $0x410] ss:$40 sps:$4 sm:$0xff]   ;;  %s7133_s20 = sshll.u32 %s11801_s25, 2 }
  0x1a   : > { %4235 = vmatpush1.bf16.msra.mxu1 %v8008_v15  ;;  %4195 = vmatprep.subr.bf16.mxu0 %v8009_v16  ;;  %v8050_v43 = vld [vmem:[%s11793_s1 + $0x910] ss:$40 sps:$4 sm:$0xff]   ;;  %s9146_s10 = scalar_lea.vmem %s11792_s0, %s7800_s22  ;;  %v8051_v44 = vld [vmem:[%s11793_s1 + $0x3c4] ss:$40 sps:$4 sm:$0xff]   ;;  %v8055_v47 = vld [vmem:[%s11793_s1 + $0x3c0] ss:$40 sps:$4 sm:$0xff]   ;;  %s276_s23 = scalar_lea.vmem %s11799_s7, %s7133_s20 }
  0x1b   : > { %4236 = vmatprep.subr.bf16.mxu1 %v8011_v17  ;;  %v8053_v45 = vld [vmem:[%s11793_s1 + $0x8c4] ss:$40 sps:$4 sm:$0xff]   ;;  %v8056_v48 = vld [vmem:[%s11793_s1 + $0x8c0] ss:$40 sps:$4 sm:$0xff]   ;;  %v280_v50 = vld [vmem:[%s9146_s10 + $0x18] sm:$0xff] }
  0x1c   : > { %v278_v46 = vld [vmem:[%s9146_s10 + $0x8] sm:$0xff]  ;;  %v8057_v51 = vld [vmem:[%s11793_s1 + $0x374] ss:$40 sps:$4 sm:$0xff]   ;;  %v9167_v52 = vpack.c.bf16 %v280_v50, %v280_v50  ;;  %v8061_v54 = vld [vmem:[%s11793_s1 + $0x370] ss:$40 sps:$4 sm:$0xff]  }
  0x1d   : > { %4196 = vmatpush1.bf16.msra.mxu0 %v8013_v18  ;;  %v9161_v49 = vpack.c.bf16 %v278_v46, %v278_v46  ;;  %v8059_v53 = vld [vmem:[%s11793_s1 + $0x874] ss:$40 sps:$4 sm:$0xff]   ;;  %v8062_v55 = vld [vmem:[%s11793_s1 + $0x870] ss:$40 sps:$4 sm:$0xff]   ;;  %v8063_v56 = vld [vmem:[%s11793_s1 + $0x324] ss:$40 sps:$4 sm:$0xff]  }
  0x1e   : > { %4237 = vmatpush1.bf16.msra.mxu1 %v8014_v19  ;;  %4197 = vmatprep.subr.bf16.mxu0 %v8015_v20  ;;  %v8065_v57 = vld [vmem:[%s11793_s1 + $0x824] ss:$40 sps:$4 sm:$0xff]   ;;  %v8067_v58 = vld [vmem:[%s11793_s1 + $0x320] ss:$40 sps:$4 sm:$0xff]   ;;  %v8069_v60 = vld [vmem:[%s11793_s1 + $0x2d4] ss:$40 sps:$4 sm:$0xff]  }
  0x1f   : > { %4238 = vmatprep.subr.bf16.mxu1 %v8017_v21  ;;  %4219 = vmatprep.mubr.bf16.mxu0 %v9161_v49  ;;  %v8068_v59 = vld [vmem:[%s11793_s1 + $0x820] ss:$40 sps:$4 sm:$0xff]   ;;  %v8071_v61 = vld [vmem:[%s11793_s1 + $0x7d4] ss:$40 sps:$4 sm:$0xff]   ;;  %v8073_v62 = vld [vmem:[%s11793_s1 + $0x2d0] ss:$40 sps:$4 sm:$0xff]  }
  0x20   : > { %4260 = vmatprep.mubr.bf16.mxu1 %v9167_v52  ;;  %v8074_v63 = vld [vmem:[%s11793_s1 + $0x7d0] ss:$40 sps:$4 sm:$0xff]   ;;  %v8075_v0 = vld [vmem:[%s11793_s1 + $0x284] ss:$40 sps:$4 sm:$0xff]   ;;  %v8079_v2 = vld [vmem:[%s11793_s1 + $0x280] ss:$40 sps:$4 sm:$0xff]  }
  0x21   : > { %4198 = vmatpush1.bf16.msra.mxu0 %v8019_v22  ;;  %v8077_v1 = vld [vmem:[%s11793_s1 + $0x784] ss:$40 sps:$4 sm:$0xff]   ;;  %v8080_v3 = vld [vmem:[%s11793_s1 + $0x780] ss:$40 sps:$4 sm:$0xff]   ;;  %v279_v5 = vld [vmem:[%s9146_s10 + $0x10] sm:$0xff] }
  0x22   : > { %4239 = vmatpush1.bf16.msra.mxu1 %v8020_v23  ;;  %4199 = vmatprep.subr.bf16.mxu0 %v8021_v24  ;;  %v277_v4 = vld [vmem:[%s9146_s10] sm:$0xff]  ;;  %v8083_v6 = vld [vmem:[%s11793_s1 + $0xc34] ss:$40 sps:$4 sm:$0xff]   ;;  %v9226_v9 = vpack.c.bf16 %v279_v5, %v279_v5  ;;  %v8081_v10 = vld [vmem:[%s11793_s1 + $0xc30] ss:$40 sps:$4 sm:$0xff]  }
  0x23   : > { %4240 = vmatprep.subr.bf16.mxu1 %v8023_v25  ;;  %v8086_v7 = vld [vmem:[%s11793_s1 + $0x1134] ss:$40 sps:$4 sm:$0xff]   ;;  %v9224_v8 = vpack.c.bf16 %v277_v4, %v277_v4  ;;  %v8084_v11 = vld [vmem:[%s11793_s1 + $0x1130] ss:$40 sps:$4 sm:$0xff]   ;;  %v8089_v12 = vld [vmem:[%s11793_s1 + $0xbe4] ss:$40 sps:$4 sm:$0xff]  }
  0x24   : > { %v8092_v13 = vld [vmem:[%s11793_s1 + $0x10e4] ss:$40 sps:$4 sm:$0xff]   ;;  %v8087_v14 = vld [vmem:[%s11793_s1 + $0xbe0] ss:$40 sps:$4 sm:$0xff]   ;;  %v8095_v16 = vld [vmem:[%s11793_s1 + $0xb94] ss:$40 sps:$4 sm:$0xff]  }
  0x25   : > { %4200 = vmatpush1.bf16.msra.mxu0 %v8025_v26  ;;  %v8090_v15 = vld [vmem:[%s11793_s1 + $0x10e0] ss:$40 sps:$4 sm:$0xff]   ;;  %v8098_v17 = vld [vmem:[%s11793_s1 + $0x1094] ss:$40 sps:$4 sm:$0xff]   ;;  %v8093_v18 = vld [vmem:[%s11793_s1 + $0xb90] ss:$40 sps:$4 sm:$0xff]  }
  0x26   : > { %4241 = vmatpush1.bf16.msra.mxu1 %v8026_v27  ;;  %4201 = vmatprep.subr.bf16.mxu0 %v8027_v28  ;;  %v8096_v19 = vld [vmem:[%s11793_s1 + $0x1090] ss:$40 sps:$4 sm:$0xff]   ;;  %v8101_v20 = vld [vmem:[%s11793_s1 + $0xb44] ss:$40 sps:$4 sm:$0xff]   ;;  %v8099_v22 = vld [vmem:[%s11793_s1 + $0xb40] ss:$40 sps:$4 sm:$0xff]  }
  0x27   : > { %4242 = vmatprep.subr.bf16.mxu1 %v8029_v29  ;;  %v8104_v21 = vld [vmem:[%s11793_s1 + $0x1044] ss:$40 sps:$4 sm:$0xff]   ;;  %v8102_v23 = vld [vmem:[%s11793_s1 + $0x1040] ss:$40 sps:$4 sm:$0xff]   ;;  %v8107_v24 = vld [vmem:[%s11793_s1 + $0xaf4] ss:$40 sps:$4 sm:$0xff]  }
  0x28   : > { %v8110_v25 = vld [vmem:[%s11793_s1 + $0xff4] ss:$40 sps:$4 sm:$0xff]   ;;  %v8105_v26 = vld [vmem:[%s11793_s1 + $0xaf0] ss:$40 sps:$4 sm:$0xff]   ;;  %v8113_v28 = vld [vmem:[%s11793_s1 + $0xaa4] ss:$40 sps:$4 sm:$0xff]  }
  0x29   : > { %4202 = vmatpush1.bf16.msra.mxu0 %v8031_v30  ;;  %v8108_v27 = vld [vmem:[%s11793_s1 + $0xff0] ss:$40 sps:$4 sm:$0xff]   ;;  %v8116_v29 = vld [vmem:[%s11793_s1 + $0xfa4] ss:$40 sps:$4 sm:$0xff]   ;;  %v8111_v30 = vld [vmem:[%s11793_s1 + $0xaa0] ss:$40 sps:$4 sm:$0xff]  }
  0x2a   : > { %4243 = vmatpush1.bf16.msra.mxu1 %v8032_v31  ;;  %4203 = vmatprep.subr.bf16.mxu0 %v8033_v32  ;;  %v8114_v31 = vld [vmem:[%s11793_s1 + $0xfa0] ss:$40 sps:$4 sm:$0xff]   ;;  %v8119_v32 = vld [vmem:[%s11793_s1 + $0xa54] ss:$40 sps:$4 sm:$0xff]   ;;  %v8129_v46 = vld [vmem:[%s11793_s1 + $0xeb0] ss:$40 sps:$4 sm:$0xff]  }
  0x2b   : > { %4244 = vmatprep.subr.bf16.mxu1 %v8035_v33  ;;  %v8122_v33 = vld [vmem:[%s11793_s1 + $0xf54] ss:$40 sps:$4 sm:$0xff]   ;;  %v8140_v50 = vld [vmem:[%s11793_s1 + $0x1364] ss:$40 sps:$4 sm:$0xff]   ;;  %v8159_v4 = vld [vmem:[%s11793_s1 + $0xd20] ss:$40 sps:$4 sm:$0xff]  }
  0x2c   : > { %v8162_v5 = vld [vmem:[%s11793_s1 + $0x1220] ss:$40 sps:$4 sm:$0xff]  }
  0x2d   : > { %4204 = vmatpush2.bf16.msra.mxu0 %v8037_v34  ;;  %v282_v34 = vld [vmem:[%s9146_s10 + $0x28] sm:$0xff] }
  0x2e   : > { %4245 = vmatpush2.bf16.msra.mxu1 %v8038_v35  ;;  %4205 = vmatprep.subr.bf16.mxu0 %v8039_v36  ;;  %v8117_v35 = vld [vmem:[%s11793_s1 + $0xa50] ss:$40 sps:$4 sm:$0xff]  }
  0x2f   : > { %4246 = vmatprep.subr.bf16.mxu1 %v8041_v37  ;;  %v8120_v36 = vld [vmem:[%s11793_s1 + $0xf50] ss:$40 sps:$4 sm:$0xff]   ;;  %v9309_v37 = vpack.c.bf16 %v282_v34, %v282_v34 }
  0x30   : > { %v8195_v34 = vld [vmem:[%s11793_s1 + $0x148] ss:$40 sps:$4 sm:$0xff]  }
  0x31   : > { %4206 = vmatpush2.bf16.msra.mxu0 %v8043_v38  ;;  %v284_v38 = vld [vmem:[%s9146_s10 + $0x38] sm:$0xff] }
  0x32   : > { %4247 = vmatpush2.bf16.msra.mxu1 %v8044_v39  ;;  %4207 = vmatprep.subr.bf16.mxu0 %v8045_v40  ;;  %v8125_v39 = vld [vmem:[%s11793_s1 + $0xa04] ss:$40 sps:$4 sm:$0xff]   ;;  %v9315_v40 = vpack.c.bf16 %v284_v38, %v284_v38 }
  0x33   : > { %4248 = vmatprep.subr.bf16.mxu1 %v8047_v41  ;;  %v8128_v41 = vld [vmem:[%s11793_s1 + $0xf04] ss:$40 sps:$4 sm:$0xff]  }
  0x34   : > { %v8206_v38 = vld [vmem:[%s11793_s1 + $0x5fc] ss:$40 sps:$4 sm:$0xff]  }
  0x35   : > { %4208 = vmatpush2.bf16.msra.mxu0 %v8049_v42  ;;  %v8123_v42 = vld [vmem:[%s11793_s1 + $0xa00] ss:$40 sps:$4 sm:$0xff]  }
  0x36   : > { %4249 = vmatpush2.bf16.msra.mxu1 %v8050_v43  ;;  %4209 = vmatprep.subr.bf16.mxu0 %v8051_v44  ;;  %v8126_v43 = vld [vmem:[%s11793_s1 + $0xf00] ss:$40 sps:$4 sm:$0xff]   ;;  %v8131_v44 = vld [vmem:[%s11793_s1 + $0xeb4] ss:$40 sps:$4 sm:$0xff]  }
  0x37   : > { %4250 = vmatprep.subr.bf16.mxu1 %v8053_v45  ;;  %v8134_v45 = vld [vmem:[%s11793_s1 + $0x13b4] ss:$40 sps:$4 sm:$0xff]  }
  0x39   : > { %4210 = vmatpush2.bf16.msra.mxu0 %v8055_v47  ;;  %v8132_v47 = vld [vmem:[%s11793_s1 + $0x13b0] ss:$40 sps:$4 sm:$0xff]  }
  0x3a   : > { %4251 = vmatpush2.bf16.msra.mxu1 %v8056_v48  ;;  %4211 = vmatprep.subr.bf16.mxu0 %v8057_v51  ;;  %v8137_v48 = vld [vmem:[%s11793_s1 + $0xe64] ss:$40 sps:$4 sm:$0xff]   ;;  %v8135_v51 = vld [vmem:[%s11793_s1 + $0xe60] ss:$40 sps:$4 sm:$0xff]  }
  0x3b   : > { %4252 = vmatprep.subr.bf16.mxu1 %v8059_v53  ;;  %v8138_v53 = vld [vmem:[%s11793_s1 + $0x1360] ss:$40 sps:$4 sm:$0xff]  }
  0x3d   : > { %4212 = vmatpush2.bf16.msra.mxu0 %v8061_v54  ;;  %v8143_v54 = vld [vmem:[%s11793_s1 + $0xe14] ss:$40 sps:$4 sm:$0xff]  }
  0x3e   : > { %4253 = vmatpush2.bf16.msra.mxu1 %v8062_v55  ;;  %4213 = vmatprep.subr.bf16.mxu0 %v8063_v56  ;;  %v8146_v55 = vld [vmem:[%s11793_s1 + $0x1314] ss:$40 sps:$4 sm:$0xff]   ;;  %v8141_v56 = vld [vmem:[%s11793_s1 + $0xe10] ss:$40 sps:$4 sm:$0xff]  }
  0x3f   : > { %4254 = vmatprep.subr.bf16.mxu1 %v8065_v57  ;;  %v8144_v57 = vld [vmem:[%s11793_s1 + $0x1310] ss:$40 sps:$4 sm:$0xff]  }
  0x41   : > { %4214 = vmatpush2.bf16.msra.mxu0 %v8067_v58  ;;  %v8149_v58 = vld [vmem:[%s11793_s1 + $0xdc4] ss:$40 sps:$4 sm:$0xff]  }
  0x42   : > { %4255 = vmatpush2.bf16.msra.mxu1 %v8068_v59  ;;  %4215 = vmatprep.subr.bf16.mxu0 %v8069_v60  ;;  %v8152_v59 = vld [vmem:[%s11793_s1 + $0x12c4] ss:$40 sps:$4 sm:$0xff]   ;;  %v8147_v60 = vld [vmem:[%s11793_s1 + $0xdc0] ss:$40 sps:$4 sm:$0xff]  }
  0x43   : > { %4256 = vmatprep.subr.bf16.mxu1 %v8071_v61  ;;  %v8150_v61 = vld [vmem:[%s11793_s1 + $0x12c0] ss:$40 sps:$4 sm:$0xff]  }
  0x45   : > { %4216 = vmatpush2.bf16.msra.mxu0 %v8073_v62  ;;  %v8155_v62 = vld [vmem:[%s11793_s1 + $0xd74] ss:$40 sps:$4 sm:$0xff]  }
  0x46   : > { %4257 = vmatpush2.bf16.msra.mxu1 %v8074_v63  ;;  %4217 = vmatprep.subr.bf16.mxu0 %v8075_v0  ;;  %v8158_v63 = vld [vmem:[%s11793_s1 + $0x1274] ss:$40 sps:$4 sm:$0xff]   ;;  %v8153_v0 = vld [vmem:[%s11793_s1 + $0xd70] ss:$40 sps:$4 sm:$0xff]  }
  0x47   : > { %4258 = vmatprep.subr.bf16.mxu1 %v8077_v1  ;;  %v8156_v1 = vld [vmem:[%s11793_s1 + $0x1270] ss:$40 sps:$4 sm:$0xff]  }
  0x49   : > { %4218 = vmatpush2.bf16.msra.mxu0 %v8079_v2  ;;  %v8161_v2 = vld [vmem:[%s11793_s1 + $0xd24] ss:$40 sps:$4 sm:$0xff]  }
  0x4a   : > { %4259 = vmatpush2.bf16.msra.mxu1 %v8080_v3  ;;  %4269 = vmatprep.subr.bf16.mxu0 %v8083_v6  ;;  %v8164_v3 = vld [vmem:[%s11793_s1 + $0x1224] ss:$40 sps:$4 sm:$0xff]   ;;  %v8167_v6 = vld [vmem:[%s11793_s1 + $0xcd4] ss:$40 sps:$4 sm:$0xff]  }
  0x4b   : > { %4310 = vmatprep.subr.bf16.mxu1 %v8086_v7  ;;  %v8170_v7 = vld [vmem:[%s11793_s1 + $0x11d4] ss:$40 sps:$4 sm:$0xff]  }
  0x4c   : > { %4220 = vmatmul.mubr.bf16.vlgmr.msra.gmra.mxu0 %v9224_v8 }
  0x4d   : > { %4261 = vmatmul.mubr.bf16.vlgmr.msra.gmra.mxu1 %v9226_v9  ;;  %4270 = vmatpush1.bf16.msra.mxu0 %v8081_v10  ;;  %v8165_v10 = vld [vmem:[%s11793_s1 + $0xcd0] ss:$40 sps:$4 sm:$0xff]  }
  0x4e   : > { %4311 = vmatpush1.bf16.msra.mxu1 %v8084_v11  ;;  %4271 = vmatprep.subr.bf16.mxu0 %v8089_v12  ;;  %v8168_v11 = vld [vmem:[%s11793_s1 + $0x11d0] ss:$40 sps:$4 sm:$0xff]   ;;  %v8173_v12 = vld [vmem:[%s11793_s1 + $0xc84] ss:$40 sps:$4 sm:$0xff]  }
  0x4f   : > { %4312 = vmatprep.subr.bf16.mxu1 %v8092_v13  ;;  %4301 = vmatprep.mubr.bf16.mxu0 %v9309_v37  ;;  %v8176_v13 = vld [vmem:[%s11793_s1 + $0x1184] ss:$40 sps:$4 sm:$0xff]  }
  0x50   : > { %4342 = vmatprep.mubr.bf16.mxu1 %v9315_v40 }
  0x51   : > { %4272 = vmatpush1.bf16.msra.mxu0 %v8087_v14  ;;  %v8171_v14 = vld [vmem:[%s11793_s1 + $0xc80] ss:$40 sps:$4 sm:$0xff]  }
  0x52   : > { %4313 = vmatpush1.bf16.msra.mxu1 %v8090_v15  ;;  %4273 = vmatprep.subr.bf16.mxu0 %v8095_v16  ;;  %v8174_v15 = vld [vmem:[%s11793_s1 + $0x1180] ss:$40 sps:$4 sm:$0xff]  }
  0x53   : > { %4314 = vmatprep.subr.bf16.mxu1 %v8098_v17  ;;  %v281_v16 = vld [vmem:[%s9146_s10 + $0x20] sm:$0xff]  ;;  %v283_v17 = vld [vmem:[%s9146_s10 + $0x30] sm:$0xff] }
  0x55   : > { %4274 = vmatpush1.bf16.msra.mxu0 %v8093_v18  ;;  %v8179_v18 = vld [vmem:[%s11793_s1 + $0x23c] ss:$40 sps:$4 sm:$0xff]  }
  0x56   : > { %4315 = vmatpush1.bf16.msra.mxu1 %v8096_v19  ;;  %4275 = vmatprep.subr.bf16.mxu0 %v8101_v20  ;;  %v8182_v19 = vld [vmem:[%s11793_s1 + $0x73c] ss:$40 sps:$4 sm:$0xff]   ;;  %v9432_v20 = vpack.c.bf16 %v281_v16, %v281_v16  ;;  %v8255_v16 = vld [vmem:[%s11793_s1 + $0x328] ss:$40 sps:$4 sm:$0xff]  }
  0x57   : > { %4316 = vmatprep.subr.bf16.mxu1 %v8104_v21  ;;  %v9434_v21 = vpack.c.bf16 %v283_v17, %v283_v17  ;;  %v8258_v17 = vld [vmem:[%s11793_s1 + $0x828] ss:$40 sps:$4 sm:$0xff]  }
  0x59   : > { %4276 = vmatpush1.bf16.msra.mxu0 %v8099_v22  ;;  %v8177_v22 = vld [vmem:[%s11793_s1 + $0x238] ss:$40 sps:$4 sm:$0xff]  }
  0x5a   : > { %4317 = vmatpush1.bf16.msra.mxu1 %v8102_v23  ;;  %4277 = vmatprep.subr.bf16.mxu0 %v8107_v24  ;;  %v8180_v23 = vld [vmem:[%s11793_s1 + $0x738] ss:$40 sps:$4 sm:$0xff]   ;;  %v8185_v24 = vld [vmem:[%s11793_s1 + $0x1ec] ss:$40 sps:$4 sm:$0xff]  }
  0x5b   : > { %4318 = vmatprep.subr.bf16.mxu1 %v8110_v25  ;;  %v8188_v25 = vld [vmem:[%s11793_s1 + $0x6ec] ss:$40 sps:$4 sm:$0xff]  }
  0x5d   : > { %4278 = vmatpush1.bf16.msra.mxu0 %v8105_v26  ;;  %v8183_v26 = vld [vmem:[%s11793_s1 + $0x1e8] ss:$40 sps:$4 sm:$0xff]  }
  0x5e   : > { %4319 = vmatpush1.bf16.msra.mxu1 %v8108_v27  ;;  %4279 = vmatprep.subr.bf16.mxu0 %v8113_v28  ;;  %v8186_v27 = vld [vmem:[%s11793_s1 + $0x6e8] ss:$40 sps:$4 sm:$0xff]   ;;  %v8191_v28 = vld [vmem:[%s11793_s1 + $0x19c] ss:$40 sps:$4 sm:$0xff]  }
  0x5f   : > { %4320 = vmatprep.subr.bf16.mxu1 %v8116_v29  ;;  %v8194_v29 = vld [vmem:[%s11793_s1 + $0x69c] ss:$40 sps:$4 sm:$0xff]  }
  0x61   : > { %4280 = vmatpush1.bf16.msra.mxu0 %v8111_v30  ;;  %v8189_v30 = vld [vmem:[%s11793_s1 + $0x198] ss:$40 sps:$4 sm:$0xff]  }
  0x62   : > { %4321 = vmatpush1.bf16.msra.mxu1 %v8114_v31  ;;  %4281 = vmatprep.subr.bf16.mxu0 %v8119_v32  ;;  %v8192_v31 = vld [vmem:[%s11793_s1 + $0x698] ss:$40 sps:$4 sm:$0xff]   ;;  %v8197_v32 = vld [vmem:[%s11793_s1 + $0x14c] ss:$40 sps:$4 sm:$0xff]  }
  0x63   : > { %4322 = vmatprep.subr.bf16.mxu1 %v8122_v33  ;;  %v8200_v33 = vld [vmem:[%s11793_s1 + $0x64c] ss:$40 sps:$4 sm:$0xff]  }
  0x65   : > { %4282 = vmatpush1.bf16.msra.mxu0 %v8117_v35  ;;  %v8198_v35 = vld [vmem:[%s11793_s1 + $0x648] ss:$40 sps:$4 sm:$0xff]  }
  0x66   : > { %4323 = vmatpush1.bf16.msra.mxu1 %v8120_v36  ;;  %4283 = vmatprep.subr.bf16.mxu0 %v8125_v39  ;;  %v8203_v36 = vld [vmem:[%s11793_s1 + $0xfc] ss:$40 sps:$4 sm:$0xff]   ;;  %v8201_v39 = vld [vmem:[%s11793_s1 + $0xf8] ss:$40 sps:$4 sm:$0xff]  }
  0x67   : > { %4324 = vmatprep.subr.bf16.mxu1 %v8128_v41  ;;  %v8204_v41 = vld [vmem:[%s11793_s1 + $0x5f8] ss:$40 sps:$4 sm:$0xff]  }
  0x69   : > { %4284 = vmatpush1.bf16.msra.mxu0 %v8123_v42  ;;  %v8209_v42 = vld [vmem:[%s11793_s1 + $0xac] ss:$40 sps:$4 sm:$0xff]  }
  0x6a   : > { %4325 = vmatpush1.bf16.msra.mxu1 %v8126_v43  ;;  %4285 = vmatprep.subr.bf16.mxu0 %v8131_v44  ;;  %v8212_v43 = vld [vmem:[%s11793_s1 + $0x5ac] ss:$40 sps:$4 sm:$0xff]   ;;  %v8207_v44 = vld [vmem:[%s11793_s1 + $0xa8] ss:$40 sps:$4 sm:$0xff]  }
  0x6b   : > { %4326 = vmatprep.subr.bf16.mxu1 %v8134_v45  ;;  %v8210_v45 = vld [vmem:[%s11793_s1 + $0x5a8] ss:$40 sps:$4 sm:$0xff]  }
  0x6d   : > { %4286 = vmatpush2.bf16.msra.mxu0 %v8129_v46  ;;  %v8215_v46 = vld [vmem:[%s11793_s1 + $0x5c] ss:$40 sps:$4 sm:$0xff]  }
  0x6e   : > { %4327 = vmatpush2.bf16.msra.mxu1 %v8132_v47  ;;  %4287 = vmatprep.subr.bf16.mxu0 %v8137_v48  ;;  %v8218_v47 = vld [vmem:[%s11793_s1 + $0x55c] ss:$40 sps:$4 sm:$0xff]   ;;  %v8213_v48 = vld [vmem:[%s11793_s1 + $0x58] ss:$40 sps:$4 sm:$0xff]  }
  0x6f   : > { %4328 = vmatprep.subr.bf16.mxu1 %v8140_v50  ;;  %v8216_v50 = vld [vmem:[%s11793_s1 + $0x558] ss:$40 sps:$4 sm:$0xff]  }
  0x71   : > { %4288 = vmatpush2.bf16.msra.mxu0 %v8135_v51  ;;  %v8221_v51 = vld [vmem:[%s11793_s1 + $0xc] ss:$40 sps:$4 sm:$0xff]  }
  0x72   : > { %4329 = vmatpush2.bf16.msra.mxu1 %v8138_v53  ;;  %4289 = vmatprep.subr.bf16.mxu0 %v8143_v54  ;;  %v8224_v53 = vld [vmem:[%s11793_s1 + $0x50c] ss:$40 sps:$4 sm:$0xff]   ;;  %v8219_v54 = vld [vmem:[%s11793_s1 + $0x8] ss:$40 sps:$4 sm:$0xff]  }
  0x73   : > { %4330 = vmatprep.subr.bf16.mxu1 %v8146_v55  ;;  %v8222_v55 = vld [vmem:[%s11793_s1 + $0x508] ss:$40 sps:$4 sm:$0xff]  }
  0x75   : > { %4290 = vmatpush2.bf16.msra.mxu0 %v8141_v56  ;;  %v8227_v56 = vld [vmem:[%s11793_s1 + $0x4bc] ss:$40 sps:$4 sm:$0xff]  }
  0x76   : > { %4331 = vmatpush2.bf16.msra.mxu1 %v8144_v57  ;;  %4291 = vmatprep.subr.bf16.mxu0 %v8149_v58  ;;  %v8230_v57 = vld [vmem:[%s11793_s1 + $0x9bc] ss:$40 sps:$4 sm:$0xff]   ;;  %v8225_v58 = vld [vmem:[%s11793_s1 + $0x4b8] ss:$40 sps:$4 sm:$0xff]  }
  0x77   : > { %4332 = vmatprep.subr.bf16.mxu1 %v8152_v59  ;;  %v8228_v59 = vld [vmem:[%s11793_s1 + $0x9b8] ss:$40 sps:$4 sm:$0xff]  }
  0x79   : > { %4292 = vmatpush2.bf16.msra.mxu0 %v8147_v60  ;;  %v8233_v60 = vld [vmem:[%s11793_s1 + $0x46c] ss:$40 sps:$4 sm:$0xff]  }
  0x7a   : > { %4333 = vmatpush2.bf16.msra.mxu1 %v8150_v61  ;;  %4293 = vmatprep.subr.bf16.mxu0 %v8155_v62  ;;  %v8236_v61 = vld [vmem:[%s11793_s1 + $0x96c] ss:$40 sps:$4 sm:$0xff]   ;;  %v8231_v62 = vld [vmem:[%s11793_s1 + $0x468] ss:$40 sps:$4 sm:$0xff]  }
  0x7b   : > { %4334 = vmatprep.subr.bf16.mxu1 %v8158_v63  ;;  %v8234_v63 = vld [vmem:[%s11793_s1 + $0x968] ss:$40 sps:$4 sm:$0xff]  }
  0x7d   : > { %4294 = vmatpush2.bf16.msra.mxu0 %v8153_v0  ;;  %v8239_v0 = vld [vmem:[%s11793_s1 + $0x41c] ss:$40 sps:$4 sm:$0xff]  }
  0x7e   : > { %4335 = vmatpush2.bf16.msra.mxu1 %v8156_v1  ;;  %4295 = vmatprep.subr.bf16.mxu0 %v8161_v2  ;;  %v8242_v1 = vld [vmem:[%s11793_s1 + $0x91c] ss:$40 sps:$4 sm:$0xff]   ;;  %v8237_v2 = vld [vmem:[%s11793_s1 + $0x418] ss:$40 sps:$4 sm:$0xff]  }
  0x7f   : > { %4336 = vmatprep.subr.bf16.mxu1 %v8164_v3  ;;  %v8240_v3 = vld [vmem:[%s11793_s1 + $0x918] ss:$40 sps:$4 sm:$0xff]  }
  0x81   : > { %4296 = vmatpush2.bf16.msra.mxu0 %v8159_v4  ;;  %v8245_v4 = vld [vmem:[%s11793_s1 + $0x3cc] ss:$40 sps:$4 sm:$0xff]  }
  0x82   : > { %4337 = vmatpush2.bf16.msra.mxu1 %v8162_v5  ;;  %4297 = vmatprep.subr.bf16.mxu0 %v8167_v6  ;;  %v8248_v5 = vld [vmem:[%s11793_s1 + $0x8cc] ss:$40 sps:$4 sm:$0xff]   ;;  %v8243_v6 = vld [vmem:[%s11793_s1 + $0x3c8] ss:$40 sps:$4 sm:$0xff]  }
  0x83   : > { %4338 = vmatprep.subr.bf16.mxu1 %v8170_v7  ;;  %v8246_v7 = vld [vmem:[%s11793_s1 + $0x8c8] ss:$40 sps:$4 sm:$0xff]  }
  0x85   : > { %4298 = vmatpush2.bf16.msra.mxu0 %v8165_v10  ;;  %v8251_v10 = vld [vmem:[%s11793_s1 + $0x37c] ss:$40 sps:$4 sm:$0xff]  }
  0x86   : > { %4339 = vmatpush2.bf16.msra.mxu1 %v8168_v11  ;;  %4299 = vmatprep.subr.bf16.mxu0 %v8173_v12  ;;  %v8254_v11 = vld [vmem:[%s11793_s1 + $0x87c] ss:$40 sps:$4 sm:$0xff]   ;;  %v8249_v12 = vld [vmem:[%s11793_s1 + $0x378] ss:$40 sps:$4 sm:$0xff]  }
  0x87   : > { %4340 = vmatprep.subr.bf16.mxu1 %v8176_v13  ;;  %v8252_v13 = vld [vmem:[%s11793_s1 + $0x878] ss:$40 sps:$4 sm:$0xff]  }
  0x89   : > { %4300 = vmatpush2.bf16.msra.mxu0 %v8171_v14  ;;  %v8257_v14 = vld [vmem:[%s11793_s1 + $0x32c] ss:$40 sps:$4 sm:$0xff]  }
  0x8a   : > { %4341 = vmatpush2.bf16.msra.mxu1 %v8174_v15  ;;  %4351 = vmatprep.subr.bf16.mxu0 %v8179_v18  ;;  %v8260_v15 = vld [vmem:[%s11793_s1 + $0x82c] ss:$40 sps:$4 sm:$0xff]   ;;  %v8263_v18 = vld [vmem:[%s11793_s1 + $0x2dc] ss:$40 sps:$4 sm:$0xff]  }
  0x8b   : > { %4392 = vmatprep.subr.bf16.mxu1 %v8182_v19  ;;  %v8266_v19 = vld [vmem:[%s11793_s1 + $0x7dc] ss:$40 sps:$4 sm:$0xff]  }
  0x8c   : > { %4302 = vmatmul.mubr.bf16.vlgmr.msra.gmra.mxu0 %v9432_v20 }
  0x8d   : > { %4343 = vmatmul.mubr.bf16.vlgmr.msra.gmra.mxu1 %v9434_v21  ;;  %4352 = vmatpush1.bf16.msra.mxu0 %v8177_v22  ;;  %v8261_v22 = vld [vmem:[%s11793_s1 + $0x2d8] ss:$40 sps:$4 sm:$0xff]  }
  0x8e   : > { %4393 = vmatpush1.bf16.msra.mxu1 %v8180_v23  ;;  %4353 = vmatprep.subr.bf16.mxu0 %v8185_v24  ;;  %v8264_v23 = vld [vmem:[%s11793_s1 + $0x7d8] ss:$40 sps:$4 sm:$0xff]   ;;  %v8269_v24 = vld [vmem:[%s11793_s1 + $0x28c] ss:$40 sps:$4 sm:$0xff]  }
  0x8f   : > { %4394 = vmatprep.subr.bf16.mxu1 %v8188_v25  ;;  %4383 = vmatprep.mubr.bf16.mxu0 %v9161_v49  ;;  %v8272_v25 = vld [vmem:[%s11793_s1 + $0x78c] ss:$40 sps:$4 sm:$0xff]  }
  0x90   : > { %4424 = vmatprep.mubr.bf16.mxu1 %v9167_v52 }
  0x91   : > { %4354 = vmatpush1.bf16.msra.mxu0 %v8183_v26  ;;  %v8267_v26 = vld [vmem:[%s11793_s1 + $0x288] ss:$40 sps:$4 sm:$0xff]  }
  0x92   : > { %4395 = vmatpush1.bf16.msra.mxu1 %v8186_v27  ;;  %4355 = vmatprep.subr.bf16.mxu0 %v8191_v28  ;;  %v8270_v27 = vld [vmem:[%s11793_s1 + $0x788] ss:$40 sps:$4 sm:$0xff]   ;;  %v8275_v28 = vld [vmem:[%s11793_s1 + $0xc3c] ss:$40 sps:$4 sm:$0xff]  }
  0x93   : > { %4396 = vmatprep.subr.bf16.mxu1 %v8194_v29  ;;  %v8278_v29 = vld [vmem:[%s11793_s1 + $0x113c] ss:$40 sps:$4 sm:$0xff]  }
  0x95   : > { %4356 = vmatpush1.bf16.msra.mxu0 %v8189_v30  ;;  %v8273_v30 = vld [vmem:[%s11793_s1 + $0xc38] ss:$40 sps:$4 sm:$0xff]  }
  0x96   : > { %4397 = vmatpush1.bf16.msra.mxu1 %v8192_v31  ;;  %4357 = vmatprep.subr.bf16.mxu0 %v8197_v32  ;;  %v8276_v31 = vld [vmem:[%s11793_s1 + $0x1138] ss:$40 sps:$4 sm:$0xff]   ;;  %v8281_v32 = vld [vmem:[%s11793_s1 + $0xbec] ss:$40 sps:$4 sm:$0xff]  }
  0x97   : > { %4398 = vmatprep.subr.bf16.mxu1 %v8200_v33  ;;  %v8284_v33 = vld [vmem:[%s11793_s1 + $0x10ec] ss:$40 sps:$4 sm:$0xff]  }
  0x99   : > { %4358 = vmatpush1.bf16.msra.mxu0 %v8195_v34  ;;  %v8279_v34 = vld [vmem:[%s11793_s1 + $0xbe8] ss:$40 sps:$4 sm:$0xff]  }
  0x9a   : > { %4399 = vmatpush1.bf16.msra.mxu1 %v8198_v35  ;;  %4359 = vmatprep.subr.bf16.mxu0 %v8203_v36  ;;  %v8282_v35 = vld [vmem:[%s11793_s1 + $0x10e8] ss:$40 sps:$4 sm:$0xff]   ;;  %v8287_v36 = vld [vmem:[%s11793_s1 + $0xb9c] ss:$40 sps:$4 sm:$0xff]  }
  0x9b   : > { %4400 = vmatprep.subr.bf16.mxu1 %v8206_v38  ;;  %v8290_v38 = vld [vmem:[%s11793_s1 + $0x109c] ss:$40 sps:$4 sm:$0xff]  }
  0x9d   : > { %4360 = vmatpush1.bf16.msra.mxu0 %v8201_v39  ;;  %v8285_v39 = vld [vmem:[%s11793_s1 + $0xb98] ss:$40 sps:$4 sm:$0xff]  }
  0x9e   : > { %4401 = vmatpush1.bf16.msra.mxu1 %v8204_v41  ;;  %4361 = vmatprep.subr.bf16.mxu0 %v8209_v42  ;;  %v8288_v41 = vld [vmem:[%s11793_s1 + $0x1098] ss:$40 sps:$4 sm:$0xff]   ;;  %v8293_v42 = vld [vmem:[%s11793_s1 + $0xb4c] ss:$40 sps:$4 sm:$0xff]  }
  0x9f   : > { %4402 = vmatprep.subr.bf16.mxu1 %v8212_v43  ;;  %v8296_v43 = vld [vmem:[%s11793_s1 + $0x104c] ss:$40 sps:$4 sm:$0xff]  }
  0xa1   : > { %4362 = vmatpush1.bf16.msra.mxu0 %v8207_v44  ;;  %v8291_v44 = vld [vmem:[%s11793_s1 + $0xb48] ss:$40 sps:$4 sm:$0xff]  }
  0xa2   : > { %4403 = vmatpush1.bf16.msra.mxu1 %v8210_v45  ;;  %4363 = vmatprep.subr.bf16.mxu0 %v8215_v46  ;;  %v8294_v45 = vld [vmem:[%s11793_s1 + $0x1048] ss:$40 sps:$4 sm:$0xff]   ;;  %v8299_v46 = vld [vmem:[%s11793_s1 + $0xafc] ss:$40 sps:$4 sm:$0xff]  }
  0xa3   : > { %4404 = vmatprep.subr.bf16.mxu1 %v8218_v47  ;;  %v8302_v47 = vld [vmem:[%s11793_s1 + $0xffc] ss:$40 sps:$4 sm:$0xff]  }
  0xa5   : > { %4364 = vmatpush1.bf16.msra.mxu0 %v8213_v48  ;;  %v8297_v48 = vld [vmem:[%s11793_s1 + $0xaf8] ss:$40 sps:$4 sm:$0xff]  }
  0xa6   : > { %4405 = vmatpush1.bf16.msra.mxu1 %v8216_v50  ;;  %4365 = vmatprep.subr.bf16.mxu0 %v8221_v51  ;;  %v8300_v50 = vld [vmem:[%s11793_s1 + $0xff8] ss:$40 sps:$4 sm:$0xff]   ;;  %v8305_v51 = vld [vmem:[%s11793_s1 + $0xaac] ss:$40 sps:$4 sm:$0xff]  }
  0xa7   : > { %4406 = vmatprep.subr.bf16.mxu1 %v8224_v53  ;;  %v8308_v53 = vld [vmem:[%s11793_s1 + $0xfac] ss:$40 sps:$4 sm:$0xff]  }
  0xa9   : > { %4366 = vmatpush1.bf16.msra.mxu0 %v8219_v54  ;;  %v8303_v54 = vld [vmem:[%s11793_s1 + $0xaa8] ss:$40 sps:$4 sm:$0xff]  }
  0xaa   : > { %4407 = vmatpush1.bf16.msra.mxu1 %v8222_v55  ;;  %4367 = vmatprep.subr.bf16.mxu0 %v8227_v56  ;;  %v8306_v55 = vld [vmem:[%s11793_s1 + $0xfa8] ss:$40 sps:$4 sm:$0xff]   ;;  %v8311_v56 = vld [vmem:[%s11793_s1 + $0xa5c] ss:$40 sps:$4 sm:$0xff]  }
  0xab   : > { %4408 = vmatprep.subr.bf16.mxu1 %v8230_v57  ;;  %v8314_v57 = vld [vmem:[%s11793_s1 + $0xf5c] ss:$40 sps:$4 sm:$0xff]  }
  0xad   : > { %4368 = vmatpush2.bf16.msra.mxu0 %v8225_v58  ;;  %v8309_v58 = vld [vmem:[%s11793_s1 + $0xa58] ss:$40 sps:$4 sm:$0xff]  }
  0xae   : > { %4409 = vmatpush2.bf16.msra.mxu1 %v8228_v59  ;;  %4369 = vmatprep.subr.bf16.mxu0 %v8233_v60  ;;  %v8312_v59 = vld [vmem:[%s11793_s1 + $0xf58] ss:$40 sps:$4 sm:$0xff]   ;;  %v8317_v60 = vld [vmem:[%s11793_s1 + $0xa0c] ss:$40 sps:$4 sm:$0xff]  }
  0xaf   : > { %4410 = vmatprep.subr.bf16.mxu1 %v8236_v61  ;;  %v8320_v61 = vld [vmem:[%s11793_s1 + $0xf0c] ss:$40 sps:$4 sm:$0xff]  }
  0xb1   : > { %4370 = vmatpush2.bf16.msra.mxu0 %v8231_v62  ;;  %v8315_v62 = vld [vmem:[%s11793_s1 + $0xa08] ss:$40 sps:$4 sm:$0xff]  }
  0xb2   : > { %4411 = vmatpush2.bf16.msra.mxu1 %v8234_v63  ;;  %4371 = vmatprep.subr.bf16.mxu0 %v8239_v0  ;;  %v8318_v63 = vld [vmem:[%s11793_s1 + $0xf08] ss:$40 sps:$4 sm:$0xff]   ;;  %v8323_v0 = vld [vmem:[%s11793_s1 + $0xebc] ss:$40 sps:$4 sm:$0xff]  }
  0xb3   : > { %4412 = vmatprep.subr.bf16.mxu1 %v8242_v1  ;;  %v8326_v1 = vld [vmem:[%s11793_s1 + $0x13bc] ss:$40 sps:$4 sm:$0xff]  }
  0xb5   : > { %4372 = vmatpush2.bf16.msra.mxu0 %v8237_v2  ;;  %v8321_v2 = vld [vmem:[%s11793_s1 + $0xeb8] ss:$40 sps:$4 sm:$0xff]  }
  0xb6   : > { %4413 = vmatpush2.bf16.msra.mxu1 %v8240_v3  ;;  %4373 = vmatprep.subr.bf16.mxu0 %v8245_v4  ;;  %v8324_v3 = vld [vmem:[%s11793_s1 + $0x13b8] ss:$40 sps:$4 sm:$0xff]   ;;  %v8329_v4 = vld [vmem:[%s11793_s1 + $0xe6c] ss:$40 sps:$4 sm:$0xff]  }
  0xb7   : > { %4414 = vmatprep.subr.bf16.mxu1 %v8248_v5  ;;  %v8332_v5 = vld [vmem:[%s11793_s1 + $0x136c] ss:$40 sps:$4 sm:$0xff]  }
  0xb9   : > { %4374 = vmatpush2.bf16.msra.mxu0 %v8243_v6  ;;  %v8327_v6 = vld [vmem:[%s11793_s1 + $0xe68] ss:$40 sps:$4 sm:$0xff]  }
  0xba   : > { %4415 = vmatpush2.bf16.msra.mxu1 %v8246_v7  ;;  %4375 = vmatprep.subr.bf16.mxu0 %v8251_v10  ;;  %v8330_v7 = vld [vmem:[%s11793_s1 + $0x1368] ss:$40 sps:$4 sm:$0xff]   ;;  %v8335_v10 = vld [vmem:[%s11793_s1 + $0xe1c] ss:$40 sps:$4 sm:$0xff]  }
  0xbb   : > { %4416 = vmatprep.subr.bf16.mxu1 %v8254_v11  ;;  %v8338_v11 = vld [vmem:[%s11793_s1 + $0x131c] ss:$40 sps:$4 sm:$0xff]  }
  0xbd   : > { %4376 = vmatpush2.bf16.msra.mxu0 %v8249_v12  ;;  %v8333_v12 = vld [vmem:[%s11793_s1 + $0xe18] ss:$40 sps:$4 sm:$0xff]  }
  0xbe   : > { %4417 = vmatpush2.bf16.msra.mxu1 %v8252_v13  ;;  %4377 = vmatprep.subr.bf16.mxu0 %v8257_v14  ;;  %v8336_v13 = vld [vmem:[%s11793_s1 + $0x1318] ss:$40 sps:$4 sm:$0xff]   ;;  %v8341_v14 = vld [vmem:[%s11793_s1 + $0xdcc] ss:$40 sps:$4 sm:$0xff]  }
  0xbf   : > { %4418 = vmatprep.subr.bf16.mxu1 %v8260_v15  ;;  %v8344_v15 = vld [vmem:[%s11793_s1 + $0x12cc] ss:$40 sps:$4 sm:$0xff]  }
  0xc1   : > { %4378 = vmatpush2.bf16.msra.mxu0 %v8255_v16  ;;  %v8339_v16 = vld [vmem:[%s11793_s1 + $0xdc8] ss:$40 sps:$4 sm:$0xff]  }
  0xc2   : > { %4419 = vmatpush2.bf16.msra.mxu1 %v8258_v17  ;;  %4379 = vmatprep.subr.bf16.mxu0 %v8263_v18  ;;  %v8342_v17 = vld [vmem:[%s11793_s1 + $0x12c8] ss:$40 sps:$4 sm:$0xff]   ;;  %v8347_v18 = vld [vmem:[%s11793_s1 + $0xd7c] ss:$40 sps:$4 sm:$0xff]  }
  0xc3   : > { %4420 = vmatprep.subr.bf16.mxu1 %v8266_v19  ;;  %v8350_v19 = vld [vmem:[%s11793_s1 + $0x127c] ss:$40 sps:$4 sm:$0xff]  }
  0xc5   : > { %4380 = vmatpush2.bf16.msra.mxu0 %v8261_v22  ;;  %v8345_v22 = vld [vmem:[%s11793_s1 + $0xd78] ss:$40 sps:$4 sm:$0xff]  }
  0xc6   : > { %4421 = vmatpush2.bf16.msra.mxu1 %v8264_v23  ;;  %4381 = vmatprep.subr.bf16.mxu0 %v8269_v24  ;;  %v8348_v23 = vld [vmem:[%s11793_s1 + $0x1278] ss:$40 sps:$4 sm:$0xff]   ;;  %v8353_v24 = vld [vmem:[%s11793_s1 + $0xd2c] ss:$40 sps:$4 sm:$0xff]  }
  0xc7   : > { %4422 = vmatprep.subr.bf16.mxu1 %v8272_v25  ;;  %v8356_v25 = vld [vmem:[%s11793_s1 + $0x122c] ss:$40 sps:$4 sm:$0xff]  }
  0xc9   : > { %4382 = vmatpush2.bf16.msra.mxu0 %v8267_v26  ;;  %v8351_v26 = vld [vmem:[%s11793_s1 + $0xd28] ss:$40 sps:$4 sm:$0xff]  }
  0xca   : > { %4423 = vmatpush2.bf16.msra.mxu1 %v8270_v27  ;;  %4433 = vmatprep.subr.bf16.mxu0 %v8275_v28  ;;  %v8354_v27 = vld [vmem:[%s11793_s1 + $0x1228] ss:$40 sps:$4 sm:$0xff]   ;;  %v937_v28 = vlaneseq }
  0xcb   : > { %4474 = vmatprep.subr.bf16.mxu1 %v8278_v29  ;;  %v8359_v29 = vld [vmem:[%s11793_s1 + $0xcdc] ss:$40 sps:$4 sm:$0xff]  }
  0xcc   : > { %4384 = vmatmul.mubr.bf16.vlgmr.msra.gmra.mxu0 %v9224_v8 }
  0xcd   : > { %4425 = vmatmul.mubr.bf16.vlgmr.msra.gmra.mxu1 %v9226_v9  ;;  %4434 = vmatpush1.bf16.msra.mxu0 %v8273_v30  ;;  %v8362_v30 = vld [vmem:[%s11793_s1 + $0x11dc] ss:$40 sps:$4 sm:$0xff]  }
  0xce   : > { %4475 = vmatpush1.bf16.msra.mxu1 %v8276_v31  ;;  %4435 = vmatprep.subr.bf16.mxu0 %v8281_v32  ;;  %v8357_v31 = vld [vmem:[%s11793_s1 + $0xcd8] ss:$40 sps:$4 sm:$0xff]  }
  0xcf   : > { %4476 = vmatprep.subr.bf16.mxu1 %v8284_v33  ;;  %4465 = vmatprep.mubr.bf16.mxu0 %v9309_v37  ;;  %v8360_v32 = vld [vmem:[%s11793_s1 + $0x11d8] ss:$40 sps:$4 sm:$0xff]   ;;  %v9811_v33 = vshrl.u32 %v937_v28, 7 }
  0xd0   : > { %4506 = vmatprep.mubr.bf16.mxu1 %v9315_v40 }
  0xd1   : > { %4436 = vmatpush1.bf16.msra.mxu0 %v8279_v34  ;;  %v8365_v34 = vld [vmem:[%s11793_s1 + $0xc8c] ss:$40 sps:$4 sm:$0xff]   ;;  %vm5799_vm10 = vcmp.lt.s32.totalorder %v9811_v33, 7 }
  0xd2   : > { %4477 = vmatpush1.bf16.msra.mxu1 %v8282_v35  ;;  %4437 = vmatprep.subr.bf16.mxu0 %v8287_v36  ;;  %v8368_v35 = vld [vmem:[%s11793_s1 + $0x118c] ss:$40 sps:$4 sm:$0xff]   ;;  %v8363_v36 = vld [vmem:[%s11793_s1 + $0xc88] ss:$40 sps:$4 sm:$0xff]  }
  0xd3   : > { %4478 = vmatprep.subr.bf16.mxu1 %v8290_v38  ;;  %v8366_v38 = vld [vmem:[%s11793_s1 + $0x1188] ss:$40 sps:$4 sm:$0xff]  }
  0xd5   : > { %4438 = vmatpush1.bf16.msra.mxu0 %v8285_v39  ;;  %v933_v39 = vld [vmem:[%s11794_s2] sm:$0xff] }
  0xd6   : > { %4479 = vmatpush1.bf16.msra.mxu1 %v8288_v41  ;;  %4439 = vmatprep.subr.bf16.mxu0 %v8293_v42  ;;  %v9829_v41 = vsub.s32 0, %v9811_v33  ;;  %v8371_v42 = vld [vmem:[%s11793_s1 + $0x244] ss:$40 sps:$4 sm:$0xff]  }
  0xd7   : > { %4480 = vmatprep.subr.bf16.mxu1 %v8296_v43  ;;  %v8374_v43 = vld [vmem:[%s11793_s1 + $0x744] ss:$40 sps:$4 sm:$0xff]  }
  0xd9   : > { %4440 = vmatpush1.bf16.msra.mxu0 %v8291_v44  ;;  %v9838_v44 = vsub.s32 1, %v9811_v33 }
  0xda   : > { %4481 = vmatpush1.bf16.msra.mxu1 %v8294_v45  ;;  %4441 = vmatprep.subr.bf16.mxu0 %v8299_v46  ;;  %v8369_v45 = vld [vmem:[%s11793_s1 + $0x240] ss:$40 sps:$4 sm:$0xff]   ;;  %v940_v46 = vrot.slane %v933_v39, %v9829_v41 }
  0xdb   : > { %4482 = vmatprep.subr.bf16.mxu1 %v8302_v47  ;;  %v8372_v47 = vld [vmem:[%s11793_s1 + $0x740] ss:$40 sps:$4 sm:$0xff]  }
  0xdd   : > { %4442 = vmatpush1.bf16.msra.mxu0 %v8297_v48  ;;  %v8377_v48 = vld [vmem:[%s11793_s1 + $0x1f4] ss:$40 sps:$4 sm:$0xff]  }
  0xde   : > { %4483 = vmatpush1.bf16.msra.mxu1 %v8300_v50  ;;  %4443 = vmatprep.subr.bf16.mxu0 %v8305_v51  ;;  %v8380_v50 = vld [vmem:[%s11793_s1 + $0x6f4] ss:$40 sps:$4 sm:$0xff]   ;;  %v944_v51 = vrot.slane %v933_v39, %v9838_v44 }
  0xdf   : > { %4484 = vmatprep.subr.bf16.mxu1 %v8308_v53  ;;  %v8428_v39 = vld [vmem:[%s11793_s1 + $0x974] ss:$40 sps:$4 sm:$0xff]  }
  0xe1   : > { %4444 = vmatpush1.bf16.msra.mxu0 %v8303_v54 }
  0xe2   : > { %4485 = vmatpush1.bf16.msra.mxu1 %v8306_v55  ;;  %4445 = vmatprep.subr.bf16.mxu0 %v8311_v56  ;;  %v8375_v55 = vld [vmem:[%s11793_s1 + $0x1f0] ss:$40 sps:$4 sm:$0xff]  }
  0xe3   : > { %4486 = vmatprep.subr.bf16.mxu1 %v8314_v57  ;;  %v8378_v57 = vld [vmem:[%s11793_s1 + $0x6f0] ss:$40 sps:$4 sm:$0xff]  }
  0xe5   : > { %4446 = vmatpush1.bf16.msra.mxu0 %v8309_v58 }
  0xe6   : > { %4487 = vmatpush1.bf16.msra.mxu1 %v8312_v59  ;;  %4447 = vmatprep.subr.bf16.mxu0 %v8317_v60  ;;  %v8383_v60 = vld [vmem:[%s11793_s1 + $0x1a4] ss:$40 sps:$4 sm:$0xff]  }
  0xe7   : > { %4488 = vmatprep.subr.bf16.mxu1 %v8320_v61  ;;  %v8386_v61 = vld [vmem:[%s11793_s1 + $0x6a4] ss:$40 sps:$4 sm:$0xff]  }
  0xe9   : > { %4448 = vmatpush1.bf16.msra.mxu0 %v8315_v62 }
  0xea   : > { %4489 = vmatpush1.bf16.msra.mxu1 %v8318_v63  ;;  %4449 = vmatprep.subr.bf16.mxu0 %v8323_v0 }
  0xeb   : > { %4490 = vmatprep.subr.bf16.mxu1 %v8326_v1 }
  0xed   : > { %4450 = vmatpush2.bf16.msra.mxu0 %v8321_v2  ;;  %v8381_v2 = vld [vmem:[%s11793_s1 + $0x1a0] ss:$40 sps:$4 sm:$0xff]  }
  0xee   : > { %4491 = vmatpush2.bf16.msra.mxu1 %v8324_v3  ;;  %4451 = vmatprep.subr.bf16.mxu0 %v8329_v4  ;;  %v8384_v4 = vld [vmem:[%s11793_s1 + $0x6a0] ss:$40 sps:$4 sm:$0xff]  }
  0xef   : > { %4492 = vmatprep.subr.bf16.mxu1 %v8332_v5 }
  0xf1   : > { %4452 = vmatpush2.bf16.msra.mxu0 %v8327_v6 }
  0xf2   : > { %4493 = vmatpush2.bf16.msra.mxu1 %v8330_v7  ;;  %4453 = vmatprep.subr.bf16.mxu0 %v8335_v10  ;;  %v8389_v7 = vld [vmem:[%s11793_s1 + $0x154] ss:$40 sps:$4 sm:$0xff]  }
  0xf3   : > { %4494 = vmatprep.subr.bf16.mxu1 %v8338_v11  ;;  %v8392_v10 = vld [vmem:[%s11793_s1 + $0x654] ss:$40 sps:$4 sm:$0xff]   ;;  %v8387_v11 = vld [vmem:[%s11793_s1 + $0x150] ss:$40 sps:$4 sm:$0xff]  }
  0xf5   : > { %4454 = vmatpush2.bf16.msra.mxu0 %v8333_v12  ;;  %v8390_v12 = vld [vmem:[%s11793_s1 + $0x650] ss:$40 sps:$4 sm:$0xff]  }
  0xf6   : > { %4495 = vmatpush2.bf16.msra.mxu1 %v8336_v13  ;;  %4455 = vmatprep.subr.bf16.mxu0 %v8341_v14  ;;  %v8395_v13 = vld [vmem:[%s11793_s1 + $0x104] ss:$40 sps:$4 sm:$0xff]  }
  0xf7   : > { %4496 = vmatprep.subr.bf16.mxu1 %v8344_v15  ;;  %v8398_v14 = vld [vmem:[%s11793_s1 + $0x604] ss:$40 sps:$4 sm:$0xff]   ;;  %v8393_v15 = vld [vmem:[%s11793_s1 + $0x100] ss:$40 sps:$4 sm:$0xff]  }
  0xf9   : > { %4456 = vmatpush2.bf16.msra.mxu0 %v8339_v16  ;;  %v8396_v16 = vld [vmem:[%s11793_s1 + $0x600] ss:$40 sps:$4 sm:$0xff]  }
  0xfa   : > { %4497 = vmatpush2.bf16.msra.mxu1 %v8342_v17  ;;  %4457 = vmatprep.subr.bf16.mxu0 %v8347_v18  ;;  %v8401_v17 = vld [vmem:[%s11793_s1 + $0xb4] ss:$40 sps:$4 sm:$0xff]  }
  0xfb   : > { %4498 = vmatprep.subr.bf16.mxu1 %v8350_v19  ;;  %v8404_v18 = vld [vmem:[%s11793_s1 + $0x5b4] ss:$40 sps:$4 sm:$0xff]   ;;  %v8399_v19 = vld [vmem:[%s11793_s1 + $0xb0] ss:$40 sps:$4 sm:$0xff]  }
  0xfd   : > { %4458 = vmatpush2.bf16.msra.mxu0 %v8345_v22  ;;  %v8402_v22 = vld [vmem:[%s11793_s1 + $0x5b0] ss:$40 sps:$4 sm:$0xff]  }
  0xfe   : > { %4499 = vmatpush2.bf16.msra.mxu1 %v8348_v23  ;;  %4459 = vmatprep.subr.bf16.mxu0 %v8353_v24  ;;  %v8407_v23 = vld [vmem:[%s11793_s1 + $0x64] ss:$40 sps:$4 sm:$0xff]  }
  0xff   : > { %4500 = vmatprep.subr.bf16.mxu1 %v8356_v25  ;;  %v8410_v24 = vld [vmem:[%s11793_s1 + $0x564] ss:$40 sps:$4 sm:$0xff]   ;;  %v8405_v25 = vld [vmem:[%s11793_s1 + $0x60] ss:$40 sps:$4 sm:$0xff]  }
 0x101   : > { %4460 = vmatpush2.bf16.msra.mxu0 %v8351_v26  ;;  %v8408_v26 = vld [vmem:[%s11793_s1 + $0x560] ss:$40 sps:$4 sm:$0xff]  }
 0x102   : > { %4501 = vmatpush2.bf16.msra.mxu1 %v8354_v27  ;;  %4461 = vmatprep.subr.bf16.mxu0 %v8359_v29  ;;  %v8413_v27 = vld [vmem:[%s11793_s1 + $0x14] ss:$40 sps:$4 sm:$0xff]  }
 0x103   : > { %4502 = vmatprep.subr.bf16.mxu1 %v8362_v30  ;;  %v8416_v29 = vld [vmem:[%s11793_s1 + $0x514] ss:$40 sps:$4 sm:$0xff]   ;;  %v8411_v30 = vld [vmem:[%s11793_s1 + $0x10] ss:$40 sps:$4 sm:$0xff]  }
 0x105   : > { %4462 = vmatpush2.bf16.msra.mxu0 %v8357_v31  ;;  %v8414_v31 = vld [vmem:[%s11793_s1 + $0x510] ss:$40 sps:$4 sm:$0xff]  }
 0x106   : > { %4503 = vmatpush2.bf16.msra.mxu1 %v8360_v32  ;;  %4463 = vmatprep.subr.bf16.mxu0 %v8365_v34  ;;  %v8419_v32 = vld [vmem:[%s11793_s1 + $0x4c4] ss:$40 sps:$4 sm:$0xff]  }
 0x107   : > { %4504 = vmatprep.subr.bf16.mxu1 %v8368_v35  ;;  %v8422_v34 = vld [vmem:[%s11793_s1 + $0x9c4] ss:$40 sps:$4 sm:$0xff]   ;;  %v8417_v35 = vld [vmem:[%s11793_s1 + $0x4c0] ss:$40 sps:$4 sm:$0xff]  }
 0x109   : > { %4464 = vmatpush2.bf16.msra.mxu0 %v8363_v36  ;;  %v8420_v36 = vld [vmem:[%s11793_s1 + $0x9c0] ss:$40 sps:$4 sm:$0xff]  }
 0x10a   : > { %4505 = vmatpush2.bf16.msra.mxu1 %v8366_v38  ;;  %4515 = vmatprep.subr.bf16.mxu0 %v8371_v42  ;;  %v8425_v38 = vld [vmem:[%s11793_s1 + $0x474] ss:$40 sps:$4 sm:$0xff]   ;;  %v8423_v42 = vld [vmem:[%s11793_s1 + $0x470] ss:$40 sps:$4 sm:$0xff]  }
 0x10b   : > { %4556 = vmatprep.subr.bf16.mxu1 %v8374_v43  ;;  %v8426_v43 = vld [vmem:[%s11793_s1 + $0x970] ss:$40 sps:$4 sm:$0xff]  }
 0x10c   : > { %v4221_v53 = vpop.f32.mrf.mxu0  ;;  %4466 = vmatmul.mubr.bf16.vlgmr.msra.gmra.mxu0 %v9432_v20 }
 0x10d   : > { %v4262_v54 = vpop.f32.mrf.mxu1  ;;  %4507 = vmatmul.mubr.bf16.vlgmr.msra.gmra.mxu1 %v9434_v21  ;;  %v4222_v56 = vadd.f32 %v4221_v53, %v940_v46  ;;  %4516 = vmatpush1.bf16.msra.mxu0 %v8369_v45  ;;  %v8431_v45 = vld [vmem:[%s11793_s1 + $0x424] ss:$40 sps:$4 sm:$0xff]   ;;  %v8435_v53 = vld [vmem:[%s11793_s1 + $0x3d0] ss:$40 sps:$4 sm:$0xff]  }
 0x10e   : > { %4557 = vmatpush1.bf16.msra.mxu1 %v8372_v47  ;;  %v4223_v58 = vpop.f32.mrf.mxu0  ;;  %4517 = vmatprep.subr.bf16.mxu0 %v8377_v48  ;;  %v8434_v46 = vld [vmem:[%s11793_s1 + $0x924] ss:$40 sps:$4 sm:$0xff]   ;;  %v8429_v47 = vld [vmem:[%s11793_s1 + $0x420] ss:$40 sps:$4 sm:$0xff]  }
 0x10f   : > { %v4264_v59 = vpop.f32.mrf.mxu1  ;;  %4558 = vmatprep.subr.bf16.mxu1 %v8380_v50  ;;  %v9868_v62 = vadd.f32 %v4262_v54, %v4222_v56  ;;  %v4224_v63 = vadd.f32 %v4223_v58, %v944_v51  ;;  %4547 = vmatprep.mubr.bf16.mxu0 %v9161_v49  ;;  %v8432_v48 = vld [vmem:[%s11793_s1 + $0x920] ss:$40 sps:$4 sm:$0xff]   ;;  %v8437_v50 = vld [vmem:[%s11793_s1 + $0x3d4] ss:$40 sps:$4 sm:$0xff]   ;;  %v8438_v54 = vld [vmem:[%s11793_s1 + $0x8d0] ss:$40 sps:$4 sm:$0xff]  }
 0x110   : > { %4588 = vmatprep.mubr.bf16.mxu1 %v9167_v52  ;;  %v4225_v0 = vpop.f32.mrf.mxu0  ;;  %v8440_v51 = vld [vmem:[%s11793_s1 + $0x8d4] ss:$40 sps:$4 sm:$0xff]   ;;  %v8446_v56 = vld [vmem:[%s11793_s1 + $0x884] ss:$40 sps:$4 sm:$0xff]   ;;  %v8444_v58 = vld [vmem:[%s11793_s1 + $0x880] ss:$40 sps:$4 sm:$0xff]  }
 0x111   : > { %v4266_v1 = vpop.f32.mrf.mxu1  ;;  %v9875_v3 = vadd.f32 %v4264_v59, %v4224_v63  ;;  %4518 = vmatpush1.bf16.msra.mxu0 %v8375_v55  ;;  %v8443_v55 = vld [vmem:[%s11793_s1 + $0x384] ss:$40 sps:$4 sm:$0xff]   ;;  %v8449_v59 = vld [vmem:[%s11793_s1 + $0x334] ss:$40 sps:$4 sm:$0xff]   ;;  %v8450_v63 = vld [vmem:[%s11793_s1 + $0x830] ss:$40 sps:$4 sm:$0xff]  }
 0x112   : > { %4559 = vmatpush1.bf16.msra.mxu1 %v8378_v57  ;;  %v4226_v5 = vpop.f32.mrf.mxu0  ;;  %4519 = vmatprep.subr.bf16.mxu0 %v8383_v60  ;;  %v8441_v57 = vld [vmem:[%s11793_s1 + $0x380] ss:$40 sps:$4 sm:$0xff]   ;;  %v8452_v60 = vld [vmem:[%s11793_s1 + $0x834] ss:$40 sps:$4 sm:$0xff]   ;;  %v8455_v0 = vld [vmem:[%s11793_s1 + $0x2e4] ss:$40 sps:$4 sm:$0xff]  }
 0x113   : > { %v4267_v6 = vpop.f32.mrf.mxu1  ;;  %4560 = vmatprep.subr.bf16.mxu1 %v8386_v61  ;;  %v8447_v61 = vld [vmem:[%s11793_s1 + $0x330] ss:$40 sps:$4 sm:$0xff]   ;;  %v8458_v1 = vld [vmem:[%s11793_s1 + $0x7e4] ss:$40 sps:$4 sm:$0xff]   ;;  %v8461_v5 = vld [vmem:[%s11793_s1 + $0x294] ss:$40 sps:$4 sm:$0xff]  }
 0x114   : > { %v8464_v6 = vld [vmem:[%s11793_s1 + $0x794] ss:$40 sps:$4 sm:$0xff]  }
 0x115   : > { %4520 = vmatpush1.bf16.msra.mxu0 %v8381_v2  ;;  %v8453_v2 = vld [vmem:[%s11793_s1 + $0x2e0] ss:$40 sps:$4 sm:$0xff]  }
 0x116   : > { %4561 = vmatpush1.bf16.msra.mxu1 %v8384_v4  ;;  %4521 = vmatprep.subr.bf16.mxu0 %v8389_v7  ;;  %v8456_v4 = vld [vmem:[%s11793_s1 + $0x7e0] ss:$40 sps:$4 sm:$0xff]   ;;  %v8459_v7 = vld [vmem:[%s11793_s1 + $0x290] ss:$40 sps:$4 sm:$0xff]  }
 0x117   : > { %4562 = vmatprep.subr.bf16.mxu1 %v8392_v10  ;;  %v8462_v10 = vld [vmem:[%s11793_s1 + $0x790] ss:$40 sps:$4 sm:$0xff]  }
 0x119   : > { %4522 = vmatpush1.bf16.msra.mxu0 %v8387_v11  ;;  %v8467_v11 = vld [vmem:[%s11793_s1 + $0xc44] ss:$40 sps:$4 sm:$0xff]  }
 0x11a   : > { %4563 = vmatpush1.bf16.msra.mxu1 %v8390_v12  ;;  %4523 = vmatprep.subr.bf16.mxu0 %v8395_v13  ;;  %v8470_v12 = vld [vmem:[%s11793_s1 + $0x1144] ss:$40 sps:$4 sm:$0xff]   ;;  %v8465_v13 = vld [vmem:[%s11793_s1 + $0xc40] ss:$40 sps:$4 sm:$0xff]  }
 0x11b   : > { %4564 = vmatprep.subr.bf16.mxu1 %v8398_v14  ;;  %v8468_v14 = vld [vmem:[%s11793_s1 + $0x1140] ss:$40 sps:$4 sm:$0xff]  }
 0x11d   : > { %4524 = vmatpush1.bf16.msra.mxu0 %v8393_v15  ;;  %v8473_v15 = vld [vmem:[%s11793_s1 + $0xbf4] ss:$40 sps:$4 sm:$0xff]  }
 0x11e   : > { %4565 = vmatpush1.bf16.msra.mxu1 %v8396_v16  ;;  %4525 = vmatprep.subr.bf16.mxu0 %v8401_v17  ;;  %v8476_v16 = vld [vmem:[%s11793_s1 + $0x10f4] ss:$40 sps:$4 sm:$0xff]   ;;  %v8471_v17 = vld [vmem:[%s11793_s1 + $0xbf0] ss:$40 sps:$4 sm:$0xff]  }
 0x11f   : > { %4566 = vmatprep.subr.bf16.mxu1 %v8404_v18  ;;  %v8474_v18 = vld [vmem:[%s11793_s1 + $0x10f0] ss:$40 sps:$4 sm:$0xff]  }
 0x121   : > { %4526 = vmatpush1.bf16.msra.mxu0 %v8399_v19 }
 0x122   : > { %4567 = vmatpush1.bf16.msra.mxu1 %v8402_v22  ;;  %4527 = vmatprep.subr.bf16.mxu0 %v8407_v23 }
 0x123   : > { %4568 = vmatprep.subr.bf16.mxu1 %v8410_v24 }
 0x125   : > { %4528 = vmatpush1.bf16.msra.mxu0 %v8405_v25 }
 0x126   : > { %4569 = vmatpush1.bf16.msra.mxu1 %v8408_v26  ;;  %4529 = vmatprep.subr.bf16.mxu0 %v8413_v27  ;;  %v8479_v26 = vld [vmem:[%s11793_s1 + $0xba4] ss:$40 sps:$4 sm:$0xff]  }
 0x127   : > { %4570 = vmatprep.subr.bf16.mxu1 %v8416_v29  ;;  %v8482_v27 = vld [vmem:[%s11793_s1 + $0x10a4] ss:$40 sps:$4 sm:$0xff]  }
 0x129   : > { %4530 = vmatpush1.bf16.msra.mxu0 %v8411_v30 }
 0x12a   : > { %4571 = vmatpush1.bf16.msra.mxu1 %v8414_v31  ;;  %4531 = vmatprep.subr.bf16.mxu0 %v8419_v32  ;;  %v8480_v31 = vld [vmem:[%s11793_s1 + $0x10a0] ss:$40 sps:$4 sm:$0xff]  }
 0x12b   : > { %4572 = vmatprep.subr.bf16.mxu1 %v8422_v34 }
 0x12d   : > { %4532 = vmatpush2.bf16.msra.mxu0 %v8417_v35 }
 0x12e   : > { %4573 = vmatpush2.bf16.msra.mxu1 %v8420_v36  ;;  %4533 = vmatprep.subr.bf16.mxu0 %v8425_v38  ;;  %v8485_v38 = vld [vmem:[%s11793_s1 + $0xb54] ss:$40 sps:$4 sm:$0xff]  }
 0x12f   : > { %4574 = vmatprep.subr.bf16.mxu1 %v8428_v39  ;;  %v8488_v39 = vld [vmem:[%s11793_s1 + $0x1054] ss:$40 sps:$4 sm:$0xff]  }
 0x131   : > { %4534 = vmatpush2.bf16.msra.mxu0 %v8423_v42  ;;  %v8483_v42 = vld [vmem:[%s11793_s1 + $0xb50] ss:$40 sps:$4 sm:$0xff]  }
 0x132   : > { %4575 = vmatpush2.bf16.msra.mxu1 %v8426_v43  ;;  %4535 = vmatprep.subr.bf16.mxu0 %v8431_v45  ;;  %v8486_v43 = vld [vmem:[%s11793_s1 + $0x1050] ss:$40 sps:$4 sm:$0xff]   ;;  %v8491_v45 = vld [vmem:[%s11793_s1 + $0xb04] ss:$40 sps:$4 sm:$0xff]  }
 0x133   : > { %4576 = vmatprep.subr.bf16.mxu1 %v8434_v46  ;;  %v8494_v46 = vld [vmem:[%s11793_s1 + $0x1004] ss:$40 sps:$4 sm:$0xff]  }
 0x135   : > { %4536 = vmatpush2.bf16.msra.mxu0 %v8429_v47  ;;  %v8489_v47 = vld [vmem:[%s11793_s1 + $0xb00] ss:$40 sps:$4 sm:$0xff]  }
 0x136   : > { %4577 = vmatpush2.bf16.msra.mxu1 %v8432_v48  ;;  %4537 = vmatprep.subr.bf16.mxu0 %v8437_v50  ;;  %v8492_v48 = vld [vmem:[%s11793_s1 + $0x1000] ss:$40 sps:$4 sm:$0xff]   ;;  %v8497_v50 = vld [vmem:[%s11793_s1 + $0xab4] ss:$40 sps:$4 sm:$0xff]  }
 0x137   : > { %4578 = vmatprep.subr.bf16.mxu1 %v8440_v51  ;;  %v8500_v51 = vld [vmem:[%s11793_s1 + $0xfb4] ss:$40 sps:$4 sm:$0xff]  }
 0x139   : > { %4538 = vmatpush2.bf16.msra.mxu0 %v8435_v53  ;;  %v8495_v53 = vld [vmem:[%s11793_s1 + $0xab0] ss:$40 sps:$4 sm:$0xff]  }
 0x13a   : > { %4579 = vmatpush2.bf16.msra.mxu1 %v8438_v54  ;;  %4539 = vmatprep.subr.bf16.mxu0 %v8443_v55  ;;  %v8498_v54 = vld [vmem:[%s11793_s1 + $0xfb0] ss:$40 sps:$4 sm:$0xff]   ;;  %v8503_v55 = vld [vmem:[%s11793_s1 + $0xa64] ss:$40 sps:$4 sm:$0xff]  }
 0x13b   : > { %4580 = vmatprep.subr.bf16.mxu1 %v8446_v56  ;;  %v8506_v56 = vld [vmem:[%s11793_s1 + $0xf64] ss:$40 sps:$4 sm:$0xff]  }
 0x13d   : > { %4540 = vmatpush2.bf16.msra.mxu0 %v8441_v57  ;;  %v8501_v57 = vld [vmem:[%s11793_s1 + $0xa60] ss:$40 sps:$4 sm:$0xff]  }
 0x13e   : > { %4581 = vmatpush2.bf16.msra.mxu1 %v8444_v58  ;;  %4541 = vmatprep.subr.bf16.mxu0 %v8449_v59  ;;  %v8504_v58 = vld [vmem:[%s11793_s1 + $0xf60] ss:$40 sps:$4 sm:$0xff]   ;;  %v8509_v59 = vld [vmem:[%s11793_s1 + $0xa14] ss:$40 sps:$4 sm:$0xff]  }
 0x13f   : > { %4582 = vmatprep.subr.bf16.mxu1 %v8452_v60  ;;  %v8512_v60 = vld [vmem:[%s11793_s1 + $0xf14] ss:$40 sps:$4 sm:$0xff]  }
 0x141   : > { %4542 = vmatpush2.bf16.msra.mxu0 %v8447_v61  ;;  %v8507_v61 = vld [vmem:[%s11793_s1 + $0xa10] ss:$40 sps:$4 sm:$0xff]  }
 0x142   : > { %4583 = vmatpush2.bf16.msra.mxu1 %v8450_v63  ;;  %4543 = vmatprep.subr.bf16.mxu0 %v8455_v0  ;;  %v8510_v63 = vld [vmem:[%s11793_s1 + $0xf10] ss:$40 sps:$4 sm:$0xff]   ;;  %v8515_v0 = vld [vmem:[%s11793_s1 + $0xec4] ss:$40 sps:$4 sm:$0xff]  }
 0x143   : > { %4584 = vmatprep.subr.bf16.mxu1 %v8458_v1  ;;  %v8518_v1 = vld [vmem:[%s11793_s1 + $0x13c4] ss:$40 sps:$4 sm:$0xff]  }
 0x145   : > { %4544 = vmatpush2.bf16.msra.mxu0 %v8453_v2  ;;  %v8513_v2 = vld [vmem:[%s11793_s1 + $0xec0] ss:$40 sps:$4 sm:$0xff]  }
 0x146   : > { %4585 = vmatpush2.bf16.msra.mxu1 %v8456_v4  ;;  %4545 = vmatprep.subr.bf16.mxu0 %v8461_v5  ;;  %v8516_v4 = vld [vmem:[%s11793_s1 + $0x13c0] ss:$40 sps:$4 sm:$0xff]   ;;  %v8521_v5 = vld [vmem:[%s11793_s1 + $0xe74] ss:$40 sps:$4 sm:$0xff]  }
 0x147   : > { %4586 = vmatprep.subr.bf16.mxu1 %v8464_v6  ;;  %v8524_v6 = vld [vmem:[%s11793_s1 + $0x1374] ss:$40 sps:$4 sm:$0xff]  }
 0x149   : > { %4546 = vmatpush2.bf16.msra.mxu0 %v8459_v7  ;;  %v8519_v7 = vld [vmem:[%s11793_s1 + $0xe70] ss:$40 sps:$4 sm:$0xff]  }
 0x14a   : > { %4587 = vmatpush2.bf16.msra.mxu1 %v8462_v10  ;;  %4597 = vmatprep.subr.bf16.mxu0 %v8467_v11  ;;  %v8522_v10 = vld [vmem:[%s11793_s1 + $0x1370] ss:$40 sps:$4 sm:$0xff]   ;;  %v8527_v11 = vld [vmem:[%s11793_s1 + $0xe24] ss:$40 sps:$4 sm:$0xff]  }
 0x14b   : > { %4638 = vmatprep.subr.bf16.mxu1 %v8470_v12  ;;  %v8530_v12 = vld [vmem:[%s11793_s1 + $0x1324] ss:$40 sps:$4 sm:$0xff]  }
 0x14c   : > { %v4303_v19 = vpop.f32.mrf.mxu0  ;;  %4548 = vmatmul.mubr.bf16.vlgmr.msra.gmra.mxu0 %v9224_v8 }
 0x14d   : > { %v4344_v22 = vpop.f32.mrf.mxu1  ;;  %4589 = vmatmul.mubr.bf16.vlgmr.msra.gmra.mxu1 %v9226_v9  ;;  %v4304_v23 = vadd.f32 %v4303_v19, %v9868_v62  ;;  %4598 = vmatpush1.bf16.msra.mxu0 %v8465_v13  ;;  %v8477_v62 = vld [vmem:[%s11793_s1 + $0xba0] ss:$40 sps:$4 sm:$0xff]   ;;  %v8539_v19 = vld [vmem:[%s11793_s1 + $0xd84] ss:$40 sps:$4 sm:$0xff]  }
 0x14e   : > { %4639 = vmatpush1.bf16.msra.mxu1 %v8468_v14  ;;  %v4305_v24 = vpop.f32.mrf.mxu0  ;;  %4599 = vmatprep.subr.bf16.mxu0 %v8473_v15  ;;  %v8525_v13 = vld [vmem:[%s11793_s1 + $0xe20] ss:$40 sps:$4 sm:$0xff]   ;;  %v8533_v15 = vld [vmem:[%s11793_s1 + $0xdd4] ss:$40 sps:$4 sm:$0xff]  }
 0x14f   : > { %v4346_v25 = vpop.f32.mrf.mxu1  ;;  %4640 = vmatprep.subr.bf16.mxu1 %v8476_v16  ;;  %v10069_v29 = vadd.f32 %v4344_v22, %v4304_v23  ;;  %v4306_v30 = vadd.f32 %v4305_v24, %v9875_v3  ;;  %4629 = vmatprep.mubr.bf16.mxu0 %v9309_v37  ;;  %v8528_v14 = vld [vmem:[%s11793_s1 + $0x1320] ss:$40 sps:$4 sm:$0xff]   ;;  %v8536_v16 = vld [vmem:[%s11793_s1 + $0x12d4] ss:$40 sps:$4 sm:$0xff]   ;;  %v8542_v22 = vld [vmem:[%s11793_s1 + $0x1284] ss:$40 sps:$4 sm:$0xff]  }
 0x150   : > { %4670 = vmatprep.mubr.bf16.mxu1 %v9315_v40  ;;  %v4307_v32 = vpop.f32.mrf.mxu0  ;;  %v8537_v23 = vld [vmem:[%s11793_s1 + $0xd80] ss:$40 sps:$4 sm:$0xff]  }
 0x151   : > { %v4348_v34 = vpop.f32.mrf.mxu1  ;;  %v10080_v35 = vadd.f32 %v4346_v25, %v4306_v30  ;;  %4600 = vmatpush1.bf16.msra.mxu0 %v8471_v17  ;;  %v8531_v17 = vld [vmem:[%s11793_s1 + $0xdd0] ss:$40 sps:$4 sm:$0xff]   ;;  %v8540_v24 = vld [vmem:[%s11793_s1 + $0x1280] ss:$40 sps:$4 sm:$0xff]   ;;  %v8545_v25 = vld [vmem:[%s11793_s1 + $0xd34] ss:$40 sps:$4 sm:$0xff]  }
 0x152   : > { %4641 = vmatpush1.bf16.msra.mxu1 %v8474_v18  ;;  %v4308_v36 = vpop.f32.mrf.mxu0  ;;  %4601 = vmatprep.subr.bf16.mxu0 %v8479_v26  ;;  %v8534_v18 = vld [vmem:[%s11793_s1 + $0x12d0] ss:$40 sps:$4 sm:$0xff]   ;;  %v8548_v26 = vld [vmem:[%s11793_s1 + $0x1234] ss:$40 sps:$4 sm:$0xff]   ;;  %v8549_v32 = vld [vmem:[%s11793_s1 + $0xce0] ss:$40 sps:$4 sm:$0xff]  }
 0x153   : > { %v4349_v3 = vpop.f32.mrf.mxu1  ;;  %4642 = vmatprep.subr.bf16.mxu1 %v8482_v27  ;;  %v8543_v27 = vld [vmem:[%s11793_s1 + $0xd30] ss:$40 sps:$4 sm:$0xff]   ;;  %v8552_v34 = vld [vmem:[%s11793_s1 + $0x11e0] ss:$40 sps:$4 sm:$0xff]   ;;  %v8557_v36 = vld [vmem:[%s11793_s1 + $0xc94] ss:$40 sps:$4 sm:$0xff]  }
 0x154   : > { %v8546_v30 = vld [vmem:[%s11793_s1 + $0x1230] ss:$40 sps:$4 sm:$0xff]   ;;  %v8560_v3 = vld [vmem:[%s11793_s1 + $0x1194] ss:$40 sps:$4 sm:$0xff]  }
 0x155   : > { %4602 = vmatpush1.bf16.msra.mxu0 %v8477_v62  ;;  %v8551_v62 = vld [vmem:[%s11793_s1 + $0xce4] ss:$40 sps:$4 sm:$0xff]  }
 0x156   : > { %4643 = vmatpush1.bf16.msra.mxu1 %v8480_v31  ;;  %4603 = vmatprep.subr.bf16.mxu0 %v8485_v38  ;;  %v8554_v31 = vld [vmem:[%s11793_s1 + $0x11e4] ss:$40 sps:$4 sm:$0xff]   ;;  %v8555_v38 = vld [vmem:[%s11793_s1 + $0xc90] ss:$40 sps:$4 sm:$0xff]  }
 0x157   : > { %4644 = vmatprep.subr.bf16.mxu1 %v8488_v39  ;;  %v8558_v39 = vld [vmem:[%s11793_s1 + $0x1190] ss:$40 sps:$4 sm:$0xff]  }
 0x159   : > { %4604 = vmatpush1.bf16.msra.mxu0 %v8483_v42  ;;  %v10239_v42 = vsub.s32 2, %v9811_v33 }
 0x15a   : > { %4645 = vmatpush1.bf16.msra.mxu1 %v8486_v43  ;;  %4605 = vmatprep.subr.bf16.mxu0 %v8491_v45  ;;  %v8563_v43 = vld [vmem:[%s11793_s1 + $0x24c] ss:$40 sps:$4 sm:$0xff]  }
 0x15b   : > { %4646 = vmatprep.subr.bf16.mxu1 %v8494_v46  ;;  %v8566_v45 = vld [vmem:[%s11793_s1 + $0x74c] ss:$40 sps:$4 sm:$0xff]   ;;  %v8561_v46 = vld [vmem:[%s11793_s1 + $0x248] ss:$40 sps:$4 sm:$0xff]  }
 0x15d   : > { %4606 = vmatpush1.bf16.msra.mxu0 %v8489_v47  ;;  %v8564_v47 = vld [vmem:[%s11793_s1 + $0x748] ss:$40 sps:$4 sm:$0xff]  }
 0x15e   : > { %4647 = vmatpush1.bf16.msra.mxu1 %v8492_v48  ;;  %4607 = vmatprep.subr.bf16.mxu0 %v8497_v50  ;;  %v951_v48 = vsub.s32 3, %v9811_v33  ;;  %v10257_v50 = vld [vmem:[%s11794_s2] sm:$0xff] }
 0x15f   : > { %4648 = vmatprep.subr.bf16.mxu1 %v8500_v51  ;;  %v948_v51 = vrot.slane %v10257_v50, %v10239_v42 }
 0x161   : > { %4608 = vmatpush1.bf16.msra.mxu0 %v8495_v53  ;;  %v8569_v53 = vld [vmem:[%s11793_s1 + $0x1fc] ss:$40 sps:$4 sm:$0xff]  }
 0x162   : > { %4649 = vmatpush1.bf16.msra.mxu1 %v8498_v54  ;;  %4609 = vmatprep.subr.bf16.mxu0 %v8503_v55  ;;  %v8572_v54 = vld [vmem:[%s11793_s1 + $0x6fc] ss:$40 sps:$4 sm:$0xff]   ;;  %v952_v55 = vrot.slane %v10257_v50, %v951_v48 }
 0x163   : > { %4650 = vmatprep.subr.bf16.mxu1 %v8506_v56  ;;  %v8620_v48 = vld [vmem:[%s11793_s1 + $0x97c] ss:$40 sps:$4 sm:$0xff]  }
 0x165   : > { %4610 = vmatpush1.bf16.msra.mxu0 %v8501_v57 }
 0x166   : > { %4651 = vmatpush1.bf16.msra.mxu1 %v8504_v58  ;;  %4611 = vmatprep.subr.bf16.mxu0 %v8509_v59  ;;  %v8567_v59 = vld [vmem:[%s11793_s1 + $0x1f8] ss:$40 sps:$4 sm:$0xff]  }
 0x167   : > { %4652 = vmatprep.subr.bf16.mxu1 %v8512_v60  ;;  %v8570_v60 = vld [vmem:[%s11793_s1 + $0x6f8] ss:$40 sps:$4 sm:$0xff]  }
 0x169   : > { %4612 = vmatpush1.bf16.msra.mxu0 %v8507_v61 }
 0x16a   : > { %4653 = vmatpush1.bf16.msra.mxu1 %v8510_v63  ;;  %4613 = vmatprep.subr.bf16.mxu0 %v8515_v0  ;;  %v8575_v0 = vld [vmem:[%s11793_s1 + $0x1ac] ss:$40 sps:$4 sm:$0xff]  }
 0x16b   : > { %4654 = vmatprep.subr.bf16.mxu1 %v8518_v1  ;;  %v8578_v1 = vld [vmem:[%s11793_s1 + $0x6ac] ss:$40 sps:$4 sm:$0xff]  }
 0x16d   : > { %4614 = vmatpush2.bf16.msra.mxu0 %v8513_v2 }
 0x16e   : > { %4655 = vmatpush2.bf16.msra.mxu1 %v8516_v4  ;;  %4615 = vmatprep.subr.bf16.mxu0 %v8521_v5 }
 0x16f   : > { %4656 = vmatprep.subr.bf16.mxu1 %v8524_v6 }
 0x171   : > { %4616 = vmatpush2.bf16.msra.mxu0 %v8519_v7 }
 0x172   : > { %4657 = vmatpush2.bf16.msra.mxu1 %v8522_v10  ;;  %4617 = vmatprep.subr.bf16.mxu0 %v8527_v11  ;;  %v8573_v10 = vld [vmem:[%s11793_s1 + $0x1a8] ss:$40 sps:$4 sm:$0xff]  }
 0x173   : > { %4658 = vmatprep.subr.bf16.mxu1 %v8530_v12  ;;  %v8576_v11 = vld [vmem:[%s11793_s1 + $0x6a8] ss:$40 sps:$4 sm:$0xff]  }
 0x175   : > { %4618 = vmatpush2.bf16.msra.mxu0 %v8525_v13 }
 0x176   : > { %4659 = vmatpush2.bf16.msra.mxu1 %v8528_v14  ;;  %4619 = vmatprep.subr.bf16.mxu0 %v8533_v15  ;;  %v8581_v14 = vld [vmem:[%s11793_s1 + $0x15c] ss:$40 sps:$4 sm:$0xff]  }
 0x177   : > { %4660 = vmatprep.subr.bf16.mxu1 %v8536_v16  ;;  %v8584_v15 = vld [vmem:[%s11793_s1 + $0x65c] ss:$40 sps:$4 sm:$0xff]   ;;  %v8579_v16 = vld [vmem:[%s11793_s1 + $0x158] ss:$40 sps:$4 sm:$0xff]  }
 0x179   : > { %4620 = vmatpush2.bf16.msra.mxu0 %v8531_v17  ;;  %v8582_v17 = vld [vmem:[%s11793_s1 + $0x658] ss:$40 sps:$4 sm:$0xff]  }
 0x17a   : > { %4661 = vmatpush2.bf16.msra.mxu1 %v8534_v18  ;;  %4621 = vmatprep.subr.bf16.mxu0 %v8539_v19  ;;  %v8587_v18 = vld [vmem:[%s11793_s1 + $0x10c] ss:$40 sps:$4 sm:$0xff]  }
 0x17b   : > { %4662 = vmatprep.subr.bf16.mxu1 %v8542_v22  ;;  %v8590_v19 = vld [vmem:[%s11793_s1 + $0x60c] ss:$40 sps:$4 sm:$0xff]   ;;  %v8585_v22 = vld [vmem:[%s11793_s1 + $0x108] ss:$40 sps:$4 sm:$0xff]  }
 0x17d   : > { %4622 = vmatpush2.bf16.msra.mxu0 %v8537_v23  ;;  %v8588_v23 = vld [vmem:[%s11793_s1 + $0x608] ss:$40 sps:$4 sm:$0xff]  }
 0x17e   : > { %4663 = vmatpush2.bf16.msra.mxu1 %v8540_v24  ;;  %4623 = vmatprep.subr.bf16.mxu0 %v8545_v25  ;;  %v8593_v24 = vld [vmem:[%s11793_s1 + $0xbc] ss:$40 sps:$4 sm:$0xff]  }
 0x17f   : > { %4664 = vmatprep.subr.bf16.mxu1 %v8548_v26  ;;  %v8596_v25 = vld [vmem:[%s11793_s1 + $0x5bc] ss:$40 sps:$4 sm:$0xff]   ;;  %v8591_v26 = vld [vmem:[%s11793_s1 + $0xb8] ss:$40 sps:$4 sm:$0xff]  }
 0x181   : > { %4624 = vmatpush2.bf16.msra.mxu0 %v8543_v27  ;;  %v8594_v27 = vld [vmem:[%s11793_s1 + $0x5b8] ss:$40 sps:$4 sm:$0xff]  }
 0x182   : > { %4665 = vmatpush2.bf16.msra.mxu1 %v8546_v30  ;;  %4625 = vmatprep.subr.bf16.mxu0 %v8551_v62  ;;  %v8599_v30 = vld [vmem:[%s11793_s1 + $0x6c] ss:$40 sps:$4 sm:$0xff]  }
 0x183   : > { %4666 = vmatprep.subr.bf16.mxu1 %v8554_v31  ;;  %v8602_v62 = vld [vmem:[%s11793_s1 + $0x56c] ss:$40 sps:$4 sm:$0xff]   ;;  %v8597_v31 = vld [vmem:[%s11793_s1 + $0x68] ss:$40 sps:$4 sm:$0xff]  }
 0x185   : > { %4626 = vmatpush2.bf16.msra.mxu0 %v8549_v32  ;;  %v8600_v32 = vld [vmem:[%s11793_s1 + $0x568] ss:$40 sps:$4 sm:$0xff]  }
 0x186   : > { %4667 = vmatpush2.bf16.msra.mxu1 %v8552_v34  ;;  %4627 = vmatprep.subr.bf16.mxu0 %v8557_v36  ;;  %v8605_v34 = vld [vmem:[%s11793_s1 + $0x1c] ss:$40 sps:$4 sm:$0xff]  }
 0x187   : > { %4668 = vmatprep.subr.bf16.mxu1 %v8560_v3  ;;  %v8608_v36 = vld [vmem:[%s11793_s1 + $0x51c] ss:$40 sps:$4 sm:$0xff]   ;;  %v8603_v3 = vld [vmem:[%s11793_s1 + $0x18] ss:$40 sps:$4 sm:$0xff]  }
 0x189   : > { %4628 = vmatpush2.bf16.msra.mxu0 %v8555_v38  ;;  %v8606_v38 = vld [vmem:[%s11793_s1 + $0x518] ss:$40 sps:$4 sm:$0xff]  }
 0x18a   : > { %4669 = vmatpush2.bf16.msra.mxu1 %v8558_v39  ;;  %4679 = vmatprep.subr.bf16.mxu0 %v8563_v43  ;;  %v8611_v39 = vld [vmem:[%s11793_s1 + $0x4cc] ss:$40 sps:$4 sm:$0xff]  }
 0x18b   : > { %4720 = vmatprep.subr.bf16.mxu1 %v8566_v45  ;;  %v8614_v43 = vld [vmem:[%s11793_s1 + $0x9cc] ss:$40 sps:$4 sm:$0xff]   ;;  %v8609_v45 = vld [vmem:[%s11793_s1 + $0x4c8] ss:$40 sps:$4 sm:$0xff]  }
 0x18c   : > { %v4385_v56 = vpop.f32.mrf.mxu0  ;;  %4630 = vmatmul.mubr.bf16.vlgmr.msra.gmra.mxu0 %v9432_v20 }
 0x18d   : > { %v4426_v57 = vpop.f32.mrf.mxu1  ;;  %4671 = vmatmul.mubr.bf16.vlgmr.msra.gmra.mxu1 %v9434_v21  ;;  %v4386_v58 = vadd.f32 %v4385_v56, %v948_v51  ;;  %4680 = vmatpush1.bf16.msra.mxu0 %v8561_v46  ;;  %v8612_v46 = vld [vmem:[%s11793_s1 + $0x9c8] ss:$40 sps:$4 sm:$0xff]   ;;  %v8615_v51 = vld [vmem:[%s11793_s1 + $0x478] ss:$40 sps:$4 sm:$0xff]  }
 0x18e   : > { %4721 = vmatpush1.bf16.msra.mxu1 %v8564_v47  ;;  %v4387_v61 = vpop.f32.mrf.mxu0  ;;  %4681 = vmatprep.subr.bf16.mxu0 %v8569_v53  ;;  %v8617_v47 = vld [vmem:[%s11793_s1 + $0x47c] ss:$40 sps:$4 sm:$0xff]   ;;  %v8618_v53 = vld [vmem:[%s11793_s1 + $0x978] ss:$40 sps:$4 sm:$0xff]   ;;  %v8621_v56 = vld [vmem:[%s11793_s1 + $0x428] ss:$40 sps:$4 sm:$0xff]  }
 0x18f   : > { %v4428_v63 = vpop.f32.mrf.mxu1  ;;  %4722 = vmatprep.subr.bf16.mxu1 %v8572_v54  ;;  %v10282_v2 = vadd.f32 %v4426_v57, %v4386_v58  ;;  %v4388_v4 = vadd.f32 %v4387_v61, %v952_v55  ;;  %4711 = vmatprep.mubr.bf16.mxu0 %v9161_v49  ;;  %v8623_v54 = vld [vmem:[%s11793_s1 + $0x42c] ss:$40 sps:$4 sm:$0xff]   ;;  %v8624_v57 = vld [vmem:[%s11793_s1 + $0x928] ss:$40 sps:$4 sm:$0xff]   ;;  %v8629_v58 = vld [vmem:[%s11793_s1 + $0x3dc] ss:$40 sps:$4 sm:$0xff]  }
 0x190   : > { %4752 = vmatprep.mubr.bf16.mxu1 %v9167_v52  ;;  %v4389_v5 = vpop.f32.mrf.mxu0  ;;  %v8626_v55 = vld [vmem:[%s11793_s1 + $0x92c] ss:$40 sps:$4 sm:$0xff]   ;;  %v8630_v61 = vld [vmem:[%s11793_s1 + $0x8d8] ss:$40 sps:$4 sm:$0xff]  }
 0x191   : > { %v4430_v6 = vpop.f32.mrf.mxu1  ;;  %v10286_v7 = vadd.f32 %v4428_v63, %v4388_v4  ;;  %4682 = vmatpush1.bf16.msra.mxu0 %v8567_v59  ;;  %v8632_v59 = vld [vmem:[%s11793_s1 + $0x8dc] ss:$40 sps:$4 sm:$0xff]   ;;  %v8635_v63 = vld [vmem:[%s11793_s1 + $0x38c] ss:$40 sps:$4 sm:$0xff]   ;;  %v8636_v4 = vld [vmem:[%s11793_s1 + $0x888] ss:$40 sps:$4 sm:$0xff]  }
 0x192   : > { %4723 = vmatpush1.bf16.msra.mxu1 %v8570_v60  ;;  %v4390_v12 = vpop.f32.mrf.mxu0  ;;  %4683 = vmatprep.subr.bf16.mxu0 %v8575_v0  ;;  %v8627_v60 = vld [vmem:[%s11793_s1 + $0x3d8] ss:$40 sps:$4 sm:$0xff]   ;;  %v8638_v0 = vld [vmem:[%s11793_s1 + $0x88c] ss:$40 sps:$4 sm:$0xff]   ;;  %v8641_v5 = vld [vmem:[%s11793_s1 + $0x33c] ss:$40 sps:$4 sm:$0xff]  }
 0x193   : > { %v4431_v13 = vpop.f32.mrf.mxu1  ;;  %4724 = vmatprep.subr.bf16.mxu1 %v8578_v1  ;;  %v8633_v1 = vld [vmem:[%s11793_s1 + $0x388] ss:$40 sps:$4 sm:$0xff]   ;;  %v8644_v6 = vld [vmem:[%s11793_s1 + $0x83c] ss:$40 sps:$4 sm:$0xff]   ;;  %v8647_v12 = vld [vmem:[%s11793_s1 + $0x2ec] ss:$40 sps:$4 sm:$0xff]  }
 0x194   : > { %v8650_v13 = vld [vmem:[%s11793_s1 + $0x7ec] ss:$40 sps:$4 sm:$0xff]  }
 0x195   : > { %4684 = vmatpush1.bf16.msra.mxu0 %v8573_v10  ;;  %v8639_v10 = vld [vmem:[%s11793_s1 + $0x338] ss:$40 sps:$4 sm:$0xff]  }
 0x196   : > { %4725 = vmatpush1.bf16.msra.mxu1 %v8576_v11  ;;  %4685 = vmatprep.subr.bf16.mxu0 %v8581_v14  ;;  %v8642_v11 = vld [vmem:[%s11793_s1 + $0x838] ss:$40 sps:$4 sm:$0xff]   ;;  %v8645_v14 = vld [vmem:[%s11793_s1 + $0x2e8] ss:$40 sps:$4 sm:$0xff]  }
 0x197   : > { %4726 = vmatprep.subr.bf16.mxu1 %v8584_v15  ;;  %v8648_v15 = vld [vmem:[%s11793_s1 + $0x7e8] ss:$40 sps:$4 sm:$0xff]  }
 0x199   : > { %4686 = vmatpush1.bf16.msra.mxu0 %v8579_v16  ;;  %v8653_v16 = vld [vmem:[%s11793_s1 + $0x29c] ss:$40 sps:$4 sm:$0xff]  }
 0x19a   : > { %4727 = vmatpush1.bf16.msra.mxu1 %v8582_v17  ;;  %4687 = vmatprep.subr.bf16.mxu0 %v8587_v18  ;;  %v8656_v17 = vld [vmem:[%s11793_s1 + $0x79c] ss:$40 sps:$4 sm:$0xff]   ;;  %v8651_v18 = vld [vmem:[%s11793_s1 + $0x298] ss:$40 sps:$4 sm:$0xff]  }
 0x19b   : > { %4728 = vmatprep.subr.bf16.mxu1 %v8590_v19  ;;  %v8654_v19 = vld [vmem:[%s11793_s1 + $0x798] ss:$40 sps:$4 sm:$0xff]  }
 0x19d   : > { %4688 = vmatpush1.bf16.msra.mxu0 %v8585_v22  ;;  %v8659_v22 = vld [vmem:[%s11793_s1 + $0xc4c] ss:$40 sps:$4 sm:$0xff]  }
 0x19e   : > { %4729 = vmatpush1.bf16.msra.mxu1 %v8588_v23  ;;  %4689 = vmatprep.subr.bf16.mxu0 %v8593_v24  ;;  %v8662_v23 = vld [vmem:[%s11793_s1 + $0x114c] ss:$40 sps:$4 sm:$0xff]   ;;  %v8657_v24 = vld [vmem:[%s11793_s1 + $0xc48] ss:$40 sps:$4 sm:$0xff]  }
 0x19f   : > { %4730 = vmatprep.subr.bf16.mxu1 %v8596_v25  ;;  %v8660_v25 = vld [vmem:[%s11793_s1 + $0x1148] ss:$40 sps:$4 sm:$0xff]  }
 0x1a1   : > { %4690 = vmatpush1.bf16.msra.mxu0 %v8591_v26  ;;  %v8665_v26 = vld [vmem:[%s11793_s1 + $0xbfc] ss:$40 sps:$4 sm:$0xff]  }
 0x1a2   : > { %4731 = vmatpush1.bf16.msra.mxu1 %v8594_v27  ;;  %4691 = vmatprep.subr.bf16.mxu0 %v8599_v30  ;;  %v8668_v27 = vld [vmem:[%s11793_s1 + $0x10fc] ss:$40 sps:$4 sm:$0xff]  }
 0x1a3   : > { %4732 = vmatprep.subr.bf16.mxu1 %v8602_v62 }
 0x1a5   : > { %4692 = vmatpush1.bf16.msra.mxu0 %v8597_v31 }
 0x1a6   : > { %4733 = vmatpush1.bf16.msra.mxu1 %v8600_v32  ;;  %4693 = vmatprep.subr.bf16.mxu0 %v8605_v34  ;;  %v8663_v32 = vld [vmem:[%s11793_s1 + $0xbf8] ss:$40 sps:$4 sm:$0xff]  }
 0x1a7   : > { %4734 = vmatprep.subr.bf16.mxu1 %v8608_v36  ;;  %v8666_v34 = vld [vmem:[%s11793_s1 + $0x10f8] ss:$40 sps:$4 sm:$0xff]  }
 0x1a9   : > { %4694 = vmatpush1.bf16.msra.mxu0 %v8603_v3 }
 0x1aa   : > { %4735 = vmatpush1.bf16.msra.mxu1 %v8606_v38  ;;  %4695 = vmatprep.subr.bf16.mxu0 %v8611_v39  ;;  %v8671_v38 = vld [vmem:[%s11793_s1 + $0xbac] ss:$40 sps:$4 sm:$0xff]  }
 0x1ab   : > { %4736 = vmatprep.subr.bf16.mxu1 %v8614_v43 }
 0x1ad   : > { %4696 = vmatpush2.bf16.msra.mxu0 %v8609_v45 }
 0x1ae   : > { %4737 = vmatpush2.bf16.msra.mxu1 %v8612_v46  ;;  %4697 = vmatprep.subr.bf16.mxu0 %v8617_v47 }
 0x1af   : > { %4738 = vmatprep.subr.bf16.mxu1 %v8620_v48  ;;  %v8669_v48 = vld [vmem:[%s11793_s1 + $0xba8] ss:$40 sps:$4 sm:$0xff]  }
 0x1b1   : > { %4698 = vmatpush2.bf16.msra.mxu0 %v8615_v51  ;;  %v8672_v51 = vld [vmem:[%s11793_s1 + $0x10a8] ss:$40 sps:$4 sm:$0xff]  }
 0x1b2   : > { %4739 = vmatpush2.bf16.msra.mxu1 %v8618_v53  ;;  %4699 = vmatprep.subr.bf16.mxu0 %v8623_v54  ;;  %v8677_v54 = vld [vmem:[%s11793_s1 + $0xb5c] ss:$40 sps:$4 sm:$0xff]  }
 0x1b3   : > { %4740 = vmatprep.subr.bf16.mxu1 %v8626_v55  ;;  %v8680_v55 = vld [vmem:[%s11793_s1 + $0x105c] ss:$40 sps:$4 sm:$0xff]  }
 0x1b5   : > { %4700 = vmatpush2.bf16.msra.mxu0 %v8621_v56  ;;  %v8675_v56 = vld [vmem:[%s11793_s1 + $0xb58] ss:$40 sps:$4 sm:$0xff]  }
 0x1b6   : > { %4741 = vmatpush2.bf16.msra.mxu1 %v8624_v57  ;;  %4701 = vmatprep.subr.bf16.mxu0 %v8629_v58  ;;  %v8678_v57 = vld [vmem:[%s11793_s1 + $0x1058] ss:$40 sps:$4 sm:$0xff]   ;;  %v8683_v58 = vld [vmem:[%s11793_s1 + $0xb0c] ss:$40 sps:$4 sm:$0xff]  }
 0x1b7   : > { %4742 = vmatprep.subr.bf16.mxu1 %v8632_v59  ;;  %v8686_v59 = vld [vmem:[%s11793_s1 + $0x100c] ss:$40 sps:$4 sm:$0xff]  }
 0x1b9   : > { %4702 = vmatpush2.bf16.msra.mxu0 %v8627_v60  ;;  %v8681_v60 = vld [vmem:[%s11793_s1 + $0xb08] ss:$40 sps:$4 sm:$0xff]  }
 0x1ba   : > { %4743 = vmatpush2.bf16.msra.mxu1 %v8630_v61  ;;  %4703 = vmatprep.subr.bf16.mxu0 %v8635_v63  ;;  %v8684_v61 = vld [vmem:[%s11793_s1 + $0x1008] ss:$40 sps:$4 sm:$0xff]   ;;  %v8689_v63 = vld [vmem:[%s11793_s1 + $0xabc] ss:$40 sps:$4 sm:$0xff]  }
 0x1bb   : > { %4744 = vmatprep.subr.bf16.mxu1 %v8638_v0  ;;  %v8692_v0 = vld [vmem:[%s11793_s1 + $0xfbc] ss:$40 sps:$4 sm:$0xff]  }
 0x1bd   : > { %4704 = vmatpush2.bf16.msra.mxu0 %v8633_v1  ;;  %v8687_v1 = vld [vmem:[%s11793_s1 + $0xab8] ss:$40 sps:$4 sm:$0xff]  }
 0x1be   : > { %4745 = vmatpush2.bf16.msra.mxu1 %v8636_v4  ;;  %4705 = vmatprep.subr.bf16.mxu0 %v8641_v5  ;;  %v8690_v4 = vld [vmem:[%s11793_s1 + $0xfb8] ss:$40 sps:$4 sm:$0xff]   ;;  %v8695_v5 = vld [vmem:[%s11793_s1 + $0xa6c] ss:$40 sps:$4 sm:$0xff]  }
 0x1bf   : > { %4746 = vmatprep.subr.bf16.mxu1 %v8644_v6  ;;  %v8698_v6 = vld [vmem:[%s11793_s1 + $0xf6c] ss:$40 sps:$4 sm:$0xff]  }
 0x1c1   : > { %4706 = vmatpush2.bf16.msra.mxu0 %v8639_v10  ;;  %v8693_v10 = vld [vmem:[%s11793_s1 + $0xa68] ss:$40 sps:$4 sm:$0xff]  }
 0x1c2   : > { %4747 = vmatpush2.bf16.msra.mxu1 %v8642_v11  ;;  %4707 = vmatprep.subr.bf16.mxu0 %v8647_v12  ;;  %v8696_v11 = vld [vmem:[%s11793_s1 + $0xf68] ss:$40 sps:$4 sm:$0xff]   ;;  %v8701_v12 = vld [vmem:[%s11793_s1 + $0xa1c] ss:$40 sps:$4 sm:$0xff]  }
 0x1c3   : > { %4748 = vmatprep.subr.bf16.mxu1 %v8650_v13  ;;  %v8704_v13 = vld [vmem:[%s11793_s1 + $0xf1c] ss:$40 sps:$4 sm:$0xff]  }
 0x1c5   : > { %4708 = vmatpush2.bf16.msra.mxu0 %v8645_v14  ;;  %v8699_v14 = vld [vmem:[%s11793_s1 + $0xa18] ss:$40 sps:$4 sm:$0xff]  }
 0x1c6   : > { %4749 = vmatpush2.bf16.msra.mxu1 %v8648_v15  ;;  %4709 = vmatprep.subr.bf16.mxu0 %v8653_v16  ;;  %v8702_v15 = vld [vmem:[%s11793_s1 + $0xf18] ss:$40 sps:$4 sm:$0xff]   ;;  %v8707_v16 = vld [vmem:[%s11793_s1 + $0xecc] ss:$40 sps:$4 sm:$0xff]  }
 0x1c7   : > { %4750 = vmatprep.subr.bf16.mxu1 %v8656_v17  ;;  %v8710_v17 = vld [vmem:[%s11793_s1 + $0x13cc] ss:$40 sps:$4 sm:$0xff]  }
 0x1c9   : > { %4710 = vmatpush2.bf16.msra.mxu0 %v8651_v18  ;;  %v8705_v18 = vld [vmem:[%s11793_s1 + $0xec8] ss:$40 sps:$4 sm:$0xff]  }
 0x1ca   : > { %4751 = vmatpush2.bf16.msra.mxu1 %v8654_v19  ;;  %4761 = vmatprep.subr.bf16.mxu0 %v8659_v22  ;;  %v8708_v19 = vld [vmem:[%s11793_s1 + $0x13c8] ss:$40 sps:$4 sm:$0xff]   ;;  %v8713_v22 = vld [vmem:[%s11793_s1 + $0xe7c] ss:$40 sps:$4 sm:$0xff]  }
 0x1cb   : > { %4802 = vmatprep.subr.bf16.mxu1 %v8662_v23  ;;  %v8716_v23 = vld [vmem:[%s11793_s1 + $0x137c] ss:$40 sps:$4 sm:$0xff]  }
 0x1cc   : > { %v4467_v30 = vpop.f32.mrf.mxu0  ;;  %4712 = vmatmul.mubr.bf16.vlgmr.msra.gmra.mxu0 %v9224_v8 }
 0x1cd   : > { %v4508_v62 = vpop.f32.mrf.mxu1  ;;  %4753 = vmatmul.mubr.bf16.vlgmr.msra.gmra.mxu1 %v9226_v9  ;;  %v4468_v31 = vadd.f32 %v4467_v30, %v10282_v2  ;;  %4762 = vmatpush1.bf16.msra.mxu0 %v8657_v24  ;;  %v8674_v2 = vld [vmem:[%s11793_s1 + $0x10ac] ss:$40 sps:$4 sm:$0xff]   ;;  %v8711_v24 = vld [vmem:[%s11793_s1 + $0xe78] ss:$40 sps:$4 sm:$0xff]   ;;  %v8717_v30 = vld [vmem:[%s11793_s1 + $0xe28] ss:$40 sps:$4 sm:$0xff]  }
 0x1ce   : > { %4803 = vmatpush1.bf16.msra.mxu1 %v8660_v25  ;;  %v4469_v36 = vpop.f32.mrf.mxu0  ;;  %4763 = vmatprep.subr.bf16.mxu0 %v8665_v26  ;;  %v8714_v25 = vld [vmem:[%s11793_s1 + $0x1378] ss:$40 sps:$4 sm:$0xff]   ;;  %v8719_v26 = vld [vmem:[%s11793_s1 + $0xe2c] ss:$40 sps:$4 sm:$0xff]  }
 0x1cf   : > { %v4510_v3 = vpop.f32.mrf.mxu1  ;;  %4804 = vmatprep.subr.bf16.mxu1 %v8668_v27  ;;  %v10483_v39 = vadd.f32 %v4508_v62, %v4468_v31  ;;  %v4470_v43 = vadd.f32 %v4469_v36, %v10286_v7  ;;  %4793 = vmatprep.mubr.bf16.mxu0 %v9309_v37  ;;  %v8722_v27 = vld [vmem:[%s11793_s1 + $0x132c] ss:$40 sps:$4 sm:$0xff]   ;;  %v8720_v62 = vld [vmem:[%s11793_s1 + $0x1328] ss:$40 sps:$4 sm:$0xff]   ;;  %v8725_v31 = vld [vmem:[%s11793_s1 + $0xddc] ss:$40 sps:$4 sm:$0xff]  }
 0x1d0   : > { %4834 = vmatprep.mubr.bf16.mxu1 %v9315_v40  ;;  %v4471_v45 = vpop.f32.mrf.mxu0  ;;  %v8726_v36 = vld [vmem:[%s11793_s1 + $0x12d8] ss:$40 sps:$4 sm:$0xff]  }
 0x1d1   : > { %v4512_v46 = vpop.f32.mrf.mxu1  ;;  %v10488_v47 = vadd.f32 %v4510_v3, %v4470_v43  ;;  %4764 = vmatpush1.bf16.msra.mxu0 %v8663_v32  ;;  %v8728_v32 = vld [vmem:[%s11793_s1 + $0x12dc] ss:$40 sps:$4 sm:$0xff]   ;;  %v8731_v3 = vld [vmem:[%s11793_s1 + $0xd8c] ss:$40 sps:$4 sm:$0xff]   ;;  %v8732_v43 = vld [vmem:[%s11793_s1 + $0x1288] ss:$40 sps:$4 sm:$0xff]  }
 0x1d2   : > { %4805 = vmatpush1.bf16.msra.mxu1 %v8666_v34  ;;  %v4472_v53 = vpop.f32.mrf.mxu0  ;;  %4765 = vmatprep.subr.bf16.mxu0 %v8671_v38  ;;  %v8723_v34 = vld [vmem:[%s11793_s1 + $0xdd8] ss:$40 sps:$4 sm:$0xff]   ;;  %v8734_v38 = vld [vmem:[%s11793_s1 + $0x128c] ss:$40 sps:$4 sm:$0xff]   ;;  %v8737_v45 = vld [vmem:[%s11793_s1 + $0xd3c] ss:$40 sps:$4 sm:$0xff]  }
 0x1d3   : > { %v4513_v7 = vpop.f32.mrf.mxu1  ;;  %4806 = vmatprep.subr.bf16.mxu1 %v8674_v2  ;;  %v8729_v2 = vld [vmem:[%s11793_s1 + $0xd88] ss:$40 sps:$4 sm:$0xff]   ;;  %v8740_v46 = vld [vmem:[%s11793_s1 + $0x123c] ss:$40 sps:$4 sm:$0xff]   ;;  %v8743_v53 = vld [vmem:[%s11793_s1 + $0xcec] ss:$40 sps:$4 sm:$0xff]  }
 0x1d4   : > { %v8746_v7 = vld [vmem:[%s11793_s1 + $0x11ec] ss:$40 sps:$4 sm:$0xff]  }
 0x1d5   : > { %4766 = vmatpush1.bf16.msra.mxu0 %v8669_v48  ;;  %v8735_v48 = vld [vmem:[%s11793_s1 + $0xd38] ss:$40 sps:$4 sm:$0xff]  }
 0x1d6   : > { %4807 = vmatpush1.bf16.msra.mxu1 %v8672_v51  ;;  %4767 = vmatprep.subr.bf16.mxu0 %v8677_v54  ;;  %v8738_v51 = vld [vmem:[%s11793_s1 + $0x1238] ss:$40 sps:$4 sm:$0xff]   ;;  %v8741_v54 = vld [vmem:[%s11793_s1 + $0xce8] ss:$40 sps:$4 sm:$0xff]  }
 0x1d7   : > { %4808 = vmatprep.subr.bf16.mxu1 %v8680_v55  ;;  %v8744_v55 = vld [vmem:[%s11793_s1 + $0x11e8] ss:$40 sps:$4 sm:$0xff]  }
 0x1d9   : > { %4768 = vmatpush1.bf16.msra.mxu0 %v8675_v56  ;;  %v8749_v56 = vld [vmem:[%s11793_s1 + $0xc9c] ss:$40 sps:$4 sm:$0xff]  }
 0x1da   : > { %4809 = vmatpush1.bf16.msra.mxu1 %v8678_v57  ;;  %4769 = vmatprep.subr.bf16.mxu0 %v8683_v58  ;;  %v8752_v57 = vld [vmem:[%s11793_s1 + $0x119c] ss:$40 sps:$4 sm:$0xff]   ;;  %v8747_v58 = vld [vmem:[%s11793_s1 + $0xc98] ss:$40 sps:$4 sm:$0xff]  }
 0x1db   : > { %4810 = vmatprep.subr.bf16.mxu1 %v8686_v59  ;;  %v8750_v59 = vld [vmem:[%s11793_s1 + $0x1198] ss:$40 sps:$4 sm:$0xff]  }
 0x1dd   : > { %4770 = vmatpush1.bf16.msra.mxu0 %v8681_v60  ;;  %v10653_v60 = vsub.s32 4, %v9811_v33 }
 0x1de   : > { %4811 = vmatpush1.bf16.msra.mxu1 %v8684_v61  ;;  %4771 = vmatprep.subr.bf16.mxu0 %v8689_v63  ;;  %v8755_v61 = vld [vmem:[%s11793_s1 + $0x254] ss:$40 sps:$4 sm:$0xff]  }
 0x1df   : > { %4812 = vmatprep.subr.bf16.mxu1 %v8692_v0  ;;  %v8758_v63 = vld [vmem:[%s11793_s1 + $0x754] ss:$40 sps:$4 sm:$0xff]   ;;  %v956_v0 = vrot.slane %v10257_v50, %v10653_v60 }
 0x1e1   : > { %4772 = vmatpush1.bf16.msra.mxu0 %v8687_v1  ;;  %v8753_v1 = vld [vmem:[%s11793_s1 + $0x250] ss:$40 sps:$4 sm:$0xff]  }
 0x1e2   : > { %4813 = vmatpush1.bf16.msra.mxu1 %v8690_v4  ;;  %4773 = vmatprep.subr.bf16.mxu0 %v8695_v5  ;;  %v8756_v4 = vld [vmem:[%s11793_s1 + $0x750] ss:$40 sps:$4 sm:$0xff]   ;;  %v10670_v5 = vsub.s32 5, %v9811_v33 }
 0x1e3   : > { %4814 = vmatprep.subr.bf16.mxu1 %v8698_v6  ;;  %v8761_v6 = vld [vmem:[%s11793_s1 + $0x204] ss:$40 sps:$4 sm:$0xff]  }
 0x1e5   : > { %4774 = vmatpush1.bf16.msra.mxu0 %v8693_v10  ;;  %v8764_v10 = vld [vmem:[%s11793_s1 + $0x704] ss:$40 sps:$4 sm:$0xff]  }
 0x1e6   : > { %4815 = vmatpush1.bf16.msra.mxu1 %v8696_v11  ;;  %4775 = vmatprep.subr.bf16.mxu0 %v8701_v12  ;;  %v960_v11 = vrot.slane %v10257_v50, %v10670_v5  ;;  %v8767_v50 = vld [vmem:[%s11793_s1 + $0x1b4] ss:$40 sps:$4 sm:$0xff]  }
 0x1e7   : > { %4816 = vmatprep.subr.bf16.mxu1 %v8704_v13 }
 0x1e9   : > { %4776 = vmatpush1.bf16.msra.mxu0 %v8699_v14 }
 0x1ea   : > { %4817 = vmatpush1.bf16.msra.mxu1 %v8702_v15  ;;  %4777 = vmatprep.subr.bf16.mxu0 %v8707_v16  ;;  %v8759_v15 = vld [vmem:[%s11793_s1 + $0x200] ss:$40 sps:$4 sm:$0xff]  }
 0x1eb   : > { %4818 = vmatprep.subr.bf16.mxu1 %v8710_v17  ;;  %v8762_v16 = vld [vmem:[%s11793_s1 + $0x700] ss:$40 sps:$4 sm:$0xff]  }
 0x1ed   : > { %4778 = vmatpush2.bf16.msra.mxu0 %v8705_v18 }
 0x1ee   : > { %4819 = vmatpush2.bf16.msra.mxu1 %v8708_v19  ;;  %4779 = vmatprep.subr.bf16.mxu0 %v8713_v22  ;;  %v8770_v19 = vld [vmem:[%s11793_s1 + $0x6b4] ss:$40 sps:$4 sm:$0xff]  }
 0x1ef   : > { %4820 = vmatprep.subr.bf16.mxu1 %v8716_v23 }
 0x1f1   : > { %4780 = vmatpush2.bf16.msra.mxu0 %v8711_v24 }
 0x1f2   : > { %4821 = vmatpush2.bf16.msra.mxu1 %v8714_v25  ;;  %4781 = vmatprep.subr.bf16.mxu0 %v8719_v26 }
 0x1f3   : > { %4822 = vmatprep.subr.bf16.mxu1 %v8722_v27  ;;  %v8765_v27 = vld [vmem:[%s11793_s1 + $0x1b0] ss:$40 sps:$4 sm:$0xff]  }
 0x1f5   : > { %4782 = vmatpush2.bf16.msra.mxu0 %v8717_v30  ;;  %v8768_v30 = vld [vmem:[%s11793_s1 + $0x6b0] ss:$40 sps:$4 sm:$0xff]  }
 0x1f6   : > { %4823 = vmatpush2.bf16.msra.mxu1 %v8720_v62  ;;  %4783 = vmatprep.subr.bf16.mxu0 %v8725_v31 }
 0x1f7   : > { %4824 = vmatprep.subr.bf16.mxu1 %v8728_v32  ;;  %v8771_v32 = vld [vmem:[%s11793_s1 + $0x160] ss:$40 sps:$4 sm:$0xff]  }
 0x1f9   : > { %4784 = vmatpush2.bf16.msra.mxu0 %v8723_v34  ;;  %v8774_v34 = vld [vmem:[%s11793_s1 + $0x660] ss:$40 sps:$4 sm:$0xff]  }
 0x1fa   : > { %4825 = vmatpush2.bf16.msra.mxu1 %v8726_v36  ;;  %4785 = vmatprep.subr.bf16.mxu0 %v8731_v3  ;;  %v8779_v36 = vld [vmem:[%s11793_s1 + $0x114] ss:$40 sps:$4 sm:$0xff]  }
 0x1fb   : > { %4826 = vmatprep.subr.bf16.mxu1 %v8734_v38  ;;  %v8782_v3 = vld [vmem:[%s11793_s1 + $0x614] ss:$40 sps:$4 sm:$0xff]   ;;  %v8777_v38 = vld [vmem:[%s11793_s1 + $0x110] ss:$40 sps:$4 sm:$0xff]  }
 0x1fd   : > { %4786 = vmatpush2.bf16.msra.mxu0 %v8729_v2  ;;  %v8780_v2 = vld [vmem:[%s11793_s1 + $0x610] ss:$40 sps:$4 sm:$0xff]  }
 0x1fe   : > { %4827 = vmatpush2.bf16.msra.mxu1 %v8732_v43  ;;  %4787 = vmatprep.subr.bf16.mxu0 %v8737_v45  ;;  %v8785_v43 = vld [vmem:[%s11793_s1 + $0xc4] ss:$40 sps:$4 sm:$0xff]  }
 0x1ff   : > { %4828 = vmatprep.subr.bf16.mxu1 %v8740_v46  ;;  %v8788_v45 = vld [vmem:[%s11793_s1 + $0x5c4] ss:$40 sps:$4 sm:$0xff]   ;;  %v8783_v46 = vld [vmem:[%s11793_s1 + $0xc0] ss:$40 sps:$4 sm:$0xff]  }
 0x201   : > { %4788 = vmatpush2.bf16.msra.mxu0 %v8735_v48  ;;  %v8786_v48 = vld [vmem:[%s11793_s1 + $0x5c0] ss:$40 sps:$4 sm:$0xff]  }
 0x202   : > { %4829 = vmatpush2.bf16.msra.mxu1 %v8738_v51  ;;  %4789 = vmatprep.subr.bf16.mxu0 %v8743_v53  ;;  %v8791_v51 = vld [vmem:[%s11793_s1 + $0x74] ss:$40 sps:$4 sm:$0xff]  }
 0x203   : > { %4830 = vmatprep.subr.bf16.mxu1 %v8746_v7  ;;  %v8794_v53 = vld [vmem:[%s11793_s1 + $0x574] ss:$40 sps:$4 sm:$0xff]   ;;  %v8789_v7 = vld [vmem:[%s11793_s1 + $0x70] ss:$40 sps:$4 sm:$0xff]  }
 0x205   : > { %4790 = vmatpush2.bf16.msra.mxu0 %v8741_v54  ;;  %v8792_v54 = vld [vmem:[%s11793_s1 + $0x570] ss:$40 sps:$4 sm:$0xff]  }
 0x206   : > { %4831 = vmatpush2.bf16.msra.mxu1 %v8744_v55  ;;  %4791 = vmatprep.subr.bf16.mxu0 %v8749_v56  ;;  %v8797_v55 = vld [vmem:[%s11793_s1 + $0x24] ss:$40 sps:$4 sm:$0xff]  }
 0x207   : > { %4832 = vmatprep.subr.bf16.mxu1 %v8752_v57  ;;  %v8800_v56 = vld [vmem:[%s11793_s1 + $0x524] ss:$40 sps:$4 sm:$0xff]   ;;  %v8795_v57 = vld [vmem:[%s11793_s1 + $0x20] ss:$40 sps:$4 sm:$0xff]  }
 0x209   : > { %4792 = vmatpush2.bf16.msra.mxu0 %v8747_v58  ;;  %v8798_v58 = vld [vmem:[%s11793_s1 + $0x520] ss:$40 sps:$4 sm:$0xff]  }
 0x20a   : > { %4833 = vmatpush2.bf16.msra.mxu1 %v8750_v59  ;;  %4843 = vmatprep.subr.bf16.mxu0 %v8755_v61  ;;  %v8803_v59 = vld [vmem:[%s11793_s1 + $0x4d4] ss:$40 sps:$4 sm:$0xff]  }
 0x20b   : > { %4884 = vmatprep.subr.bf16.mxu1 %v8758_v63  ;;  %v8806_v61 = vld [vmem:[%s11793_s1 + $0x9d4] ss:$40 sps:$4 sm:$0xff]   ;;  %v8801_v63 = vld [vmem:[%s11793_s1 + $0x4d0] ss:$40 sps:$4 sm:$0xff]  }
 0x20c   : > { %v4549_v12 = vpop.f32.mrf.mxu0  ;;  %4794 = vmatmul.mubr.bf16.vlgmr.msra.gmra.mxu0 %v9432_v20 }
 0x20d   : > { %v4590_v13 = vpop.f32.mrf.mxu1  ;;  %4835 = vmatmul.mubr.bf16.vlgmr.msra.gmra.mxu1 %v9434_v21  ;;  %v4550_v14 = vadd.f32 %v4549_v12, %v956_v0  ;;  %4844 = vmatpush1.bf16.msra.mxu0 %v8753_v1  ;;  %v8804_v0 = vld [vmem:[%s11793_s1 + $0x9d0] ss:$40 sps:$4 sm:$0xff]   ;;  %v8809_v1 = vld [vmem:[%s11793_s1 + $0x484] ss:$40 sps:$4 sm:$0xff]   ;;  %v8818_v12 = vld [vmem:[%s11793_s1 + $0x934] ss:$40 sps:$4 sm:$0xff]  }
 0x20e   : > { %4885 = vmatpush1.bf16.msra.mxu1 %v8756_v4  ;;  %v4551_v17 = vpop.f32.mrf.mxu0  ;;  %4845 = vmatprep.subr.bf16.mxu0 %v8761_v6  ;;  %v8812_v4 = vld [vmem:[%s11793_s1 + $0x984] ss:$40 sps:$4 sm:$0xff]   ;;  %v8807_v6 = vld [vmem:[%s11793_s1 + $0x480] ss:$40 sps:$4 sm:$0xff]  }
 0x20f   : > { %v4592_v18 = vpop.f32.mrf.mxu1  ;;  %4886 = vmatprep.subr.bf16.mxu1 %v8764_v10  ;;  %v10694_v22 = vadd.f32 %v4590_v13, %v4550_v14  ;;  %v4552_v23 = vadd.f32 %v4551_v17, %v960_v11  ;;  %4875 = vmatprep.mubr.bf16.mxu0 %v9161_v49  ;;  %v8773_v49 = vld [vmem:[%s11793_s1 + $0x164] ss:$40 sps:$4 sm:$0xff]   ;;  %v8810_v10 = vld [vmem:[%s11793_s1 + $0x980] ss:$40 sps:$4 sm:$0xff]   ;;  %v8815_v11 = vld [vmem:[%s11793_s1 + $0x434] ss:$40 sps:$4 sm:$0xff]  }
 0x210   : > { %4916 = vmatprep.mubr.bf16.mxu1 %v9167_v52  ;;  %v4553_v24 = vpop.f32.mrf.mxu0  ;;  %v8776_v52 = vld [vmem:[%s11793_s1 + $0x664] ss:$40 sps:$4 sm:$0xff]   ;;  %v8813_v13 = vld [vmem:[%s11793_s1 + $0x430] ss:$40 sps:$4 sm:$0xff]   ;;  %v8819_v17 = vld [vmem:[%s11793_s1 + $0x3e0] ss:$40 sps:$4 sm:$0xff]  }
 0x211   : > { %v4594_v25 = vpop.f32.mrf.mxu1  ;;  %v10698_v26 = vadd.f32 %v4592_v18, %v4552_v23  ;;  %4846 = vmatpush1.bf16.msra.mxu0 %v8759_v15  ;;  %v8816_v14 = vld [vmem:[%s11793_s1 + $0x930] ss:$40 sps:$4 sm:$0xff]   ;;  %v8821_v15 = vld [vmem:[%s11793_s1 + $0x3e4] ss:$40 sps:$4 sm:$0xff]   ;;  %v8822_v18 = vld [vmem:[%s11793_s1 + $0x8e0] ss:$40 sps:$4 sm:$0xff]  }
 0x212   : > { %4887 = vmatpush1.bf16.msra.mxu1 %v8762_v16  ;;  %v4554_v62 = vpop.f32.mrf.mxu0  ;;  %4847 = vmatprep.subr.bf16.mxu0 %v8767_v50  ;;  %v8824_v16 = vld [vmem:[%s11793_s1 + $0x8e4] ss:$40 sps:$4 sm:$0xff]   ;;  %v8827_v50 = vld [vmem:[%s11793_s1 + $0x394] ss:$40 sps:$4 sm:$0xff]   ;;  %v8825_v23 = vld [vmem:[%s11793_s1 + $0x390] ss:$40 sps:$4 sm:$0xff]  }
 0x213   : > { %v4595_v31 = vpop.f32.mrf.mxu1  ;;  %4888 = vmatprep.subr.bf16.mxu1 %v8770_v19  ;;  %v8830_v19 = vld [vmem:[%s11793_s1 + $0x894] ss:$40 sps:$4 sm:$0xff]   ;;  %v8828_v24 = vld [vmem:[%s11793_s1 + $0x890] ss:$40 sps:$4 sm:$0xff]   ;;  %v8833_v25 = vld [vmem:[%s11793_s1 + $0x344] ss:$40 sps:$4 sm:$0xff]  }
 0x214   : > { %v8834_v62 = vld [vmem:[%s11793_s1 + $0x840] ss:$40 sps:$4 sm:$0xff]   ;;  %v8839_v31 = vld [vmem:[%s11793_s1 + $0x2f4] ss:$40 sps:$4 sm:$0xff]  }
 0x215   : > { %4848 = vmatpush1.bf16.msra.mxu0 %v8765_v27  ;;  %v8836_v27 = vld [vmem:[%s11793_s1 + $0x844] ss:$40 sps:$4 sm:$0xff]  }
 0x216   : > { %4889 = vmatpush1.bf16.msra.mxu1 %v8768_v30  ;;  %4849 = vmatprep.subr.bf16.mxu0 %v8773_v49  ;;  %v8831_v30 = vld [vmem:[%s11793_s1 + $0x340] ss:$40 sps:$4 sm:$0xff]   ;;  %v8842_v49 = vld [vmem:[%s11793_s1 + $0x7f4] ss:$40 sps:$4 sm:$0xff]  }
 0x217   : > { %4890 = vmatprep.subr.bf16.mxu1 %v8776_v52  ;;  %v8837_v52 = vld [vmem:[%s11793_s1 + $0x2f0] ss:$40 sps:$4 sm:$0xff]  }
 0x219   : > { %4850 = vmatpush1.bf16.msra.mxu0 %v8771_v32  ;;  %v8840_v32 = vld [vmem:[%s11793_s1 + $0x7f0] ss:$40 sps:$4 sm:$0xff]  }
 0x21a   : > { %4891 = vmatpush1.bf16.msra.mxu1 %v8774_v34  ;;  %4851 = vmatprep.subr.bf16.mxu0 %v8779_v36  ;;  %v8845_v34 = vld [vmem:[%s11793_s1 + $0x2a4] ss:$40 sps:$4 sm:$0xff]  }
 0x21b   : > { %4892 = vmatprep.subr.bf16.mxu1 %v8782_v3  ;;  %v8848_v36 = vld [vmem:[%s11793_s1 + $0x7a4] ss:$40 sps:$4 sm:$0xff]   ;;  %v8843_v3 = vld [vmem:[%s11793_s1 + $0x2a0] ss:$40 sps:$4 sm:$0xff]  }
 0x21d   : > { %4852 = vmatpush1.bf16.msra.mxu0 %v8777_v38  ;;  %v8846_v38 = vld [vmem:[%s11793_s1 + $0x7a0] ss:$40 sps:$4 sm:$0xff]  }
 0x21e   : > { %4893 = vmatpush1.bf16.msra.mxu1 %v8780_v2  ;;  %4853 = vmatprep.subr.bf16.mxu0 %v8785_v43  ;;  %v8851_v2 = vld [vmem:[%s11793_s1 + $0xc54] ss:$40 sps:$4 sm:$0xff]  }
 0x21f   : > { %4894 = vmatprep.subr.bf16.mxu1 %v8788_v45  ;;  %v8854_v43 = vld [vmem:[%s11793_s1 + $0x1154] ss:$40 sps:$4 sm:$0xff]   ;;  %v8849_v45 = vld [vmem:[%s11793_s1 + $0xc50] ss:$40 sps:$4 sm:$0xff]  }
 0x221   : > { %4854 = vmatpush1.bf16.msra.mxu0 %v8783_v46  ;;  %v8852_v46 = vld [vmem:[%s11793_s1 + $0x1150] ss:$40 sps:$4 sm:$0xff]  }
 0x222   : > { %4895 = vmatpush1.bf16.msra.mxu1 %v8786_v48  ;;  %4855 = vmatprep.subr.bf16.mxu0 %v8791_v51  ;;  %v8857_v48 = vld [vmem:[%s11793_s1 + $0xc04] ss:$40 sps:$4 sm:$0xff]  }
 0x223   : > { %4896 = vmatprep.subr.bf16.mxu1 %v8794_v53  ;;  %v8860_v51 = vld [vmem:[%s11793_s1 + $0x1104] ss:$40 sps:$4 sm:$0xff]  }
 0x225   : > { %4856 = vmatpush1.bf16.msra.mxu0 %v8789_v7 }
 0x226   : > { %4897 = vmatpush1.bf16.msra.mxu1 %v8792_v54  ;;  %4857 = vmatprep.subr.bf16.mxu0 %v8797_v55  ;;  %v8855_v55 = vld [vmem:[%s11793_s1 + $0xc00] ss:$40 sps:$4 sm:$0xff]  }
 0x227   : > { %4898 = vmatprep.subr.bf16.mxu1 %v8800_v56  ;;  %v8858_v56 = vld [vmem:[%s11793_s1 + $0x1100] ss:$40 sps:$4 sm:$0xff]  }
 0x229   : > { %4858 = vmatpush1.bf16.msra.mxu0 %v8795_v57 }
 0x22a   : > { %4899 = vmatpush1.bf16.msra.mxu1 %v8798_v58  ;;  %4859 = vmatprep.subr.bf16.mxu0 %v8803_v59 }
 0x22b   : > { %4900 = vmatprep.subr.bf16.mxu1 %v8806_v61 }
 0x22d   : > { %4860 = vmatpush2.bf16.msra.mxu0 %v8801_v63 }
 0x22e   : > { %4901 = vmatpush2.bf16.msra.mxu1 %v8804_v0  ;;  %4861 = vmatprep.subr.bf16.mxu0 %v8809_v1  ;;  %v8861_v1 = vld [vmem:[%s11793_s1 + $0xbb0] ss:$40 sps:$4 sm:$0xff]  }
 0x22f   : > { %4902 = vmatprep.subr.bf16.mxu1 %v8812_v4  ;;  %v8864_v4 = vld [vmem:[%s11793_s1 + $0x10b0] ss:$40 sps:$4 sm:$0xff]  }
 0x231   : > { %4862 = vmatpush2.bf16.msra.mxu0 %v8807_v6 }
 0x232   : > { %4903 = vmatpush2.bf16.msra.mxu1 %v8810_v10  ;;  %4863 = vmatprep.subr.bf16.mxu0 %v8815_v11  ;;  %v8867_v10 = vld [vmem:[%s11793_s1 + $0xb60] ss:$40 sps:$4 sm:$0xff]  }
 0x233   : > { %4904 = vmatprep.subr.bf16.mxu1 %v8818_v12  ;;  %v8870_v11 = vld [vmem:[%s11793_s1 + $0x1060] ss:$40 sps:$4 sm:$0xff]   ;;  %v8875_v12 = vld [vmem:[%s11793_s1 + $0xb14] ss:$40 sps:$4 sm:$0xff]  }
 0x235   : > { %4864 = vmatpush2.bf16.msra.mxu0 %v8813_v13  ;;  %v8878_v13 = vld [vmem:[%s11793_s1 + $0x1014] ss:$40 sps:$4 sm:$0xff]  }
 0x236   : > { %4905 = vmatpush2.bf16.msra.mxu1 %v8816_v14  ;;  %4865 = vmatprep.subr.bf16.mxu0 %v8821_v15  ;;  %v8873_v14 = vld [vmem:[%s11793_s1 + $0xb10] ss:$40 sps:$4 sm:$0xff]  }
 0x237   : > { %4906 = vmatprep.subr.bf16.mxu1 %v8824_v16  ;;  %v8876_v15 = vld [vmem:[%s11793_s1 + $0x1010] ss:$40 sps:$4 sm:$0xff]   ;;  %v8881_v16 = vld [vmem:[%s11793_s1 + $0xac4] ss:$40 sps:$4 sm:$0xff]  }
 0x239   : > { %4866 = vmatpush2.bf16.msra.mxu0 %v8819_v17  ;;  %v8884_v17 = vld [vmem:[%s11793_s1 + $0xfc4] ss:$40 sps:$4 sm:$0xff]  }
 0x23a   : > { %4907 = vmatpush2.bf16.msra.mxu1 %v8822_v18  ;;  %4867 = vmatprep.subr.bf16.mxu0 %v8827_v50  ;;  %v8879_v18 = vld [vmem:[%s11793_s1 + $0xac0] ss:$40 sps:$4 sm:$0xff]  }
 0x23b   : > { %4908 = vmatprep.subr.bf16.mxu1 %v8830_v19  ;;  %v8882_v50 = vld [vmem:[%s11793_s1 + $0xfc0] ss:$40 sps:$4 sm:$0xff]   ;;  %v8887_v19 = vld [vmem:[%s11793_s1 + $0xa74] ss:$40 sps:$4 sm:$0xff]  }
 0x23d   : > { %4868 = vmatpush2.bf16.msra.mxu0 %v8825_v23  ;;  %v8890_v23 = vld [vmem:[%s11793_s1 + $0xf74] ss:$40 sps:$4 sm:$0xff]  }
 0x23e   : > { %4909 = vmatpush2.bf16.msra.mxu1 %v8828_v24  ;;  %4869 = vmatprep.subr.bf16.mxu0 %v8833_v25  ;;  %v8885_v24 = vld [vmem:[%s11793_s1 + $0xa70] ss:$40 sps:$4 sm:$0xff]  }
 0x23f   : > { %4910 = vmatprep.subr.bf16.mxu1 %v8836_v27  ;;  %v8888_v25 = vld [vmem:[%s11793_s1 + $0xf70] ss:$40 sps:$4 sm:$0xff]   ;;  %v8893_v27 = vld [vmem:[%s11793_s1 + $0xa24] ss:$40 sps:$4 sm:$0xff]  }
 0x241   : > { %4870 = vmatpush2.bf16.msra.mxu0 %v8831_v30  ;;  %v8896_v30 = vld [vmem:[%s11793_s1 + $0xf24] ss:$40 sps:$4 sm:$0xff]  }
 0x242   : > { %4911 = vmatpush2.bf16.msra.mxu1 %v8834_v62  ;;  %4871 = vmatprep.subr.bf16.mxu0 %v8839_v31  ;;  %v8891_v62 = vld [vmem:[%s11793_s1 + $0xa20] ss:$40 sps:$4 sm:$0xff]  }
 0x243   : > { %4912 = vmatprep.subr.bf16.mxu1 %v8842_v49  ;;  %v8894_v31 = vld [vmem:[%s11793_s1 + $0xf20] ss:$40 sps:$4 sm:$0xff]   ;;  %v8899_v49 = vld [vmem:[%s11793_s1 + $0xed4] ss:$40 sps:$4 sm:$0xff]  }
 0x245   : > { %4872 = vmatpush2.bf16.msra.mxu0 %v8837_v52  ;;  %v8902_v52 = vld [vmem:[%s11793_s1 + $0x13d4] ss:$40 sps:$4 sm:$0xff]  }
 0x246   : > { %4913 = vmatpush2.bf16.msra.mxu1 %v8840_v32  ;;  %4873 = vmatprep.subr.bf16.mxu0 %v8845_v34  ;;  %v8897_v32 = vld [vmem:[%s11793_s1 + $0xed0] ss:$40 sps:$4 sm:$0xff]  }
 0x247   : > { %4914 = vmatprep.subr.bf16.mxu1 %v8848_v36  ;;  %v8900_v34 = vld [vmem:[%s11793_s1 + $0x13d0] ss:$40 sps:$4 sm:$0xff]   ;;  %v8905_v36 = vld [vmem:[%s11793_s1 + $0xe84] ss:$40 sps:$4 sm:$0xff]  }
 0x249   : > { %4874 = vmatpush2.bf16.msra.mxu0 %v8843_v3  ;;  %v8908_v3 = vld [vmem:[%s11793_s1 + $0x1384] ss:$40 sps:$4 sm:$0xff]  }
 0x24a   : > { %4915 = vmatpush2.bf16.msra.mxu1 %v8846_v38  ;;  %4925 = vmatprep.subr.bf16.mxu0 %v8851_v2  ;;  %v8903_v38 = vld [vmem:[%s11793_s1 + $0xe80] ss:$40 sps:$4 sm:$0xff]  }
 0x24b   : > { %4966 = vmatprep.subr.bf16.mxu1 %v8854_v43  ;;  %v8906_v2 = vld [vmem:[%s11793_s1 + $0x1380] ss:$40 sps:$4 sm:$0xff]   ;;  %v8911_v43 = vld [vmem:[%s11793_s1 + $0xe34] ss:$40 sps:$4 sm:$0xff]  }
 0x24c   : > { %v4631_v53 = vpop.f32.mrf.mxu0  ;;  %4876 = vmatmul.mubr.bf16.vlgmr.msra.gmra.mxu0 %v9224_v8  ;;  %v8863_v8 = vld [vmem:[%s11793_s1 + $0xbb4] ss:$40 sps:$4 sm:$0xff]  }
 0x24d   : > { %v4672_v7 = vpop.f32.mrf.mxu1  ;;  %4917 = vmatmul.mubr.bf16.vlgmr.msra.gmra.mxu1 %v9226_v9  ;;  %v4632_v54 = vadd.f32 %v4631_v53, %v10694_v22  ;;  %4926 = vmatpush1.bf16.msra.mxu0 %v8849_v45  ;;  %v8866_v9 = vld [vmem:[%s11793_s1 + $0x10b4] ss:$40 sps:$4 sm:$0xff]   ;;  %v8920_v53 = vld [vmem:[%s11793_s1 + $0x12e4] ss:$40 sps:$4 sm:$0xff]  }
 0x24e   : > { %4967 = vmatpush1.bf16.msra.mxu1 %v8852_v46  ;;  %v4633_v57 = vpop.f32.mrf.mxu0  ;;  %4927 = vmatprep.subr.bf16.mxu0 %v8857_v48  ;;  %v8914_v45 = vld [vmem:[%s11793_s1 + $0x1334] ss:$40 sps:$4 sm:$0xff]   ;;  %v8909_v46 = vld [vmem:[%s11793_s1 + $0xe30] ss:$40 sps:$4 sm:$0xff]  }
 0x24f   : > { %v4674_v58 = vpop.f32.mrf.mxu1  ;;  %4968 = vmatprep.subr.bf16.mxu1 %v8860_v51  ;;  %v10895_v22 = vadd.f32 %v4672_v7, %v4632_v54  ;;  %v4634_v59 = vadd.f32 %v4633_v57, %v10698_v26  ;;  %4957 = vmatprep.mubr.bf16.mxu0 %v9309_v37  ;;  %v8869_v37 = vld [vmem:[%s11793_s1 + $0xb64] ss:$40 sps:$4 sm:$0xff]   ;;  %v8912_v48 = vld [vmem:[%s11793_s1 + $0x1330] ss:$40 sps:$4 sm:$0xff]   ;;  %v8915_v7 = vld [vmem:[%s11793_s1 + $0xde0] ss:$40 sps:$4 sm:$0xff]  }
 0x250   : > { %4998 = vmatprep.mubr.bf16.mxu1 %v9315_v40  ;;  %v4635_v61 = vpop.f32.mrf.mxu0  ;;  %v8872_v40 = vld [vmem:[%s11793_s1 + $0x1064] ss:$40 sps:$4 sm:$0xff]   ;;  %v8918_v54 = vld [vmem:[%s11793_s1 + $0x12e0] ss:$40 sps:$4 sm:$0xff]   ;;  %v8921_v57 = vld [vmem:[%s11793_s1 + $0xd90] ss:$40 sps:$4 sm:$0xff]  }
 0x251   : > { %v4676_v63 = vpop.f32.mrf.mxu1  ;;  %v10900_v0 = vadd.f32 %v4674_v58, %v4634_v59  ;;  %4928 = vmatpush1.bf16.msra.mxu0 %v8855_v55  ;;  %v8917_v51 = vld [vmem:[%s11793_s1 + $0xde4] ss:$40 sps:$4 sm:$0xff]   ;;  %v8923_v55 = vld [vmem:[%s11793_s1 + $0xd94] ss:$40 sps:$4 sm:$0xff]   ;;  %v8924_v58 = vld [vmem:[%s11793_s1 + $0x1290] ss:$40 sps:$4 sm:$0xff]  }
 0x252   : > { %4969 = vmatpush1.bf16.msra.mxu1 %v8858_v56  ;;  %v4636_v6 = vpop.f32.mrf.mxu0  ;;  %4929 = vmatprep.subr.bf16.mxu0 %v8863_v8  ;;  %v8926_v56 = vld [vmem:[%s11793_s1 + $0x1294] ss:$40 sps:$4 sm:$0xff]   ;;  %v8929_v8 = vld [vmem:[%s11793_s1 + $0xd44] ss:$40 sps:$4 sm:$0xff]   ;;  %v8927_v59 = vld [vmem:[%s11793_s1 + $0xd40] ss:$40 sps:$4 sm:$0xff]  }
 0x253   : > { %v4677_v26 = vpop.f32.mrf.mxu1  ;;  %4970 = vmatprep.subr.bf16.mxu1 %v8866_v9  ;;  %v8932_v9 = vld [vmem:[%s11793_s1 + $0x1244] ss:$40 sps:$4 sm:$0xff]   ;;  %v8930_v61 = vld [vmem:[%s11793_s1 + $0x1240] ss:$40 sps:$4 sm:$0xff]   ;;  %v8935_v63 = vld [vmem:[%s11793_s1 + $0xcf4] ss:$40 sps:$4 sm:$0xff]  }
 0x254   : > { %v8936_v6 = vld [vmem:[%s11793_s1 + $0x11f0] ss:$40 sps:$4 sm:$0xff]   ;;  %v8941_v26 = vld [vmem:[%s11793_s1 + $0xca4] ss:$40 sps:$4 sm:$0xff]  }
 0x255   : > { %4930 = vmatpush1.bf16.msra.mxu0 %v8861_v1  ;;  %v8938_v1 = vld [vmem:[%s11793_s1 + $0x11f4] ss:$40 sps:$4 sm:$0xff]  }
 0x256   : > { %4971 = vmatpush1.bf16.msra.mxu1 %v8864_v4  ;;  %4931 = vmatprep.subr.bf16.mxu0 %v8869_v37  ;;  %v8933_v4 = vld [vmem:[%s11793_s1 + $0xcf0] ss:$40 sps:$4 sm:$0xff]   ;;  %v8944_v37 = vld [vmem:[%s11793_s1 + $0x11a4] ss:$40 sps:$4 sm:$0xff]  }
 0x257   : > { %4972 = vmatprep.subr.bf16.mxu1 %v8872_v40  ;;  %v8939_v40 = vld [vmem:[%s11793_s1 + $0xca0] ss:$40 sps:$4 sm:$0xff]  }
 0x259   : > { %4932 = vmatpush1.bf16.msra.mxu0 %v8867_v10  ;;  %v8942_v10 = vld [vmem:[%s11793_s1 + $0x11a0] ss:$40 sps:$4 sm:$0xff]  }
 0x25a   : > { %4973 = vmatpush1.bf16.msra.mxu1 %v8870_v11  ;;  %4933 = vmatprep.subr.bf16.mxu0 %v8875_v12  ;;  %v5817_v11 = vmax.f32 %v10080_v35, 0.0  ;;  %v11069_v12 = vand.u32 127, %v937_v28 }
 0x25b   : > { %4974 = vmatprep.subr.bf16.mxu1 %v8878_v13  ;;  %v5019_v13 = vadd.s32 4294967295, %v9811_v33 }
 0x25d   : > { %4934 = vmatpush1.bf16.msra.mxu0 %v8873_v14  ;;  %v5011_v14 = vadd.s32 1, %v9811_v33  ;;  %vm5020_vm0 = vcmp.eq.s32.totalorder %v11069_v12, %v5019_v13 }
 0x25e   : > { %4975 = vmatpush1.bf16.msra.mxu1 %v8876_v15  ;;  %4935 = vmatprep.subr.bf16.mxu0 %v8881_v16  ;;  %v5816_v15 = vmax.f32 %v10069_v29, 0.0 }
 0x25f   : > { %4976 = vmatprep.subr.bf16.mxu1 %v8884_v17  ;;  %vm5012_vm1 = vcmp.eq.s32.totalorder %v11069_v12, %v5011_v14  ;;  %v934_v14 = vld [vmem:[%s11794_s2 + $0x8] sm:$0x3] }
 0x261   : > { %4936 = vmatpush1.bf16.msra.mxu0 %v8879_v18 }
 0x262   : > { %4977 = vmatpush1.bf16.msra.mxu1 %v8882_v50  ;;  %4937 = vmatprep.subr.bf16.mxu0 %v8887_v19  ;;  %v8955_v50 = vmov 0.0  }
 0x263   : > { %4978 = vmatprep.subr.bf16.mxu1 %v8890_v23  ;;  %v7775_v19 = vsel %vm5020_vm0, 1.0, %v8955_v50  ;;  %v11086_v23 = vsel %vm5012_vm1, 1.0, %v8955_v50 }
 0x265   : > { %4938 = vmatpush1.bf16.msra.mxu0 %v8885_v24 }
 0x266   : > { %4979 = vmatpush1.bf16.msra.mxu1 %v8888_v25  ;;  %4939 = vmatprep.subr.bf16.mxu0 %v8893_v27  ;;  %v5254_v27 = vadd.s32 4294967294, %v9811_v33 }
 0x267   : > { %4980 = vmatprep.subr.bf16.mxu1 %v8896_v30  ;;  %v5332_v30 = vadd.s32 2, %v9811_v33 }
 0x268   : > { %vm5255_vm3 = vcmp.eq.s32.totalorder %v11069_v12, %v5254_v27 }
 0x269   : > { %4940 = vmatpush1.bf16.msra.mxu0 %v8891_v62  ;;  %v7778_v62 = vsel %vm5255_vm3, 1.0, %v8955_v50  ;;  %vm5333_vm4 = vcmp.eq.s32.totalorder %v11069_v12, %v5332_v30 }
 0x26a   : > { %4981 = vmatpush1.bf16.msra.mxu1 %v8894_v31  ;;  %4941 = vmatprep.subr.bf16.mxu0 %v8899_v49  ;;  %v7780_v31 = vsel %vm5333_vm4, 1.0, %v8955_v50  ;;  %v11112_v49 = vsub.s32 6, %v9811_v33 }
 0x26b   : > { %4982 = vmatprep.subr.bf16.mxu1 %v8902_v52  ;;  %v967_v52 = vsub.s32 7, %v9811_v33 }
 0x26d   : > { %4942 = vmatpush2.bf16.msra.mxu0 %v8897_v32  ;;  %v8946_v32 = vld [vmem:[%s11794_s2] sm:$0xff] }
 0x26e   : > { %4983 = vmatpush2.bf16.msra.mxu1 %v8900_v34  ;;  %4943 = vmatprep.subr.bf16.mxu0 %v8905_v36  ;;  %v964_v34 = vrot.slane %v8946_v32, %v11112_v49  ;;  %v968_v36 = vrot.slane %v8946_v32, %v967_v52 }
 0x26f   : > { %4984 = vmatprep.subr.bf16.mxu1 %v8908_v3 }
 0x271   : > { %4944 = vmatpush2.bf16.msra.mxu0 %v8903_v38 }
 0x272   : > { %4985 = vmatpush2.bf16.msra.mxu1 %v8906_v2  ;;  %4945 = vmatprep.subr.bf16.mxu0 %v8911_v43  ;;  %v5492_v2 = vadd.s32 4294967293, %v9811_v33 }
 0x273   : > { %4986 = vmatprep.subr.bf16.mxu1 %v8914_v45 }
 0x274   : > { %vm5493_vm5 = vcmp.eq.s32.totalorder %v11069_v12, %v5492_v2 }
 0x275   : > { %4946 = vmatpush2.bf16.msra.mxu0 %v8909_v46 }
 0x276   : > { %4987 = vmatpush2.bf16.msra.mxu1 %v8912_v48  ;;  %4947 = vmatprep.subr.bf16.mxu0 %v8917_v51 }
 0x277   : > { %4988 = vmatprep.subr.bf16.mxu1 %v8920_v53 }
 0x279   : > { %4948 = vmatpush2.bf16.msra.mxu0 %v8915_v7 }
 0x27a   : > { %4989 = vmatpush2.bf16.msra.mxu1 %v8918_v54  ;;  %4949 = vmatprep.subr.bf16.mxu0 %v8923_v55  ;;  %v5570_v55 = vadd.s32 3, %v9811_v33 }
 0x27b   : > { %4990 = vmatprep.subr.bf16.mxu1 %v8926_v56 }
 0x27c   : > { %vm5571_vm6 = vcmp.eq.s32.totalorder %v11069_v12, %v5570_v55  ;;  %v5252_v55 = vld [vmem:[%s11795_s3 + $0x8] sm:$0x77] }
 0x27d   : > { %4950 = vmatpush2.bf16.msra.mxu0 %v8921_v57 }
 0x27e   : > { %4991 = vmatpush2.bf16.msra.mxu1 %v8924_v58  ;;  %4951 = vmatprep.subr.bf16.mxu0 %v8929_v8 }
 0x27f   : > { %4992 = vmatprep.subr.bf16.mxu1 %v8932_v9 }
 0x281   : > { %4952 = vmatpush2.bf16.msra.mxu0 %v8927_v59 }
 0x282   : > { %4993 = vmatpush2.bf16.msra.mxu1 %v8930_v61  ;;  %4953 = vmatprep.subr.bf16.mxu0 %v8935_v63  ;;  %v7782_v61 = vsel %vm5493_vm5, 1.0, %v8955_v50  ;;  %v7784_v63 = vsel %vm5571_vm6, 1.0, %v8955_v50 }
 0x283   : > { %4994 = vmatprep.subr.bf16.mxu1 %v8938_v1 }
 0x285   : > { %4954 = vmatpush2.bf16.msra.mxu0 %v8933_v4 }
 0x286   : > { %4995 = vmatpush2.bf16.msra.mxu1 %v8936_v6  ;;  %4955 = vmatprep.subr.bf16.mxu0 %v8941_v26 }
 0x287   : > { %4996 = vmatprep.subr.bf16.mxu1 %v8944_v37 }
 0x289   : > { %4956 = vmatpush2.bf16.msra.mxu0 %v8939_v40 }
 0x28a   : > { %4997 = vmatpush2.bf16.msra.mxu1 %v8942_v10  ;;  %5057 = vmatprep.subr.mxu0 %v10488_v47 }
 0x28b   : > { %5856 = vmatprep.subr.mxu1 %v5817_v11 }
 0x28c   : > { %v4713_v16 = vpop.f32.mrf.mxu0  ;;  %4958 = vmatmul.mubr.bf16.vlgmr.msra.gmra.mxu0 %v9432_v20 }
 0x28d   : > { %v4754_v17 = vpop.f32.mrf.mxu1  ;;  %4999 = vmatmul.mubr.bf16.vlgmr.msra.gmra.mxu1 %v9434_v21  ;;  %5058 = vmatpush1.msra.mxu0 %v10483_v39  ;;  %v4714_v3 = vadd.f32 %v4713_v16, %v964_v34  ;;  %v972_v16 = vrot.slane %v934_v14, %v9829_v41 }
 0x28e   : > { %5857 = vmatpush1.msra.mxu1 %v5816_v15  ;;  %v4715_v18 = vpop.f32.mrf.mxu0  ;;  %5131 = vmatprep.subr.mxu0 %v10488_v47 }
 0x28f   : > { %v4756_v28 = vpop.f32.mrf.mxu1  ;;  %5091 = vmatprep.mubr.f32.mxu0 %v8955_v50  ;;  %5890 = vmatprep.mubr.f32.mxu1 %v8955_v50  ;;  %v4716_v38 = vadd.f32 %v4715_v18, %v968_v36  ;;  %v4755_v43 = vadd.f32 %v4754_v17, %v4714_v3  ;;  %v976_v17 = vrot.slane %v934_v14, %v9838_v44 }
 0x290   : > { %v4717_v20 = vpop.f32.mrf.mxu0  ;;  %v5438_v14 = vrot.slane %v5252_v55, %v10670_v5 }
 0x291   : > { %v4758_v21 = vpop.f32.mrf.mxu1  ;;  %v4757_v48 = vadd.f32 %v4756_v28, %v4716_v38 }
 0x292   : > { %v4718_v24 = vpop.f32.mrf.mxu0 }
 0x293   : > { %v4759_v25 = vpop.f32.mrf.mxu1  ;;  %v5017_v24 = vld [vmem:[%s11795_s3] sm:$0x77] }
 0x294   : > { %7776 = vmatmul.mubr.msk.f32.vlgmr.msra.gmra.mxu0 %vm5023_vm2, %v7775_v19  ;;  %v5176_v27 = vrot.slane %v5017_v24, %v9829_v41  ;;  %v5196_v32 = vrot.slane %v5017_v24, %v9838_v44  ;;  %v5180_v34 = vrot.slane %v5017_v24, %v10653_v60  ;;  %v5200_v38 = vrot.slane %v5017_v24, %v10670_v5 }
 0x295   : > { %7787 = vmatmul.mubr.msk.f32.vlgmr.msra.gmra.mxu1 %vm5023_vm2, %v11086_v23  ;;  %5132 = vmatpush1.msra.mxu0 %v10483_v39 }
 0x296   : > { %5165 = vmatprep.mubr.f32.mxu0 %v8955_v50  ;;  %5291 = vmatprep.subr.mxu0 %v10900_v0 }
 0x297   : > { %6032 = vmatprep.mubr.f32.mxu1 %v8955_v50 }
 0x298   : > { %7777 = vmatmul.mubr.msk.f32.vlgmr.msra.gmra.mxu0 %vm5023_vm2, %v11086_v23 }
 0x299   : > { %5292 = vmatpush1.msra.mxu0 %v10895_v22  ;;  %5325 = vmatprep.mubr.f32.mxu0 %v8955_v50 }
 0x29a   : > { %5369 = vmatprep.subr.mxu0 %v10900_v0 }
 0x29c   : > { %7779 = vmatmul.mubr.msk.f32.vlgmr.msra.gmra.mxu0 %vm5023_vm2, %v7778_v62 }
 0x29d   : > { %5370 = vmatpush1.msra.mxu0 %v10895_v22  ;;  %5403 = vmatprep.mubr.f32.mxu0 %v8955_v50 }
 0x2a0   : > { %7781 = vmatmul.mubr.msk.f32.vlgmr.msra.gmra.mxu0 %vm5023_vm2, %v7780_v31 }
 0x2a1   : > { %5563 = vmatprep.mubr.f32.mxu0 %v8955_v50 }
 0x2cc   : > { %v4795_v45 = vpop.f32.mrf.mxu0 }
 0x2cd   : > { %v4836_v46 = vpop.f32.mrf.mxu1  ;;  %v4796_v51 = vadd.f32 %v4795_v45, %v4755_v43  ;;  %v5186_v43 = vrot.slane %v5176_v27, %v9829_v41  ;;  %v5218_v45 = vrot.slane %v5017_v24, %v10239_v42 }
 0x2ce   : > { %v4797_v53 = vpop.f32.mrf.mxu0 }
 0x2cf   : > { %v4838_v7 = vpop.f32.mrf.mxu1  ;;  %v4798_v54 = vadd.f32 %v4797_v53, %v4757_v48  ;;  %v11124_v8 = vadd.f32 %v4836_v46, %v4796_v51  ;;  %v5206_v53 = vrot.slane %v5196_v32, %v9838_v44  ;;  %v5448_v32 = vrot.slane %v5438_v14, %v9838_v44 }
 0x2d0   : > { %v4799_v56 = vpop.f32.mrf.mxu0 }
 0x2d1   : > { %v4840_v57 = vpop.f32.mrf.mxu1  ;;  %v11122_v58 = vadd.f32 %v4838_v7, %v4798_v54  ;;  %v5190_v7 = vrot.slane %v5180_v34, %v9829_v41  ;;  %v5222_v54 = vrot.slane %v5017_v24, %v11112_v49 }
 0x2d2   : > { %v4800_v9 = vpop.f32.mrf.mxu0  ;;  %v5210_v57 = vrot.slane %v5200_v38, %v9838_v44 }
 0x2d3   : > { %v4841_v59 = vpop.f32.mrf.mxu1  ;;  %5529 = vmatprep.subr.mxu0 %v11122_v58 }
 0x2d4   : > { %5530 = vmatpush1.msra.mxu0 %v11124_v8  ;;  %v5228_v59 = vrot.slane %v5218_v45, %v10239_v42  ;;  %v5253_v45 = vld [vmem:[%s11796_s4 + $0x2] sm:$0x3] }
 0x2d5   : > { %7783 = vmatmul.mubr.msk.f32.vlgmr.msra.gmra.mxu0 %vm5023_vm2, %v7782_v61  ;;  %5607 = vmatprep.subr.mxu0 %v11122_v58  ;;  %v5414_v61 = vrot.slane %v5252_v55, %v9829_v41 }
 0x2d6   : > { %5608 = vmatpush1.msra.mxu0 %v11124_v8  ;;  %5641 = vmatprep.mubr.f32.mxu0 %v8955_v50 }
 0x2d9   : > { %7785 = vmatmul.mubr.msk.f32.vlgmr.msra.gmra.mxu0 %vm5023_vm2, %v7784_v63 }
 0x2da   : > { %5792 = vmatprep.mubr.f32.mxu0 %v8955_v50 }
 0x30c   : > { %v4877_v1 = vpop.f32.mrf.mxu0 }
 0x30d   : > { %v4918_v4 = vpop.f32.mrf.mxu1  ;;  %v4878_v18 = vadd.f32 %v4877_v1, %v972_v16  ;;  %v5434_v1 = vrot.slane %v5252_v55, %v9838_v44 }
 0x30e   : > { %v4879_v6 = vpop.f32.mrf.mxu0 }
 0x30f   : > { %v4920_v26 = vpop.f32.mrf.mxu1  ;;  %v4880_v28 = vadd.f32 %v4879_v6, %v976_v17  ;;  %v4919_v20 = vadd.f32 %v4918_v4, %v4878_v18  ;;  %v5418_v4 = vrot.slane %v5252_v55, %v10653_v60  ;;  %v5211_v6 = vmul.f32 %v5206_v53, %v10483_v39 }
 0x310   : > { %v4881_v37 = vpop.f32.mrf.mxu0  ;;  %v5424_v18 = vrot.slane %v5414_v61, %v9829_v41 }
 0x311   : > { %v4922_v40 = vpop.f32.mrf.mxu1  ;;  %v4921_v25 = vadd.f32 %v4920_v26, %v4880_v28  ;;  %v5018_v37 = vld [vmem:[%s11796_s4] sm:$0x3]  ;;  %v5456_v28 = vrot.slane %v5252_v55, %v10239_v42 }
 0x312   : > { %v4882_v10 = vpop.f32.mrf.mxu0  ;;  %v5232_v40 = vrot.slane %v5222_v54, %v10239_v42  ;;  %v5241_v39 = vrot.slane %v5018_v37, %v9829_v41  ;;  %v5245_v24 = vrot.slane %v5018_v37, %v9838_v44  ;;  %v5450_v54 = vmul.f32 %v5448_v32, %v10900_v0 }
 0x313   : > { %v4923_v13 = vpop.f32.mrf.mxu1  ;;  %v5212_v10 = vmul.f32 %v5210_v57, %v10488_v47  ;;  %v5466_v34 = vrot.slane %v5456_v28, %v10239_v42 }
 0x34c   : > { %v4959_v21 = vpop.f32.mrf.mxu0 }
 0x34d   : > { %v5000_v19 = vpop.f32.mrf.mxu1  ;;  %v4960_v30 = vadd.f32 %v4959_v21, %v4919_v20  ;;  %v5444_v21 = vrot.slane %v5434_v1, %v9838_v44  ;;  %v5483_v1 = vrot.slane %v5253_v45, %v9838_v44 }
 0x34e   : > { %v4961_v62 = vpop.f32.mrf.mxu0 }
 0x34f   : > { %v5002_v31 = vpop.f32.mrf.mxu1  ;;  %v4962_v52 = vadd.f32 %v4961_v62, %v4921_v25  ;;  %v11153_v46 = vadd.f32 %v5000_v19, %v4960_v30  ;;  %v5428_v19 = vrot.slane %v5418_v4, %v9829_v41  ;;  %v5460_v30 = vrot.slane %v5252_v55, %v11112_v49 }
 0x350   : > { %v4963_v36 = vpop.f32.mrf.mxu0  ;;  %v5449_v38 = vmul.f32 %v5444_v21, %v10895_v22  ;;  %v5479_v22 = vrot.slane %v5253_v45, %v9829_v41 }
 0x351   : > { %v5004_v3 = vpop.f32.mrf.mxu1  ;;  %v11149_v2 = vadd.f32 %v5002_v31, %v4962_v52 }
 0x352   : > { %v4964_v48 = vpop.f32.mrf.mxu0 }
 0x353   : > { %v5005_v51 = vpop.f32.mrf.mxu1  ;;  %5758 = vmatprep.subr.mxu0 %v11149_v2  ;;  %v5470_v48 = vrot.slane %v5460_v30, %v10239_v42 }
 0x354   : > { %v5093_v56 = vpop.f32.mrf.mxu0  ;;  %5759 = vmatpush1.msra.mxu0 %v11153_v46 }
 0x355   : > { %v5191_v9 = vmul.f32 %v5186_v43, %v5093_v56  ;;  %7786 = vmatmul.mubr.msk.f32.vlgmr.msra.gmra.mxu0 %vm5023_vm2, %v11086_v23  ;;  %v5892_v45 = vpop.f32.mrf.mxu1 }
 0x356   : > { %v5095_v63 = vpop.f32.mrf.mxu0  ;;  %5961 = vmatprep.mubr.f32.mxu0 %v8955_v50 }
 0x357   : > { %v5192_v26 = vmul.f32 %v5190_v7, %v5095_v63  ;;  %v5213_v16 = vadd.f32 %v5211_v6, %v5191_v9 }
 0x358   : > { %v5167_v13 = vpop.f32.mrf.mxu0 }
 0x359   : > { %v5233_v17 = vmul.f32 %v5228_v59, %v5167_v13  ;;  %v5214_v25 = vadd.f32 %v5212_v10, %v5192_v26 }
 0x35a   : > { %v5169_v20 = vpop.f32.mrf.mxu0 }
 0x35b   : > { %v5235_v47 = vadd.f32 %v5233_v17, %v5213_v16  ;;  %v5234_v27 = vmul.f32 %v5232_v40, %v5169_v20  ;;  %v5490_v40 = vld [vmem:[%s11795_s3 + $0x10] sm:$0x77] }
 0x35c   : > { %v5327_v62 = vpop.f32.mrf.mxu0  ;;  %v5652_v10 = vrot.slane %v5490_v40, %v9829_v41  ;;  %v5672_v13 = vrot.slane %v5490_v40, %v9838_v44  ;;  %v5656_v14 = vrot.slane %v5490_v40, %v10653_v60  ;;  %v5676_v17 = vrot.slane %v5490_v40, %v10670_v5  ;;  %v5491_v5 = vld [vmem:[%s11796_s4 + $0x4] sm:$0x3] }
 0x35d   : > { %v5236_v31 = vadd.f32 %v5234_v27, %v5214_v25  ;;  %v5429_v52 = vmul.f32 %v5424_v18, %v5327_v62  ;;  %v11187_v36 = vadd.f32 %v5241_v39, %v5235_v47  ;;  %v5694_v18 = vrot.slane %v5490_v40, %v10239_v42 }
 0x35e   : > { %v5329_v3 = vpop.f32.mrf.mxu0  ;;  %v5662_v16 = vrot.slane %v5652_v10, %v9829_v41  ;;  %v5682_v28 = vrot.slane %v5672_v13, %v9838_v44  ;;  %v5666_v39 = vrot.slane %v5656_v14, %v9829_v41  ;;  %v5698_v20 = vrot.slane %v5490_v40, %v11112_v49  ;;  %v6586_v13 = vld [vmem:[%s11797_s5 + $0xf8] sm:$0xff]  ;;  %v6583_v14 = vld [vmem:[%s11797_s5 + $0xe0] sm:$0xff] }
 0x35f   : > { %v5430_v43 = vmul.f32 %v5428_v19, %v5329_v3  ;;  %v11194_v51 = vadd.f32 %v5245_v24, %v5236_v31  ;;  %v5451_v7 = vadd.f32 %v5449_v38, %v5429_v52  ;;  %v5818_v57 = vmax.f32 %v11187_v36, 0.0 }
 0x360   : > { %v5405_v53 = vpop.f32.mrf.mxu0  ;;  %v5686_v24 = vrot.slane %v5676_v17, %v9838_v44  ;;  %v5704_v25 = vrot.slane %v5694_v18, %v10239_v42  ;;  %v5687_v60 = vmul.f32 %v5682_v28, %v11124_v8  ;;  %v5708_v30 = vrot.slane %v5698_v20, %v10239_v42  ;;  %v6582_v17 = vld [vmem:[%s11797_s5 + $0xd8] sm:$0xff]  ;;  %v6581_v28 = vld [vmem:[%s11797_s5 + $0xd0] sm:$0xff]  ;;  %v6580_v20 = vld [vmem:[%s11797_s5 + $0xc8] sm:$0xff] }
 0x361   : > { %v5471_v55 = vmul.f32 %v5466_v34, %v5405_v53  ;;  %v5819_v56 = vmax.f32 %v11194_v51, 0.0  ;;  %v5452_v59 = vadd.f32 %v5450_v54, %v5430_v43  ;;  %v5717_v32 = vrot.slane %v5491_v5, %v9829_v41  ;;  %v5894_v54 = vpop.f32.mrf.mxu1  ;;  %v6566_v18 = vld [vmem:[%s11797_s5 + $0x58] sm:$0xff] }
 0x362   : > { %v5407_v9 = vpop.f32.mrf.mxu0  ;;  %v5688_v49 = vmul.f32 %v5686_v24, %v11122_v58  ;;  %v5721_v8 = vrot.slane %v5491_v5, %v9838_v44  ;;  %v6181_v41 = vmax.f32 %v5816_v15, %v5892_v45  ;;  %v6191_v44 = vmul.u32 2, %v9811_v33  ;;  %v6563_v24 = vld [vmem:[%s11797_s5 + $0x40] sm:$0xff]  ;;  %v6576_v5 = vld [vmem:[%s11797_s5 + $0xa8] sm:$0xff] }
 0x363   : > { %v5473_v61 = vadd.f32 %v5471_v55, %v5451_v7  ;;  %v5472_v63 = vmul.f32 %v5470_v48, %v5407_v9  ;;  %5927 = vmatprep.subr.mxu0 %v5819_v56  ;;  %v6571_v45 = vld [vmem:[%s11797_s5 + $0x80] sm:$0xff] }
 0x364   : > { %5928 = vmatpush1.msra.mxu0 %v5818_v57  ;;  %v6193_v58 = vadd.s32 2, %v6191_v44  ;;  %vm6192_vm7 = vcmp.eq.s32.totalorder %v11069_v12, %v6191_v44  ;;  %v6631_v44 = vld [vmem:[%s11797_s5 + $0x260] sm:$0xff] }
 0x365   : > { %v5474_v0 = vadd.f32 %v5472_v63, %v5452_v59  ;;  %7788 = vmatmul.mubr.msk.f32.vlgmr.msra.gmra.mxu0 %vm5023_vm2, %v11086_v23  ;;  %v11207_v4 = vadd.f32 %v5479_v22, %v5473_v61  ;;  %v6182_v22 = vmax.f32 %v5817_v11, %v5894_v54  ;;  %v6649_v54 = vld [vmem:[%s11797_s5 + $0x2f0] sm:$0xff] }
 0x366   : > { %6103 = vmatprep.mubr.f32.mxu0 %v8955_v50  ;;  %vm6194_vm8 = vcmp.eq.s32.totalorder %v11069_v12, %v6193_v58  ;;  %v6646_v58 = vld [vmem:[%s11797_s5 + $0x2d8] sm:$0xff] }
 0x367   : > { %v11210_v6 = vadd.f32 %v5483_v1, %v5474_v0  ;;  %v5820_v37 = vmax.f32 %v11207_v4, 0.0  ;;  %vm6195_vm9 = vmor %vm6192_vm7, %vm6194_vm8  ;;  %v6570_v4 = vld [vmem:[%s11797_s5 + $0x78] sm:$0xff] }
 0x368   : > { %v11254_v35 = vsel %vm6195_vm9, 0.5, %v8955_v50 }
 0x369   : > { %v5821_v26 = vmax.f32 %v11210_v6, 0.0  ;;  %v6585_v6 = vld [vmem:[%s11797_s5 + $0xf0] sm:$0xff] }
 0x36b   : > { %5998 = vmatprep.subr.mxu1 %v5821_v26 }
 0x36c   : > { %5999 = vmatpush1.msra.mxu1 %v5820_v37 }
 0x36d   : > { %7789 = vmatmul.mubr.msk.f32.vlgmr.msra.gmra.mxu1 %vm5023_vm2, %v11086_v23 }
 0x36e   : > { %6174 = vmatprep.mubr.f32.mxu1 %v8955_v50 }
 0x395   : > { %v5565_v21 = vpop.f32.mrf.mxu0 }
 0x396   : > { %v5667_v19 = vmul.f32 %v5662_v16, %v5565_v21  ;;  %v6567_v16 = vld [vmem:[%s11797_s5 + $0x60] sm:$0xff]  ;;  %v6564_v21 = vld [vmem:[%s11797_s5 + $0x48] sm:$0xff] }
 0x397   : > { %v5567_v47 = vpop.f32.mrf.mxu0 }
 0x398   : > { %v5668_v27 = vmul.f32 %v5666_v39, %v5567_v47  ;;  %v5689_v31 = vadd.f32 %v5687_v60, %v5667_v19  ;;  %v6565_v39 = vld [vmem:[%s11797_s5 + $0x50] sm:$0xff]  ;;  %v6579_v19 = vld [vmem:[%s11797_s5 + $0xc0] sm:$0xff]  ;;  %v6562_v47 = vld [vmem:[%s11797_s5 + $0x38] sm:$0xff] }
 0x399   : > { %v5643_v62 = vpop.f32.mrf.mxu0  ;;  %v6577_v60 = vld [vmem:[%s11797_s5 + $0xb0] sm:$0xff] }
 0x39a   : > { %v5709_v52 = vmul.f32 %v5704_v25, %v5643_v62  ;;  %v5690_v3 = vadd.f32 %v5688_v49, %v5668_v27  ;;  %v6578_v25 = vld [vmem:[%s11797_s5 + $0xb8] sm:$0xff]  ;;  %v6561_v27 = vld [vmem:[%s11797_s5 + $0x30] sm:$0xff]  ;;  %v6575_v62 = vld [vmem:[%s11797_s5 + $0xa0] sm:$0xff] }
 0x39b   : > { %v5645_v34 = vpop.f32.mrf.mxu0  ;;  %v6559_v49 = vld [vmem:[%s11797_s5 + $0x20] sm:$0xff] }
 0x39c   : > { %v5711_v38 = vadd.f32 %v5709_v52, %v5689_v31  ;;  %v5710_v43 = vmul.f32 %v5708_v30, %v5645_v34  ;;  %v6560_v30 = vld [vmem:[%s11797_s5 + $0x28] sm:$0xff]  ;;  %v6574_v52 = vld [vmem:[%s11797_s5 + $0x98] sm:$0xff] }
 0x39d   : > { %v6558_v34 = vld [vmem:[%s11797_s5 + $0x18] sm:$0xff] }
 0x39e   : > { %v5712_v48 = vadd.f32 %v5710_v43, %v5690_v3  ;;  %v5724_v53 = vadd.f32 %v5717_v32, %v5711_v38  ;;  %v6573_v3 = vld [vmem:[%s11797_s5 + $0x90] sm:$0xff]  ;;  %v6572_v43 = vld [vmem:[%s11797_s5 + $0x88] sm:$0xff] }
 0x39f   : > { %v6557_v38 = vld [vmem:[%s11797_s5 + $0x10] sm:$0xff] }
 0x3a0   : > { %v5725_v7 = vadd.f32 %v5721_v8, %v5712_v48  ;;  %v5822_v42 = vmax.f32 %v5724_v53, 0.0  ;;  %v6556_v8 = vld [vmem:[%s11797_s5 + $0x8] sm:$0xff]  ;;  %v6555_v48 = vld [vmem:[%s11797_s5] sm:$0xff]  ;;  %v6650_v53 = vld [vmem:[%s11797_s5 + $0x2f8] sm:$0xff] }
 0x3a2   : > { %v5823_v55 = vmax.f32 %v5725_v7, 0.0  ;;  %v6634_v7 = vld [vmem:[%s11797_s5 + $0x278] sm:$0xff] }
 0x3a4   : > { %6069 = vmatprep.subr.mxu0 %v5823_v55 }
 0x3a5   : > { %6070 = vmatpush1.msra.mxu0 %v5822_v42 }
 0x3a6   : > { %7790 = vmatmul.mubr.msk.f32.vlgmr.msra.gmra.mxu0 %vm5023_vm2, %v11086_v23  ;;  %6230 = vmatprep.subr.mxu0 %v6182_v22  ;;  %v6632_v22 = vld [vmem:[%s11797_s5 + $0x268] sm:$0xff] }
 0x3a7   : > { %6231 = vmatpush1.msra.mxu0 %v6181_v41  ;;  %6264 = vmatprep.mubr.f32.mxu0 %v8955_v50  ;;  %v6647_v41 = vld [vmem:[%s11797_s5 + $0x2e0] sm:$0xff] }
 0x3aa   : > { %7792 = vmatmul.mubr.msk.f32.vlgmr.msra.gmra.mxu0 %vm5023_vm2, %v11254_v35 }
 0x3ab   : > { %6406 = vmatprep.mubr.f32.mxu0 %v8955_v50 }
 0x415   : > { %v5794_v29 = vpop.f32.mrf.mxu0 }
 0x416   : > { %v5800_v11 = vmax.f32 %v11153_v46, %v5794_v29  ;;  %v6630_v29 = vld [vmem:[%s11797_s5 + $0x258] sm:$0xff] }
 0x417   : > { %v5796_v15 = vpop.f32.mrf.mxu0 }
 0x418   : > { %v5801_v9 = vmax.f32 %v11149_v2, %v5796_v15  ;;  %v11263_v59 = vsel %vm5799_vm10, %v5800_v11, %v11153_v46  ;;  %v6645_v11 = vld [vmem:[%s11797_s5 + $0x2d0] sm:$0xff] }
 0x419   : > { %v5824_v63 = vmax.f32 %v11263_v59, 0.0  ;;  %v6629_v15 = vld [vmem:[%s11797_s5 + $0x250] sm:$0xff] }
 0x41a   : > { %v11266_v12 = vsel %vm5799_vm10, %v5801_v9, %v11149_v2  ;;  %v6644_v9 = vld [vmem:[%s11797_s5 + $0x2c8] sm:$0xff]  ;;  %v6601_v59 = vld [vmem:[%s11797_s5 + $0x170] sm:$0xff] }
 0x41b   : > { %v5825_v61 = vmax.f32 %v11266_v12, 0.0  ;;  %v6616_v12 = vld [vmem:[%s11797_s5 + $0x1e8] sm:$0xff] }
 0x41d   : > { %6140 = vmatprep.subr.mxu1 %v5825_v61 }
 0x41e   : > { %6141 = vmatpush1.msra.mxu1 %v5824_v63 }
 0x41f   : > { %7791 = vmatmul.mubr.msk.f32.vlgmr.msra.gmra.mxu1 %vm5023_vm2, %v11086_v23 }
 0x420   : > { %6335 = vmatprep.mubr.f32.mxu1 %v8955_v50 }
 0x425   : > { %v5963_v33 = vpop.f32.mrf.mxu0 }
 0x426   : > { %v6183_v1 = vmax.f32 %v5818_v57, %v5963_v33  ;;  %v6628_v33 = vld [vmem:[%s11797_s5 + $0x248] sm:$0xff] }
 0x427   : > { %v5965_v46 = vpop.f32.mrf.mxu0 }
 0x428   : > { %v6184_v2 = vmax.f32 %v5819_v56, %v5965_v46  ;;  %v6643_v46 = vld [vmem:[%s11797_s5 + $0x2c0] sm:$0xff] }
 0x42a   : > { %6301 = vmatprep.subr.mxu1 %v6184_v2  ;;  %v6627_v2 = vld [vmem:[%s11797_s5 + $0x240] sm:$0xff] }
 0x42b   : > { %6302 = vmatpush1.msra.mxu1 %v6183_v1  ;;  %v6642_v1 = vld [vmem:[%s11797_s5 + $0x2b8] sm:$0xff] }
 0x42c   : > { %7793 = vmatmul.mubr.msk.f32.vlgmr.msra.gmra.mxu1 %vm5023_vm2, %v11254_v35 }
 0x42d   : > { %v6034_v0 = vpop.f32.mrf.mxu1  ;;  %6477 = vmatprep.mubr.f32.mxu1 %v8955_v50 }
 0x42e   : > { %v6185_v10 = vmax.f32 %v5820_v37, %v6034_v0  ;;  %v6568_v37 = vld [vmem:[%s11797_s5 + $0x68] sm:$0xff]  ;;  %v6626_v0 = vld [vmem:[%s11797_s5 + $0x238] sm:$0xff] }
 0x42f   : > { %v6036_v40 = vpop.f32.mrf.mxu1 }
 0x430   : > { %v6186_v23 = vmax.f32 %v5821_v26, %v6036_v40  ;;  %v6584_v26 = vld [vmem:[%s11797_s5 + $0xe8] sm:$0xff]  ;;  %v6641_v40 = vld [vmem:[%s11797_s5 + $0x2b0] sm:$0xff] }
 0x432   : > { %6372 = vmatprep.subr.mxu0 %v6186_v23  ;;  %v6625_v23 = vld [vmem:[%s11797_s5 + $0x230] sm:$0xff] }
 0x433   : > { %6373 = vmatpush1.msra.mxu0 %v6185_v10  ;;  %v6640_v10 = vld [vmem:[%s11797_s5 + $0x2a8] sm:$0xff] }
 0x434   : > { %7794 = vmatmul.mubr.msk.f32.vlgmr.msra.gmra.mxu0 %vm5023_vm2, %v11254_v35 }
 0x435   : > { %6548 = vmatprep.mubr.f32.mxu0 %v8955_v50  ;;  %v6569_v50 = vld [vmem:[%s11797_s5 + $0x70] sm:$0xff] }
 0x466   : > { %v6105_v36 = vpop.f32.mrf.mxu0 }
 0x467   : > { %v6187_v57 = vmax.f32 %v5822_v42, %v6105_v36  ;;  %v6648_v42 = vld [vmem:[%s11797_s5 + $0x2e8] sm:$0xff] }
 0x468   : > { %v6107_v51 = vpop.f32.mrf.mxu0  ;;  %v6624_v36 = vld [vmem:[%s11797_s5 + $0x228] sm:$0xff] }
 0x469   : > { %v6188_v56 = vmax.f32 %v5823_v55, %v6107_v51  ;;  %v6633_v55 = vld [vmem:[%s11797_s5 + $0x270] sm:$0xff]  ;;  %v6639_v51 = vld [vmem:[%s11797_s5 + $0x2a0] sm:$0xff] }
 0x46a   : > { %v6266_v31 = vpop.f32.mrf.mxu0 }
 0x46b   : > { %6443 = vmatprep.subr.mxu1 %v6188_v56  ;;  %v6623_v56 = vld [vmem:[%s11797_s5 + $0x220] sm:$0xff] }
 0x46c   : > { %6444 = vmatpush1.msra.mxu1 %v6187_v57  ;;  %v6268_v32 = vpop.f32.mrf.mxu0  ;;  %v6638_v57 = vld [vmem:[%s11797_s5 + $0x298] sm:$0xff] }
 0x46d   : > { %7795 = vmatmul.mubr.msk.f32.vlgmr.msra.gmra.mxu1 %vm5023_vm2, %v11254_v35  ;;  %7801 = vmatprep.subr.mxu1 %v6586_v13  ;;  %v6622_v13 = vld [vmem:[%s11797_s5 + $0x218] sm:$0xff] }
 0x46e   : > { %7802 = vmatpush3.msra.mxu1 %v6570_v4  ;;  %6786 = vmatprep.mubr.f32.mxu1 %v6268_v32  ;;  %v6637_v4 = vld [vmem:[%s11797_s5 + $0x290] sm:$0xff]  ;;  %v6594_v32 = vld [vmem:[%s11797_s5 + $0x138] sm:$0xff] }
 0x46f   : > { %7803 = vmatprep.subr.mxu1 %v6585_v6  ;;  %v6621_v6 = vld [vmem:[%s11797_s5 + $0x210] sm:$0xff] }
 0x470   : > { %7804 = vmatpush3.msra.mxu1 %v6569_v50  ;;  %v6636_v50 = vld [vmem:[%s11797_s5 + $0x288] sm:$0xff] }
 0x471   : > { %7805 = vmatprep.subr.mxu1 %v6584_v26  ;;  %v6620_v26 = vld [vmem:[%s11797_s5 + $0x208] sm:$0xff] }
 0x472   : > { %7806 = vmatpush3.msra.mxu1 %v6568_v37  ;;  %v6635_v37 = vld [vmem:[%s11797_s5 + $0x280] sm:$0xff] }
 0x473   : > { %7807 = vmatprep.subr.mxu1 %v6583_v14  ;;  %v6619_v14 = vld [vmem:[%s11797_s5 + $0x200] sm:$0xff] }
 0x474   : > { %7808 = vmatpush3.msra.mxu1 %v6567_v16  ;;  %v6714_v16 = vld [vmem:[%s11797_s5 + $0x4f8] sm:$0xff] }
 0x475   : > { %7809 = vmatprep.subr.mxu1 %v6582_v17 }
 0x476   : > { %7810 = vmatpush3.msra.mxu1 %v6566_v18 }
 0x477   : > { %7811 = vmatprep.subr.mxu1 %v6581_v28 }
 0x478   : > { %7812 = vmatpush3.msra.mxu1 %v6565_v39 }
 0x479   : > { %7813 = vmatprep.subr.mxu1 %v6580_v20  ;;  %v6618_v20 = vld [vmem:[%s11797_s5 + $0x1f8] sm:$0xff] }
 0x47a   : > { %7814 = vmatpush3.msra.mxu1 %v6564_v21  ;;  %v6602_v21 = vld [vmem:[%s11797_s5 + $0x178] sm:$0xff] }
 0x47b   : > { %7815 = vmatprep.subr.mxu1 %v6579_v19  ;;  %v6617_v19 = vld [vmem:[%s11797_s5 + $0x1f0] sm:$0xff] }
 0x47c   : > { %7816 = vmatpush3.msra.mxu1 %v6563_v24  ;;  %v6614_v24 = vld [vmem:[%s11797_s5 + $0x1d8] sm:$0xff] }
 0x47d   : > { %7817 = vmatprep.subr.mxu1 %v6578_v25  ;;  %v6598_v25 = vld [vmem:[%s11797_s5 + $0x158] sm:$0xff] }
 0x47e   : > { %7818 = vmatpush3.msra.mxu1 %v6562_v47 }
 0x47f   : > { %7819 = vmatprep.subr.mxu1 %v6577_v60  ;;  %v6613_v60 = vld [vmem:[%s11797_s5 + $0x1d0] sm:$0xff] }
 0x480   : > { %7820 = vmatpush3.msra.mxu1 %v6561_v27  ;;  %v6597_v27 = vld [vmem:[%s11797_s5 + $0x150] sm:$0xff] }
 0x481   : > { %7821 = vmatprep.subr.mxu1 %v6576_v5 }
 0x482   : > { %7822 = vmatpush3.msra.mxu1 %v6560_v30  ;;  %v6612_v30 = vld [vmem:[%s11797_s5 + $0x1c8] sm:$0xff] }
 0x483   : > { %7823 = vmatprep.subr.mxu1 %v6575_v62  ;;  %v6596_v62 = vld [vmem:[%s11797_s5 + $0x148] sm:$0xff] }
 0x484   : > { %7824 = vmatpush3.msra.mxu1 %v6559_v49  ;;  %v6595_v49 = vld [vmem:[%s11797_s5 + $0x140] sm:$0xff] }
 0x485   : > { %7825 = vmatprep.subr.mxu1 %v6574_v52  ;;  %v6610_v52 = vld [vmem:[%s11797_s5 + $0x1b8] sm:$0xff] }
 0x486   : > { %7826 = vmatpush3.msra.mxu1 %v6558_v34 }
 0x487   : > { %7827 = vmatprep.subr.mxu1 %v6573_v3  ;;  %v6609_v3 = vld [vmem:[%s11797_s5 + $0x1b0] sm:$0xff] }
 0x488   : > { %7828 = vmatpush3.msra.mxu1 %v6557_v38  ;;  %v6593_v38 = vld [vmem:[%s11797_s5 + $0x130] sm:$0xff] }
 0x489   : > { %7829 = vmatprep.subr.mxu1 %v6572_v43 }
 0x48a   : > { %7830 = vmatpush3.msra.mxu1 %v6556_v8  ;;  %v6698_v8 = vld [vmem:[%s11797_s5 + $0x478] sm:$0xff] }
 0x48b   : > { %7831 = vmatprep.subr.mxu1 %v6571_v45  ;;  %v6608_v45 = vld [vmem:[%s11797_s5 + $0x1a8] sm:$0xff] }
 0x48c   : > { %7832 = vmatpush3.msra.mxu1 %v6555_v48  ;;  %v6713_v48 = vld [vmem:[%s11797_s5 + $0x4f0] sm:$0xff] }
 0x48d   : > { %7871 = vmatprep.subr.mxu1 %v6650_v53  ;;  %6787 = vmatmul.mubr.f32.vlgmr.msra.gmra.mxu1 %v6266_v31  ;;  %v6611_v31 = vld [vmem:[%s11797_s5 + $0x1c0] sm:$0xff]  ;;  %v6592_v53 = vld [vmem:[%s11797_s5 + $0x128] sm:$0xff] }
 0x48e   : > { %7872 = vmatpush3.msra.mxu1 %v6634_v7  ;;  %v6697_v7 = vld [vmem:[%s11797_s5 + $0x470] sm:$0xff] }
 0x48f   : > { %7873 = vmatprep.subr.mxu1 %v6649_v54  ;;  %v6607_v54 = vld [vmem:[%s11797_s5 + $0x1a0] sm:$0xff] }
 0x490   : > { %7874 = vmatpush3.msra.mxu1 %v6633_v55  ;;  %v6712_v55 = vld [vmem:[%s11797_s5 + $0x4e8] sm:$0xff] }
 0x491   : > { %7875 = vmatprep.subr.mxu1 %v6648_v42  ;;  %v6591_v42 = vld [vmem:[%s11797_s5 + $0x120] sm:$0xff] }
 0x492   : > { %7876 = vmatpush3.msra.mxu1 %v6632_v22  ;;  %v6696_v22 = vld [vmem:[%s11797_s5 + $0x468] sm:$0xff] }
 0x493   : > { %7877 = vmatprep.subr.mxu1 %v6647_v41  ;;  %v6606_v41 = vld [vmem:[%s11797_s5 + $0x198] sm:$0xff] }
 0x494   : > { %7878 = vmatpush3.msra.mxu1 %v6631_v44  ;;  %v6711_v44 = vld [vmem:[%s11797_s5 + $0x4e0] sm:$0xff] }
 0x495   : > { %7879 = vmatprep.subr.mxu1 %v6646_v58  ;;  %v6590_v58 = vld [vmem:[%s11797_s5 + $0x118] sm:$0xff] }
 0x496   : > { %7880 = vmatpush3.msra.mxu1 %v6630_v29  ;;  %v6695_v29 = vld [vmem:[%s11797_s5 + $0x460] sm:$0xff] }
 0x497   : > { %7881 = vmatprep.subr.mxu1 %v6645_v11  ;;  %v6605_v11 = vld [vmem:[%s11797_s5 + $0x190] sm:$0xff] }
 0x498   : > { %7882 = vmatpush3.msra.mxu1 %v6629_v15  ;;  %v6710_v15 = vld [vmem:[%s11797_s5 + $0x4d8] sm:$0xff] }
 0x499   : > { %7883 = vmatprep.subr.mxu1 %v6644_v9  ;;  %v6589_v9 = vld [vmem:[%s11797_s5 + $0x110] sm:$0xff] }
 0x49a   : > { %7884 = vmatpush3.msra.mxu1 %v6628_v33  ;;  %v6694_v33 = vld [vmem:[%s11797_s5 + $0x458] sm:$0xff] }
 0x49b   : > { %7885 = vmatprep.subr.mxu1 %v6643_v46  ;;  %v6604_v46 = vld [vmem:[%s11797_s5 + $0x188] sm:$0xff] }
 0x49c   : > { %7886 = vmatpush3.msra.mxu1 %v6627_v2  ;;  %v6709_v2 = vld [vmem:[%s11797_s5 + $0x4d0] sm:$0xff] }
 0x49d   : > { %7887 = vmatprep.subr.mxu1 %v6642_v1  ;;  %v6588_v1 = vld [vmem:[%s11797_s5 + $0x108] sm:$0xff] }
 0x49e   : > { %7888 = vmatpush3.msra.mxu1 %v6626_v0  ;;  %v6693_v0 = vld [vmem:[%s11797_s5 + $0x450] sm:$0xff] }
 0x49f   : > { %7889 = vmatprep.subr.mxu1 %v6641_v40  ;;  %v6603_v40 = vld [vmem:[%s11797_s5 + $0x180] sm:$0xff] }
 0x4a0   : > { %7890 = vmatpush3.msra.mxu1 %v6625_v23  ;;  %v6708_v23 = vld [vmem:[%s11797_s5 + $0x4c8] sm:$0xff] }
 0x4a1   : > { %7891 = vmatprep.subr.mxu1 %v6640_v10  ;;  %v6587_v10 = vld [vmem:[%s11797_s5 + $0x100] sm:$0xff] }
 0x4a2   : > { %7892 = vmatpush3.msra.mxu1 %v6624_v36  ;;  %v6692_v36 = vld [vmem:[%s11797_s5 + $0x448] sm:$0xff] }
 0x4a3   : > { %7893 = vmatprep.subr.mxu1 %v6639_v51  ;;  %v6682_v51 = vld [vmem:[%s11797_s5 + $0x3f8] sm:$0xff] }
 0x4a4   : > { %7894 = vmatpush3.msra.mxu1 %v6623_v56  ;;  %v6666_v56 = vld [vmem:[%s11797_s5 + $0x378] sm:$0xff] }
 0x4a5   : > { %7895 = vmatprep.subr.mxu1 %v6638_v57  ;;  %v6707_v57 = vld [vmem:[%s11797_s5 + $0x4c0] sm:$0xff] }
 0x4a6   : > { %7896 = vmatpush3.msra.mxu1 %v6622_v13  ;;  %v6681_v13 = vld [vmem:[%s11797_s5 + $0x3f0] sm:$0xff] }
 0x4a7   : > { %7897 = vmatprep.subr.mxu1 %v6637_v4  ;;  %v6691_v4 = vld [vmem:[%s11797_s5 + $0x440] sm:$0xff] }
 0x4a8   : > { %7898 = vmatpush3.msra.mxu1 %v6621_v6  ;;  %v6665_v6 = vld [vmem:[%s11797_s5 + $0x370] sm:$0xff] }
 0x4a9   : > { %7899 = vmatprep.subr.mxu1 %v6636_v50  ;;  %v6706_v50 = vld [vmem:[%s11797_s5 + $0x4b8] sm:$0xff] }
 0x4aa   : > { %7900 = vmatpush3.msra.mxu1 %v6620_v26  ;;  %v6680_v26 = vld [vmem:[%s11797_s5 + $0x3e8] sm:$0xff] }
 0x4ab   : > { %7901 = vmatprep.subr.mxu1 %v6635_v37  ;;  %v6690_v37 = vld [vmem:[%s11797_s5 + $0x438] sm:$0xff] }
 0x4ac   : > { %7902 = vmatpush3.msra.mxu1 %v6619_v14  ;;  %v6664_v14 = vld [vmem:[%s11797_s5 + $0x368] sm:$0xff] }
 0x4ad   : > { %7941 = vmatprep.subr.mxu1 %v6714_v16  ;;  %v6705_v16 = vld [vmem:[%s11797_s5 + $0x4b0] sm:$0xff] }
 0x4df   : > { %v6176_v17 = vpop.f32.mrf.mxu1 }
 0x4e0   : > { %v6189_v39 = vmax.f32 %v5824_v63, %v6176_v17  ;;  %v6599_v63 = vld [vmem:[%s11797_s5 + $0x160] sm:$0xff] }
 0x4e1   : > { %v6178_v18 = vpop.f32.mrf.mxu1  ;;  %v6679_v17 = vld [vmem:[%s11797_s5 + $0x3e0] sm:$0xff] }
 0x4e2   : > { %v6190_v28 = vmax.f32 %v5825_v61, %v6178_v18  ;;  %v6600_v61 = vld [vmem:[%s11797_s5 + $0x168] sm:$0xff]  ;;  %v6689_v18 = vld [vmem:[%s11797_s5 + $0x430] sm:$0xff] }
 0x4e4   : > { %6514 = vmatprep.subr.mxu0 %v6190_v28  ;;  %v6663_v28 = vld [vmem:[%s11797_s5 + $0x360] sm:$0xff] }
 0x4e5   : > { %6515 = vmatpush1.msra.mxu0 %v6189_v39  ;;  %v6704_v39 = vld [vmem:[%s11797_s5 + $0x4a8] sm:$0xff] }
 0x4e6   : > { %7796 = vmatmul.mubr.msk.f32.vlgmr.msra.gmra.mxu0 %vm5023_vm2, %v11254_v35  ;;  %7836 = vmatprep.subr.mxu0 %v6618_v20  ;;  %v6615_v35 = vld [vmem:[%s11797_s5 + $0x1e0] sm:$0xff]  ;;  %v6678_v20 = vld [vmem:[%s11797_s5 + $0x3d8] sm:$0xff] }
 0x4e7   : > { %7837 = vmatpush3.msra.mxu0 %v6602_v21  ;;  %v6688_v21 = vld [vmem:[%s11797_s5 + $0x428] sm:$0xff] }
 0x4e8   : > { %7838 = vmatprep.subr.mxu0 %v6617_v19  ;;  %v6662_v19 = vld [vmem:[%s11797_s5 + $0x358] sm:$0xff] }
 0x4e9   : > { %7839 = vmatpush3.msra.mxu0 %v6601_v59  ;;  %v6703_v59 = vld [vmem:[%s11797_s5 + $0x4a0] sm:$0xff] }
 0x4ea   : > { %7840 = vmatprep.subr.mxu0 %v6616_v12  ;;  %v6677_v12 = vld [vmem:[%s11797_s5 + $0x3d0] sm:$0xff] }
 0x4eb   : > { %7841 = vmatpush3.msra.mxu0 %v6600_v61  ;;  %v6687_v61 = vld [vmem:[%s11797_s5 + $0x420] sm:$0xff] }
 0x4ec   : > { %7842 = vmatprep.subr.mxu0 %v6615_v35  ;;  %v11524_v47 = vpop.f32.mrf.mxu1  ;;  %v6661_v35 = vld [vmem:[%s11797_s5 + $0x350] sm:$0xff] }
 0x4ed   : > { %7843 = vmatpush3.msra.mxu0 %v6599_v63  ;;  %v6702_v63 = vld [vmem:[%s11797_s5 + $0x498] sm:$0xff] }
 0x4ee   : > { %7844 = vmatprep.subr.mxu0 %v6614_v24  ;;  %v6339_v5 = vpop.f32.mrf.mxu1  ;;  %v6676_v24 = vld [vmem:[%s11797_s5 + $0x3c8] sm:$0xff] }
 0x4ef   : > { %7845 = vmatpush3.msra.mxu0 %v6598_v25  ;;  %6856 = vmatprep.mubr.f32.mxu0 %v6339_v5  ;;  %v6686_v25 = vld [vmem:[%s11797_s5 + $0x418] sm:$0xff]  ;;  %v6685_v5 = vld [vmem:[%s11797_s5 + $0x410] sm:$0xff] }
 0x4f0   : > { %7846 = vmatprep.subr.mxu0 %v6613_v60  ;;  %v6701_v60 = vld [vmem:[%s11797_s5 + $0x490] sm:$0xff] }
 0x4f1   : > { %7847 = vmatpush3.msra.mxu0 %v6597_v27  ;;  %v6675_v27 = vld [vmem:[%s11797_s5 + $0x3c0] sm:$0xff] }
 0x4f2   : > { %7848 = vmatprep.subr.mxu0 %v6612_v30  ;;  %v6659_v30 = vld [vmem:[%s11797_s5 + $0x340] sm:$0xff] }
 0x4f3   : > { %7849 = vmatpush3.msra.mxu0 %v6596_v62  ;;  %v6674_v62 = vld [vmem:[%s11797_s5 + $0x3b8] sm:$0xff] }
 0x4f4   : > { %7850 = vmatprep.subr.mxu0 %v6611_v31  ;;  %v6408_v34 = vpop.f32.mrf.mxu0  ;;  %v6658_v31 = vld [vmem:[%s11797_s5 + $0x338] sm:$0xff] }
 0x4f5   : > { %7851 = vmatpush3.msra.mxu0 %v6595_v49  ;;  %v6673_v49 = vld [vmem:[%s11797_s5 + $0x3b0] sm:$0xff] }
 0x4f6   : > { %7852 = vmatprep.subr.mxu0 %v6610_v52  ;;  %v6410_v43 = vpop.f32.mrf.mxu0  ;;  %v6657_v52 = vld [vmem:[%s11797_s5 + $0x330] sm:$0xff] }
 0x4f7   : > { %7853 = vmatpush3.msra.mxu0 %v6594_v32  ;;  %6926 = vmatprep.mubr.f32.mxu1 %v6410_v43  ;;  %v6672_v32 = vld [vmem:[%s11797_s5 + $0x3a8] sm:$0xff]  ;;  %v6670_v43 = vld [vmem:[%s11797_s5 + $0x398] sm:$0xff] }
 0x4f8   : > { %7854 = vmatprep.subr.mxu0 %v6609_v3  ;;  %6927 = vmatmul.mubr.f32.vlgmr.msra.gmra.mxu1 %v6408_v34  ;;  %v6656_v34 = vld [vmem:[%s11797_s5 + $0x328] sm:$0xff]  ;;  %v6671_v3 = vld [vmem:[%s11797_s5 + $0x3a0] sm:$0xff] }
 0x4f9   : > { %7855 = vmatpush3.msra.mxu0 %v6593_v38  ;;  %7942 = vmatpush3.msra.mxu1 %v6698_v8  ;;  %v6655_v38 = vld [vmem:[%s11797_s5 + $0x320] sm:$0xff]  ;;  %v6654_v8 = vld [vmem:[%s11797_s5 + $0x318] sm:$0xff] }
 0x4fa   : > { %7856 = vmatprep.subr.mxu0 %v6608_v45  ;;  %7943 = vmatprep.subr.mxu1 %v6713_v48  ;;  %v6669_v45 = vld [vmem:[%s11797_s5 + $0x390] sm:$0xff] }
 0x4fb   : > { %7857 = vmatpush3.msra.mxu0 %v6592_v53  ;;  %7944 = vmatpush3.msra.mxu1 %v6697_v7  ;;  %v6653_v48 = vld [vmem:[%s11797_s5 + $0x310] sm:$0xff]  ;;  %v6668_v53 = vld [vmem:[%s11797_s5 + $0x388] sm:$0xff] }
 0x4fc   : > { %7858 = vmatprep.subr.mxu0 %v6607_v54  ;;  %7945 = vmatprep.subr.mxu1 %v6712_v55  ;;  %v6652_v7 = vld [vmem:[%s11797_s5 + $0x308] sm:$0xff]  ;;  %v6667_v54 = vld [vmem:[%s11797_s5 + $0x380] sm:$0xff] }
 0x4fd   : > { %7859 = vmatpush3.msra.mxu0 %v6591_v42  ;;  %7946 = vmatpush3.msra.mxu1 %v6696_v22  ;;  %v6651_v55 = vld [vmem:[%s11797_s5 + $0x300] sm:$0xff]  ;;  %v6700_v42 = vld [vmem:[%s11797_s5 + $0x488] sm:$0xff] }
 0x4fe   : > { %7860 = vmatprep.subr.mxu0 %v6606_v41  ;;  %7947 = vmatprep.subr.mxu1 %v6711_v44  ;;  %v6684_v22 = vld [vmem:[%s11797_s5 + $0x408] sm:$0xff]  ;;  %v6699_v41 = vld [vmem:[%s11797_s5 + $0x480] sm:$0xff] }
 0x4ff   : > { %7861 = vmatpush3.msra.mxu0 %v6590_v58  ;;  %7948 = vmatpush3.msra.mxu1 %v6695_v29  ;;  %v6683_v44 = vld [vmem:[%s11797_s5 + $0x400] sm:$0xff] }
 0x500   : > { %7862 = vmatprep.subr.mxu0 %v6605_v11  ;;  %7949 = vmatprep.subr.mxu1 %v6710_v15 }
 0x501   : > { %7863 = vmatpush3.msra.mxu0 %v6589_v9  ;;  %7950 = vmatpush3.msra.mxu1 %v6694_v33 }
 0x502   : > { %7864 = vmatprep.subr.mxu0 %v6604_v46  ;;  %7951 = vmatprep.subr.mxu1 %v6709_v2 }
 0x503   : > { %7865 = vmatpush3.msra.mxu0 %v6588_v1  ;;  %7952 = vmatpush3.msra.mxu1 %v6693_v0  ;;  %v7797_v1 = vld [vmem:[%s11798_s6] ss:$0 sm:$0xff] }
 0x504   : > { %7866 = vmatprep.subr.mxu0 %v6603_v40  ;;  %7953 = vmatprep.subr.mxu1 %v6708_v23 }
 0x505   : > { %7867 = vmatpush3.msra.mxu0 %v6587_v10  ;;  %7954 = vmatpush3.msra.mxu1 %v6692_v36 }
 0x506   : > { %7906 = vmatprep.subr.mxu0 %v6682_v51  ;;  %6857 = vmatmul.mubr.f32.vlgmr.msra.gmra.mxu0 %v11524_v47  ;;  %v6660_v47 = vld [vmem:[%s11797_s5 + $0x348] sm:$0xff] }
 0x507   : > { %7907 = vmatpush3.msra.mxu0 %v6666_v56  ;;  %7955 = vmatprep.subr.mxu1 %v6707_v57 }
 0x508   : > { %7908 = vmatprep.subr.mxu0 %v6681_v13  ;;  %7956 = vmatpush3.msra.mxu1 %v6691_v4 }
 0x509   : > { %7909 = vmatpush3.msra.mxu0 %v6665_v6  ;;  %7957 = vmatprep.subr.mxu1 %v6706_v50 }
 0x50a   : > { %7910 = vmatprep.subr.mxu0 %v6680_v26  ;;  %7958 = vmatpush3.msra.mxu1 %v6690_v37 }
 0x50b   : > { %7911 = vmatpush3.msra.mxu0 %v6664_v14  ;;  %7959 = vmatprep.subr.mxu1 %v6705_v16 }
 0x50c   : > { %7912 = vmatprep.subr.mxu0 %v6679_v17  ;;  %7960 = vmatpush3.msra.mxu1 %v6689_v18 }
 0x50d   : > { %7913 = vmatpush3.msra.mxu0 %v6663_v28  ;;  %7961 = vmatprep.subr.mxu1 %v6704_v39 }
 0x50e   : > { %7914 = vmatprep.subr.mxu0 %v6678_v20  ;;  %7962 = vmatpush3.msra.mxu1 %v6688_v21 }
 0x50f   : > { %7915 = vmatpush3.msra.mxu0 %v6662_v19  ;;  %7963 = vmatprep.subr.mxu1 %v6703_v59 }
 0x510   : > { %7916 = vmatprep.subr.mxu0 %v6677_v12  ;;  %7964 = vmatpush3.msra.mxu1 %v6687_v61 }
 0x511   : > { %7917 = vmatpush3.msra.mxu0 %v6661_v35  ;;  %7965 = vmatprep.subr.mxu1 %v6702_v63 }
 0x512   : > { %7918 = vmatprep.subr.mxu0 %v6676_v24  ;;  %7966 = vmatpush3.msra.mxu1 %v6686_v25 }
 0x513   : > { %7919 = vmatpush3.msra.mxu0 %v6660_v47  ;;  %7967 = vmatprep.subr.mxu1 %v6701_v60 }
 0x514   : > { %7920 = vmatprep.subr.mxu0 %v6675_v27  ;;  %7968 = vmatpush3.msra.mxu1 %v6685_v5 }
 0x515   : > { %7921 = vmatpush3.msra.mxu0 %v6659_v30  ;;  %7969 = vmatprep.subr.mxu1 %v6700_v42 }
 0x516   : > { %7922 = vmatprep.subr.mxu0 %v6674_v62  ;;  %7970 = vmatpush3.msra.mxu1 %v6684_v22 }
 0x517   : > { %7923 = vmatpush3.msra.mxu0 %v6658_v31  ;;  %7971 = vmatprep.subr.mxu1 %v6699_v41 }
 0x518   : > { %7924 = vmatprep.subr.mxu0 %v6673_v49  ;;  %7972 = vmatpush3.msra.mxu1 %v6683_v44 }
 0x519   : > { %7925 = vmatpush3.msra.mxu0 %v6657_v52 }
 0x51a   : > { %7926 = vmatprep.subr.mxu0 %v6672_v32 }
 0x51b   : > { %7927 = vmatpush3.msra.mxu0 %v6656_v34 }
 0x51c   : > { %7928 = vmatprep.subr.mxu0 %v6671_v3 }
 0x51d   : > { %7929 = vmatpush3.msra.mxu0 %v6655_v38 }
 0x51e   : > { %7930 = vmatprep.subr.mxu0 %v6670_v43 }
 0x51f   : > { %7931 = vmatpush3.msra.mxu0 %v6654_v8 }
 0x520   : > { %7932 = vmatprep.subr.mxu0 %v6669_v45 }
 0x521   : > { %7933 = vmatpush3.msra.mxu0 %v6653_v48 }
 0x522   : > { %7934 = vmatprep.subr.mxu0 %v6668_v53 }
 0x523   : > { %7935 = vmatpush3.msra.mxu0 %v6652_v7 }
 0x524   : > { %7936 = vmatprep.subr.mxu0 %v6667_v54 }
 0x525   : > { %7937 = vmatpush3.msra.mxu0 %v6651_v55 }
 0x52d   : > { %v6479_v58 = vpop.f32.mrf.mxu1 }
 0x52f   : > { %v6481_v29 = vpop.f32.mrf.mxu1 }
 0x530   : > { %6996 = vmatprep.mubr.f32.mxu0 %v6481_v29 }
 0x531   : > { %6997 = vmatmul.mubr.f32.vlgmr.msra.gmra.mxu0 %v6479_v58 }
 0x54d   : > { %v7833_v9 = vpop.f32.mrf.mxu1 }
 0x54f   : > { %v7834_v33 = vpop.f32.mrf.mxu1 }
 0x550   : > { %v7835_v2 = vadd.f32 %v7834_v33, %v7833_v9 }
 0x552   : > { %v6789_v23 = vadd.f32 %v7835_v2, %v7797_v1 }
 0x5a6   : > { %v6550_v11 = vpop.f32.mrf.mxu0 }
 0x5a8   : > { %v6552_v15 = vpop.f32.mrf.mxu0 }
 0x5a9   : > { %7066 = vmatprep.mubr.f32.mxu1 %v6552_v15 }
 0x5aa   : > { %7067 = vmatmul.mubr.f32.vlgmr.msra.gmra.mxu1 %v6550_v11 }
 0x5b8   : > { %v7903_v40 = vpop.f32.mrf.mxu1 }
 0x5ba   : > { %v7904_v36 = vpop.f32.mrf.mxu1 }
 0x5bb   : > { %v7905_v57 = vadd.f32 %v7904_v36, %v7903_v40 }
 0x5c6   : > { %v7868_v46 = vpop.f32.mrf.mxu0 }
 0x5c8   : > { %v7869_v0 = vpop.f32.mrf.mxu0 }
 0x5c9   : > { %v7870_v10 = vadd.f32 %v7869_v0, %v7868_v46 }
 0x5cb   : > { %v6859_v56 = vadd.f32 %v7870_v10, %v6789_v23 }
 0x5cd   : > { %v6929_v4 = vadd.f32 %v7905_v57, %v6859_v56 }
 0x5f1   : > { %v7938_v51 = vpop.f32.mrf.mxu0 }
 0x5f3   : > { %v7939_v13 = vpop.f32.mrf.mxu0 }
 0x5f4   : > { %v7940_v6 = vadd.f32 %v7939_v13, %v7938_v51 }
 0x5f6   : > { %v6999_v37 = vadd.f32 %v7940_v6, %v6929_v4 }
 0x66a   : > { %v7973_v50 = vpop.f32.mrf.mxu1 }
 0x66c   : > { %v7974_v26 = vpop.f32.mrf.mxu1 }
 0x66d   : > { %v7975_v14 = vadd.f32 %v7974_v26, %v7973_v50 }
 0x66f   : > { %v7069_v16 = vadd.f32 %v7975_v14, %v6999_v37 }
 0x671   : > { %7072 = vst [vmem:[%s276_s23] sm:$0x7] %v7069_v16 }
 0x672 PF: > { %s17_s24 = sadd.s32 1, %s8953_s24  }
 0x673   : > { %p14_p4 = scmp.ge.s32.totalorder %s17_s24, 4  }
 0x675   :  { %16 = sbr.rel (!%p14_p4) target bundleno = 1 (0x1), region = 78 }

</bundles_post_ra>
